<compile_context>
chip_gen: v7x
topology: tpu7x:2x2x1
jax: 0.10.0
libtpu: 0.0.40
codegen_flags: <defaults>
</compile_context>

<pallas_src>
import jax
import jax.numpy as jnp
from jax.experimental import pallas as pl
from jax.experimental.pallas import tpu as pltpu

_OUT = 512  # postprocess_masks original_size


# ----------------------------------------------------------------------------
# Interpolation-matrix construction (glue, plain JAX; constant-folded under jit).
# Matches PyTorch bilinear semantics for both align_corners modes.
# ----------------------------------------------------------------------------
def _interp_matrix(out_size: int, in_size: int, align_corners: bool):
    i = jnp.arange(out_size, dtype=jnp.float32)
    if align_corners:
        if out_size == 1:
            src = jnp.zeros((out_size,), jnp.float32)
        else:
            src = i * (float(in_size - 1) / float(out_size - 1))
    else:
        src = (i + 0.5) * (float(in_size) / float(out_size)) - 0.5
        src = jnp.maximum(src, 0.0)
    i0 = jnp.clip(jnp.floor(src).astype(jnp.int32), 0, in_size - 1)
    i1 = jnp.minimum(i0 + 1, in_size - 1)
    frac = src - i0.astype(jnp.float32)
    rows = jnp.arange(out_size)
    m = jnp.zeros((out_size, in_size), jnp.float32)
    m = m.at[rows, i0].add(1.0 - frac)
    m = m.at[rows, i1].add(frac)
    return m


# ----------------------------------------------------------------------------
# Small helpers
# ----------------------------------------------------------------------------
def _plane_spec(G, H, W):
    return pl.BlockSpec((G, H, W), lambda g: (g, 0, 0))


def _mat_spec(shape):
    return pl.BlockSpec(shape, lambda g: (0, 0))


def _pick_group(n, max_g=4):
    """Largest divisor of n (<= max_g) that keeps the grid >= 2 steps (v7x TCs)."""
    if n < 2:
        return 1
    best = 1
    for g in range(1, min(max_g, n) + 1):
        if n % g == 0 and n // g >= 2:
            best = g
    return best


def _col_stage(x, mwt):
    """(G, H, W) @ (W, Wout) -> (G, H, Wout) as one lane-dense MXU matmul."""
    G, H, W = x.shape
    t = jnp.dot(x.reshape(G * H, W), mwt, preferred_element_type=jnp.float32)
    return t.reshape(G, H, mwt.shape[1])


# ----------------------------------------------------------------------------
# Kernel 1 (main): fused postprocess — emits autoMask and masks in one call.
# Per grid step: a block of G planes from each of spgen1..4 and low_res_masks.
# ----------------------------------------------------------------------------
def _fused_postprocess_kernel(s1, s2, s3, s4, lrm,
                              mh1, mw1t, mh2, mw2t, mh3, mw3t, mh4, mw4t,
                              mhl, mwlt,
                              auto_ref, masks_ref):
    G = auto_ref.shape[0]
    # Column-interp stage: one batched matmul per input.
    t1 = _col_stage(s1[...], mw1t[...])
    t2 = _col_stage(s2[...], mw2t[...])
    t3 = _col_stage(s3[...], mw3t[...])
    t4 = _col_stage(s4[...], mw4t[...])
    tl = _col_stage(lrm[...], mwlt[...])
    # Row-interp stage + accumulation, per plane (G is a small static constant).
    for g in range(G):
        acc = jnp.dot(mh1[...], t1[g], preferred_element_type=jnp.float32)
        acc = acc + jnp.dot(mh2[...], t2[g], preferred_element_type=jnp.float32)
        acc = acc + jnp.dot(mh3[...], t3[g], preferred_element_type=jnp.float32)
        acc = acc + jnp.dot(mh4[...], t4[g], preferred_element_type=jnp.float32)
        auto_ref[g] = acc
        masks_ref[g] = jnp.dot(mhl[...], tl[g], preferred_element_type=jnp.float32)


# ----------------------------------------------------------------------------
# Kernel 2 (fallback only): single bilinear resize to (512, 512).
# ----------------------------------------------------------------------------
def _resize_kernel(x, mh, mwt, o_ref):
    G = o_ref.shape[0]
    t = _col_stage(x[...], mwt[...])
    for g in range(G):
        o_ref[g] = jnp.dot(mh[...], t[g], preferred_element_type=jnp.float32)


def resize_to_out(x, out_size=_OUT):
    B, C, H, W = x.shape
    n = B * C
    mh = _interp_matrix(out_size, H, False)
    mwt = _interp_matrix(out_size, W, False).T
    G = _pick_group(n)
    xf = x.reshape(n, H, W).astype(jnp.float32)
    out = pl.pallas_call(
        _resize_kernel,
        out_shape=jax.ShapeDtypeStruct((n, out_size, out_size), jnp.float32),
        grid_spec=pltpu.PrefetchScalarGridSpec(
            num_scalar_prefetch=0,
            grid=(n // G,),
            in_specs=[_plane_spec(G, H, W), _mat_spec(mh.shape), _mat_spec(mwt.shape)],
            out_specs=_plane_spec(G, out_size, out_size)),
        compiler_params=pltpu.CompilerParams(
            dimension_semantics=("parallel",),
            vmem_limit_bytes=48 * 1024 * 1024),
    )(xf, mh, mwt)
    return out.reshape(B, C, out_size, out_size)


# ----------------------------------------------------------------------------
# Fused wrapper: builds composed matrices and calls the single pallas_call.
# ----------------------------------------------------------------------------
def fused_postprocess(spgen1, spgen2, spgen3, spgen4, low_res_masks, out_size=_OUT):
    B, C, H4, W4 = spgen4.shape
    n = B * C
    Bl, Cl, Hl, Wl = low_res_masks.shape
    nl = Bl * Cl
    f32 = jnp.float32

    # Final-stage (mid -> 512) matrices, align_corners=False (F.interpolate).
    rh_fin = _interp_matrix(out_size, H4, False)          # (512, H4)
    rw_fin = _interp_matrix(out_size, W4, False)          # (512, W4)

    # Composed matrices for spgen1..3 (upsample ac=True folded into final resize).
    mats = []
    for s in (spgen1, spgen2, spgen3):
        _, _, Hi, Wi = s.shape
        mh = rh_fin @ _interp_matrix(H4, Hi, True)        # (512, Hi)
        mwt = (rw_fin @ _interp_matrix(W4, Wi, True)).T   # (Wi, 512)
        mats.append((mh, mwt))
    mats.append((rh_fin, rw_fin.T))                       # spgen4 goes straight through

    s_planes = [s.reshape(-1, s.shape[2], s.shape[3]).astype(f32)
                for s in (spgen1, spgen2, spgen3, spgen4)]

    if nl == n:
        lrm_in = low_res_masks.reshape(nl, Hl, Wl).astype(f32)
        mhl = _interp_matrix(out_size, Hl, False)
        mwlt = _interp_matrix(out_size, Wl, False).T
    else:
        # TODO(synk): plane counts differ; feed spgen4 as a dummy 5th operand so
        # the fused kernel still emits autoMask, and resize masks separately.
        lrm_in = s_planes[3]
        mhl, mwlt = rh_fin, rw_fin.T

    G = _pick_group(n)
    in_args = s_planes + [lrm_in]
    in_specs = [_plane_spec(G, p.shape[1], p.shape[2]) for p in in_args]
    for mh, mwt in mats:
        in_args += [mh, mwt]
        in_specs += [_mat_spec(mh.shape), _mat_spec(mwt.shape)]
    in_args += [mhl, mwlt]
    in_specs += [_mat_spec(mhl.shape), _mat_spec(mwlt.shape)]

    auto_p, masks_p = pl.pallas_call(
        _fused_postprocess_kernel,
        out_shape=(jax.ShapeDtypeStruct((n, out_size, out_size), f32),
                   jax.ShapeDtypeStruct((n, out_size, out_size), f32)),
        grid_spec=pltpu.PrefetchScalarGridSpec(
            num_scalar_prefetch=0,
            grid=(n // G,),
            in_specs=in_specs,
            out_specs=(_plane_spec(G, out_size, out_size),
                       _plane_spec(G, out_size, out_size))),
        compiler_params=pltpu.CompilerParams(
            dimension_semantics=("parallel",),
            vmem_limit_bytes=48 * 1024 * 1024),
    )(*in_args)

    autoMask = auto_p.reshape(B, C, out_size, out_size)
    if nl == n:
        masks = masks_p.reshape(Bl, Cl, out_size, out_size)
    else:
        masks = resize_to_out(low_res_masks, out_size)
    return masks, autoMask


# ----------------------------------------------------------------------------
# Model.forward equivalent.
# ----------------------------------------------------------------------------
def model_forward(spgen1, spgen2, spgen3, spgen4, low_res_masks, cnn_out):
    # TODO(synk): sam.image_encoder / prompt_encoder / mask_decoder are external
    # SAM submodules; their outputs are provided as inputs.
    masks, autoMask = fused_postprocess(spgen1, spgen2, spgen3, spgen4, low_res_masks)
    return masks, autoMask, cnn_out


# ----------------------------------------------------------------------------
# Pure-JAX reference (PyTorch-semantics two-stage resize) for validation.
# ----------------------------------------------------------------------------
def _ref_resize(x, out_hw, align_corners):
    Hout, Wout = out_hw
    rh = _interp_matrix(Hout, x.shape[2], align_corners)
    rw = _interp_matrix(Wout, x.shape[3], align_corners)
    return jnp.einsum('oh,bchw,pw->bcop', rh, x.astype(jnp.float32), rw)


if __name__ == "__main__":
    key = jax.random.PRNGKey(0)
    k1, k2, k3, k4, k5, k6 = jax.random.split(key, 6)

    B, C = 2, 1
    # spgen4 at 64x64; spgen3 at 32x32 (x2), spgen2 at 16x16 (x4), spgen1 at 8x8 (x8)
    spgen1 = jax.random.normal(k1, (B, C, 8, 8), jnp.float32)
    spgen2 = jax.random.normal(k2, (B, C, 16, 16), jnp.float32)
    spgen3 = jax.random.normal(k3, (B, C, 32, 32), jnp.float32)
    spgen4 = jax.random.normal(k4, (B, C, 64, 64), jnp.float32)
    low_res_masks = jax.random.normal(k5, (B, C, 64, 64), jnp.float32)
    cnn_out = jax.random.normal(k6, (B, C, 64, 64), jnp.float32)

    fwd = jax.jit(model_forward)
    masks, autoMask, cnn_passthru = jax.block_until_ready(
        fwd(spgen1, spgen2, spgen3, spgen4, low_res_masks, cnn_out)
    )

    assert masks.shape == (B, C, 512, 512)
    assert autoMask.shape == (B, C, 512, 512)
    assert cnn_passthru.shape == cnn_out.shape

    # Numerical check against a two-stage (PyTorch-order) reference.
    ref_sum = (_ref_resize(spgen1, (64, 64), True)
               + _ref_resize(spgen2, (64, 64), True)
               + _ref_resize(spgen3, (64, 64), True)
               + spgen4)
    ref_autoMask = _ref_resize(ref_sum, (512, 512), False)
    ref_masks = _ref_resize(low_res_masks, (512, 512), False)
    assert jnp.allclose(autoMask, ref_autoMask, atol=1e-4, rtol=1e-4)
    assert jnp.allclose(masks, ref_masks, atol=1e-4, rtol=1e-4)

    print("KERNEL_OK")
</pallas_src>

<mosaic_0001>
module attributes {stable_mosaic.version = 11 : i64} {
  func.func private @main(%arg0: i32) attributes {dimension_semantics = [#tpu.dimension_semantics<core_parallel>], iteration_bounds = array<i64: 2>, tpu.core_type = #tpu.core_type<sc_scalar_subcore>, window_params = []} {
    return
  }
}

module attributes {stable_mosaic.version = 11 : i64} {
  func.func private @main(%arg0: i32) attributes {dimension_semantics = [#tpu.dimension_semantics<core_parallel>], iteration_bounds = array<i64: 2>, tpu.core_type = #tpu.core_type<sc_scalar_subcore>, window_params = []} {
    return
  }
}

module attributes {stable_mosaic.version = 11 : i64} {
  func.func @_fused_postprocess_kernel(%arg0: i32, %arg1: memref<1x8x8xf32, #tpu.memory_space<vmem>>, %arg2: memref<1x16x16xf32, #tpu.memory_space<vmem>>, %arg3: memref<1x32x32xf32, #tpu.memory_space<vmem>>, %arg4: memref<1x64x64xf32, #tpu.memory_space<vmem>>, %arg5: memref<1x64x64xf32, #tpu.memory_space<vmem>>, %arg6: memref<512x8xf32, #tpu.memory_space<vmem>>, %arg7: memref<8x512xf32, #tpu.memory_space<vmem>>, %arg8: memref<512x16xf32, #tpu.memory_space<vmem>>, %arg9: memref<16x512xf32, #tpu.memory_space<vmem>>, %arg10: memref<512x32xf32, #tpu.memory_space<vmem>>, %arg11: memref<32x512xf32, #tpu.memory_space<vmem>>, %arg12: memref<512x64xf32, #tpu.memory_space<vmem>>, %arg13: memref<64x512xf32, #tpu.memory_space<vmem>>, %arg14: memref<512x64xf32, #tpu.memory_space<vmem>>, %arg15: memref<64x512xf32, #tpu.memory_space<vmem>>, %arg16: memref<1x512x512xf32, #tpu.memory_space<vmem>>, %arg17: memref<1x512x512xf32, #tpu.memory_space<vmem>>) attributes {dimension_semantics = [#tpu.dimension_semantics<parallel>], iteration_bounds = array<i64: 2>, scalar_prefetch = 0 : i64, scratch_operands = 0 : i64, tpu.core_type = #tpu.core_type<tc>, window_params = [{transform_indices = @transform_0, window_bounds = array<i64: 1, 8, 8>}, {transform_indices = @transform_1, window_bounds = array<i64: 1, 16, 16>}, {transform_indices = @transform_2, window_bounds = array<i64: 1, 32, 32>}, {transform_indices = @transform_3, window_bounds = array<i64: 1, 64, 64>}, {transform_indices = @transform_4, window_bounds = array<i64: 1, 64, 64>}, {pipeline_mode = #tpu.pipeline_mode<synchronous>, transform_indices = @transform_5, window_bounds = array<i64: 512, 8>}, {pipeline_mode = #tpu.pipeline_mode<synchronous>, transform_indices = @transform_6, window_bounds = array<i64: 8, 512>}, {pipeline_mode = #tpu.pipeline_mode<synchronous>, transform_indices = @transform_7, window_bounds = array<i64: 512, 16>}, {pipeline_mode = #tpu.pipeline_mode<synchronous>, transform_indices = @transform_8, window_bounds = array<i64: 16, 512>}, {pipeline_mode = #tpu.pipeline_mode<synchronous>, transform_indices = @transform_9, window_bounds = array<i64: 512, 32>}, {pipeline_mode = #tpu.pipeline_mode<synchronous>, transform_indices = @transform_10, window_bounds = array<i64: 32, 512>}, {pipeline_mode = #tpu.pipeline_mode<synchronous>, transform_indices = @transform_11, window_bounds = array<i64: 512, 64>}, {pipeline_mode = #tpu.pipeline_mode<synchronous>, transform_indices = @transform_12, window_bounds = array<i64: 64, 512>}, {pipeline_mode = #tpu.pipeline_mode<synchronous>, transform_indices = @transform_13, window_bounds = array<i64: 512, 64>}, {pipeline_mode = #tpu.pipeline_mode<synchronous>, transform_indices = @transform_14, window_bounds = array<i64: 64, 512>}, {transform_indices = @transform_15, window_bounds = array<i64: 1, 512, 512>}, {transform_indices = @transform_16, window_bounds = array<i64: 1, 512, 512>}]} {
    %c0 = arith.constant 0 : index
    %c0_0 = arith.constant 0 : index
    %c0_1 = arith.constant 0 : index
    %0 = vector.load %arg1[%c0, %c0_0, %c0_1] : memref<1x8x8xf32, #tpu.memory_space<vmem>>, vector<1x8x8xf32>
    %c0_2 = arith.constant 0 : index
    %c0_3 = arith.constant 0 : index
    %1 = vector.load %arg7[%c0_2, %c0_3] : memref<8x512xf32, #tpu.memory_space<vmem>>, vector<8x512xf32>
    %2 = vector.shape_cast %0 : vector<1x8x8xf32> to vector<8x8xf32>
    %cst = arith.constant dense<0.000000e+00> : vector<8x512xf32>
    %3 = tpu.matmul %2, %1, %cst {dimension_numbers = #tpu.dot_dimension_numbers<[1], [0], [0], [1], [0, 0, 1, 1], [], []>} : vector<8x8xf32>, vector<8x512xf32>, vector<8x512xf32> -> vector<8x512xf32>
    %4 = vector.shape_cast %3 : vector<8x512xf32> to vector<1x8x512xf32>
    %c0_4 = arith.constant 0 : index
    %c0_5 = arith.constant 0 : index
    %c0_6 = arith.constant 0 : index
    %5 = vector.load %arg2[%c0_4, %c0_5, %c0_6] : memref<1x16x16xf32, #tpu.memory_space<vmem>>, vector<1x16x16xf32>
    %c0_7 = arith.constant 0 : index
    %c0_8 = arith.constant 0 : index
    %6 = vector.load %arg9[%c0_7, %c0_8] : memref<16x512xf32, #tpu.memory_space<vmem>>, vector<16x512xf32>
    %7 = vector.shape_cast %5 : vector<1x16x16xf32> to vector<16x16xf32>
    %cst_9 = arith.constant dense<0.000000e+00> : vector<16x512xf32>
    %8 = tpu.matmul %7, %6, %cst_9 {dimension_numbers = #tpu.dot_dimension_numbers<[1], [0], [0], [1], [0, 0, 1, 1], [], []>} : vector<16x16xf32>, vector<16x512xf32>, vector<16x512xf32> -> vector<16x512xf32>
    %9 = vector.shape_cast %8 : vector<16x512xf32> to vector<1x16x512xf32>
    %c0_10 = arith.constant 0 : index
    %c0_11 = arith.constant 0 : index
    %c0_12 = arith.constant 0 : index
    %10 = vector.load %arg3[%c0_10, %c0_11, %c0_12] : memref<1x32x32xf32, #tpu.memory_space<vmem>>, vector<1x32x32xf32>
    %c0_13 = arith.constant 0 : index
    %c0_14 = arith.constant 0 : index
    %11 = vector.load %arg11[%c0_13, %c0_14] : memref<32x512xf32, #tpu.memory_space<vmem>>, vector<32x512xf32>
    %12 = vector.shape_cast %10 : vector<1x32x32xf32> to vector<32x32xf32>
    %cst_15 = arith.constant dense<0.000000e+00> : vector<32x512xf32>
    %13 = tpu.matmul %12, %11, %cst_15 {dimension_numbers = #tpu.dot_dimension_numbers<[1], [0], [0], [1], [0, 0, 1, 1], [], []>} : vector<32x32xf32>, vector<32x512xf32>, vector<32x512xf32> -> vector<32x512xf32>
    %14 = vector.shape_cast %13 : vector<32x512xf32> to vector<1x32x512xf32>
    %c0_16 = arith.constant 0 : index
    %c0_17 = arith.constant 0 : index
    %c0_18 = arith.constant 0 : index
    %15 = vector.load %arg4[%c0_16, %c0_17, %c0_18] : memref<1x64x64xf32, #tpu.memory_space<vmem>>, vector<1x64x64xf32>
    %c0_19 = arith.constant 0 : index
    %c0_20 = arith.constant 0 : index
    %16 = vector.load %arg13[%c0_19, %c0_20] : memref<64x512xf32, #tpu.memory_space<vmem>>, vector<64x512xf32>
    %17 = vector.shape_cast %15 : vector<1x64x64xf32> to vector<64x64xf32>
    %cst_21 = arith.constant dense<0.000000e+00> : vector<64x512xf32>
    %18 = tpu.matmul %17, %16, %cst_21 {dimension_numbers = #tpu.dot_dimension_numbers<[1], [0], [0], [1], [0, 0, 1, 1], [], []>} : vector<64x64xf32>, vector<64x512xf32>, vector<64x512xf32> -> vector<64x512xf32>
    %19 = vector.shape_cast %18 : vector<64x512xf32> to vector<1x64x512xf32>
    %c0_22 = arith.constant 0 : index
    %c0_23 = arith.constant 0 : index
    %c0_24 = arith.constant 0 : index
    %20 = vector.load %arg5[%c0_22, %c0_23, %c0_24] : memref<1x64x64xf32, #tpu.memory_space<vmem>>, vector<1x64x64xf32>
    %c0_25 = arith.constant 0 : index
    %c0_26 = arith.constant 0 : index
    %21 = vector.load %arg15[%c0_25, %c0_26] : memref<64x512xf32, #tpu.memory_space<vmem>>, vector<64x512xf32>
    %22 = vector.shape_cast %20 : vector<1x64x64xf32> to vector<64x64xf32>
    %cst_27 = arith.constant dense<0.000000e+00> : vector<64x512xf32>
    %23 = tpu.matmul %22, %21, %cst_27 {dimension_numbers = #tpu.dot_dimension_numbers<[1], [0], [0], [1], [0, 0, 1, 1], [], []>} : vector<64x64xf32>, vector<64x512xf32>, vector<64x512xf32> -> vector<64x512xf32>
    %24 = vector.shape_cast %23 : vector<64x512xf32> to vector<1x64x512xf32>
    %c0_28 = arith.constant 0 : index
    %c0_29 = arith.constant 0 : index
    %25 = vector.load %arg6[%c0_28, %c0_29] : memref<512x8xf32, #tpu.memory_space<vmem>>, vector<512x8xf32>
    %26 = vector.shape_cast %4 : vector<1x8x512xf32> to vector<8x512xf32>
    %cst_30 = arith.constant dense<0.000000e+00> : vector<512x512xf32>
    %27 = tpu.matmul %25, %26, %cst_30 {dimension_numbers = #tpu.dot_dimension_numbers<[1], [0], [0], [1], [0, 0, 1, 1], [], []>} : vector<512x8xf32>, vector<8x512xf32>, vector<512x512xf32> -> vector<512x512xf32>
    %c0_31 = arith.constant 0 : index
    %c0_32 = arith.constant 0 : index
    %28 = vector.load %arg8[%c0_31, %c0_32] : memref<512x16xf32, #tpu.memory_space<vmem>>, vector<512x16xf32>
    %29 = vector.shape_cast %9 : vector<1x16x512xf32> to vector<16x512xf32>
    %cst_33 = arith.constant dense<0.000000e+00> : vector<512x512xf32>
    %30 = tpu.matmul %28, %29, %cst_33 {dimension_numbers = #tpu.dot_dimension_numbers<[1], [0], [0], [1], [0, 0, 1, 1], [], []>} : vector<512x16xf32>, vector<16x512xf32>, vector<512x512xf32> -> vector<512x512xf32>
    %31 = arith.addf %27, %30 : vector<512x512xf32>
    %c0_34 = arith.constant 0 : index
    %c0_35 = arith.constant 0 : index
    %32 = vector.load %arg10[%c0_34, %c0_35] : memref<512x32xf32, #tpu.memory_space<vmem>>, vector<512x32xf32>
    %33 = vector.shape_cast %14 : vector<1x32x512xf32> to vector<32x512xf32>
    %cst_36 = arith.constant dense<0.000000e+00> : vector<512x512xf32>
    %34 = tpu.matmul %32, %33, %cst_36 {dimension_numbers = #tpu.dot_dimension_numbers<[1], [0], [0], [1], [0, 0, 1, 1], [], []>} : vector<512x32xf32>, vector<32x512xf32>, vector<512x512xf32> -> vector<512x512xf32>
    %35 = arith.addf %31, %34 : vector<512x512xf32>
    %c0_37 = arith.constant 0 : index
    %c0_38 = arith.constant 0 : index
    %36 = vector.load %arg12[%c0_37, %c0_38] : memref<512x64xf32, #tpu.memory_space<vmem>>, vector<512x64xf32>
    %37 = vector.shape_cast %19 : vector<1x64x512xf32> to vector<64x512xf32>
    %cst_39 = arith.constant dense<0.000000e+00> : vector<512x512xf32>
    %38 = tpu.matmul %36, %37, %cst_39 {dimension_numbers = #tpu.dot_dimension_numbers<[1], [0], [0], [1], [0, 0, 1, 1], [], []>} : vector<512x64xf32>, vector<64x512xf32>, vector<512x512xf32> -> vector<512x512xf32>
    %39 = arith.addf %35, %38 : vector<512x512xf32>
    %c0_40 = arith.constant 0 : index
    %c0_41 = arith.constant 0 : index
    %c0_42 = arith.constant 0 : index
    %40 = vector.load %arg16[%c0_40, %c0_41, %c0_42] : memref<1x512x512xf32, #tpu.memory_space<vmem>>, vector<1x512x512xf32>
    %41 = vector.shape_cast %40 : vector<1x512x512xf32> to vector<512x512xf32>
    %42 = vector.shape_cast %39 : vector<512x512xf32> to vector<1x512x512xf32>
    tpu.vector_store %arg16[%c0_40, %c0_41, %c0_42], %42 {strides = array<i32>} : memref<1x512x512xf32, #tpu.memory_space<vmem>>, vector<1x512x512xf32>,
    %c0_43 = arith.constant 0 : index
    %c0_44 = arith.constant 0 : index
    %43 = vector.load %arg14[%c0_43, %c0_44] : memref<512x64xf32, #tpu.memory_space<vmem>>, vector<512x64xf32>
    %44 = vector.shape_cast %24 : vector<1x64x512xf32> to vector<64x512xf32>
    %cst_45 = arith.constant dense<0.000000e+00> : vector<512x512xf32>
    %45 = tpu.matmul %43, %44, %cst_45 {dimension_numbers = #tpu.dot_dimension_numbers<[1], [0], [0], [1], [0, 0, 1, 1], [], []>} : vector<512x64xf32>, vector<64x512xf32>, vector<512x512xf32> -> vector<512x512xf32>
    %c0_46 = arith.constant 0 : index
    %c0_47 = arith.constant 0 : index
    %c0_48 = arith.constant 0 : index
    %46 = vector.load %arg17[%c0_46, %c0_47, %c0_48] : memref<1x512x512xf32, #tpu.memory_space<vmem>>, vector<1x512x512xf32>
    %47 = vector.shape_cast %46 : vector<1x512x512xf32> to vector<512x512xf32>
    %48 = vector.shape_cast %45 : vector<512x512xf32> to vector<1x512x512xf32>
    tpu.vector_store %arg17[%c0_46, %c0_47, %c0_48], %48 {strides = array<i32>} : memref<1x512x512xf32, #tpu.memory_space<vmem>>, vector<1x512x512xf32>,
    return
  }
  func.func @transform_0(%arg0: i32) -> (i32, i32, i32) {
    %c0_i32 = arith.constant 0 : i32
    %c0_i32_0 = arith.constant 0 : i32
    %c0_i32_1 = arith.constant 0 : i32
    return %arg0, %c0_i32, %c0_i32_0 : i32, i32, i32
  }
  func.func @transform_1(%arg0: i32) -> (i32, i32, i32) {
    %c0_i32 = arith.constant 0 : i32
    %c0_i32_0 = arith.constant 0 : i32
    %c0_i32_1 = arith.constant 0 : i32
    return %arg0, %c0_i32, %c0_i32_0 : i32, i32, i32
  }
  func.func @transform_2(%arg0: i32) -> (i32, i32, i32) {
    %c0_i32 = arith.constant 0 : i32
    %c0_i32_0 = arith.constant 0 : i32
    %c0_i32_1 = arith.constant 0 : i32
    return %arg0, %c0_i32, %c0_i32_0 : i32, i32, i32
  }
  func.func @transform_3(%arg0: i32) -> (i32, i32, i32) {
    %c0_i32 = arith.constant 0 : i32
    %c0_i32_0 = arith.constant 0 : i32
    %c0_i32_1 = arith.constant 0 : i32
    return %arg0, %c0_i32, %c0_i32_0 : i32, i32, i32
  }
  func.func @transform_4(%arg0: i32) -> (i32, i32, i32) {
    %c0_i32 = arith.constant 0 : i32
    %c0_i32_0 = arith.constant 0 : i32
    %c0_i32_1 = arith.constant 0 : i32
    return %arg0, %c0_i32, %c0_i32_0 : i32, i32, i32
  }
  func.func @transform_5(%arg0: i32) -> (i32, i32) {
    %c0_i32 = arith.constant 0 : i32
    %c0_i32_0 = arith.constant 0 : i32
    %c0_i32_1 = arith.constant 0 : i32
    return %c0_i32, %c0_i32_0 : i32, i32
  }
  func.func @transform_6(%arg0: i32) -> (i32, i32) {
    %c0_i32 = arith.constant 0 : i32
    %c0_i32_0 = arith.constant 0 : i32
    %c0_i32_1 = arith.constant 0 : i32
    return %c0_i32, %c0_i32_0 : i32, i32
  }
  func.func @transform_7(%arg0: i32) -> (i32, i32) {
    %c0_i32 = arith.constant 0 : i32
    %c0_i32_0 = arith.constant 0 : i32
    %c0_i32_1 = arith.constant 0 : i32
    return %c0_i32, %c0_i32_0 : i32, i32
  }
  func.func @transform_8(%arg0: i32) -> (i32, i32) {
    %c0_i32 = arith.constant 0 : i32
    %c0_i32_0 = arith.constant 0 : i32
    %c0_i32_1 = arith.constant 0 : i32
    return %c0_i32, %c0_i32_0 : i32, i32
  }
  func.func @transform_9(%arg0: i32) -> (i32, i32) {
    %c0_i32 = arith.constant 0 : i32
    %c0_i32_0 = arith.constant 0 : i32
    %c0_i32_1 = arith.constant 0 : i32
    return %c0_i32, %c0_i32_0 : i32, i32
  }
  func.func @transform_10(%arg0: i32) -> (i32, i32) {
    %c0_i32 = arith.constant 0 : i32
    %c0_i32_0 = arith.constant 0 : i32
    %c0_i32_1 = arith.constant 0 : i32
    return %c0_i32, %c0_i32_0 : i32, i32
  }
  func.func @transform_11(%arg0: i32) -> (i32, i32) {
    %c0_i32 = arith.constant 0 : i32
    %c0_i32_0 = arith.constant 0 : i32
    %c0_i32_1 = arith.constant 0 : i32
    return %c0_i32, %c0_i32_0 : i32, i32
  }
  func.func @transform_12(%arg0: i32) -> (i32, i32) {
    %c0_i32 = arith.constant 0 : i32
    %c0_i32_0 = arith.constant 0 : i32
    %c0_i32_1 = arith.constant 0 : i32
    return %c0_i32, %c0_i32_0 : i32, i32
  }
  func.func @transform_13(%arg0: i32) -> (i32, i32) {
    %c0_i32 = arith.constant 0 : i32
    %c0_i32_0 = arith.constant 0 : i32
    %c0_i32_1 = arith.constant 0 : i32
    return %c0_i32, %c0_i32_0 : i32, i32
  }
  func.func @transform_14(%arg0: i32) -> (i32, i32) {
    %c0_i32 = arith.constant 0 : i32
    %c0_i32_0 = arith.constant 0 : i32
    %c0_i32_1 = arith.constant 0 : i32
    return %c0_i32, %c0_i32_0 : i32, i32
  }
  func.func @transform_15(%arg0: i32) -> (i32, i32, i32) {
    %c0_i32 = arith.constant 0 : i32
    %c0_i32_0 = arith.constant 0 : i32
    %c0_i32_1 = arith.constant 0 : i32
    return %arg0, %c0_i32, %c0_i32_0 : i32, i32, i32
  }
  func.func @transform_16(%arg0: i32) -> (i32, i32, i32) {
    %c0_i32 = arith.constant 0 : i32
    %c0_i32_0 = arith.constant 0 : i32
    %c0_i32_1 = arith.constant 0 : i32
    return %arg0, %c0_i32, %c0_i32_0 : i32, i32, i32
  }
}

</mosaic_0001>

<bundles_post_ra>
// kernel: model_forward.1
= control target key start
LH: loop header
LB: loop body
LE: loop exit
PB: predicated region body
PF: predicated region fallthrough
CT: control target
= control target key end

     0   :  { %s14252_s0 = inlined_call_operand.vmem [shape: f32[2,8,8], index: 0, kind: input, shape index: {}]   ;;  %s14253_s1 = inlined_call_operand.vmem [shape: f32[2,16,16], index: 1, kind: input, shape index: {}]   ;;  %s14254_s2 = inlined_call_operand.vmem [shape: f32[2,32,32], index: 2, kind: input, shape index: {}]   ;;  %s14255_s3 = inlined_call_operand.vmem [shape: f32[2,64,64], index: 3, kind: input, shape index: {}]   ;;  %s14256_s4 = inlined_call_operand.vmem [shape: f32[2,64,64], index: 4, kind: input, shape index: {}]   ;;  %s14257_s5 = inlined_call_operand.vmem [shape: f32[512,8], index: 5, kind: input, shape index: {}]   ;;  %s14258_s6 = inlined_call_operand.vmem [shape: f32[8,512], index: 6, kind: input, shape index: {}]   ;;  %s14259_s7 = inlined_call_operand.vmem [shape: f32[512,16], index: 7, kind: input, shape index: {}]   ;;  %s14260_s8 = inlined_call_operand.vmem [shape: f32[16,512], index: 8, kind: input, shape index: {}]   ;;  %s14261_s9 = inlined_call_operand.vmem [shape: f32[512,32], index: 9, kind: input, shape index: {}]   ;;  %s14262_s10 = inlined_call_operand.vmem [shape: f32[32,512], index: 10, kind: input, shape index: {}]   ;;  %s14263_s11 = inlined_call_operand.vmem [shape: f32[512,64], index: 11, kind: input, shape index: {}, may-alias: {11,13}]   ;;  %s14264_s12 = inlined_call_operand.vmem [shape: f32[64,512], index: 12, kind: input, shape index: {}, may-alias: {12,14}]   ;;  %s14265_s13 = inlined_call_operand.vmem [shape: f32[512,64], index: 13, kind: input, shape index: {}, may-alias: {11,13}]   ;;  %s14266_s14 = inlined_call_operand.vmem [shape: f32[64,512], index: 14, kind: input, shape index: {}, may-alias: {12,14}]   ;;  %s14267_s15 = inlined_call_operand.hbm [shape: f32[2,512,512], index: 15, kind: output, shape index: {0}]   ;;  %s14268_s16 = inlined_call_operand.hbm [shape: f32[2,512,512], index: 16, kind: output, shape index: {1}]  }
   0x1   :  { %14297 = sst [smem:[#allocation33_spill]] %s14252_s0 }
   0x2   :  { %14298 = sst [smem:[#allocation34_spill]] %s14258_s6 }
   0x3   :  { %14299 = sst [smem:[#allocation35_spill]] %s14260_s8 }
   0x4   :  { %14300 = sst [smem:[#allocation36_spill]] %s14268_s16 }
   0x5   :  { %22 = vsyncpa [#allocation3], 0 }
   0x6   :  { %24 = vsyncpa [#allocation3 + $0x1], 0 }
   0x7   :  { %25 = vsyncpa [#allocation5], 0 }
   0x8   :  { %27 = vsyncpa [#allocation5 + $0x1], 0  ;;  %s10585_s21 = smov 0   ;;  %s10587_s22 = smov 0  }
   0x9   :  { %s10589_s23 = smov 0   ;;  %s10591_s24 = smov 0  }
   0xa LB: > { %14301 = sst [smem:[#allocation8_spill]] %s10481_s21  ;;  %s10606_s25 = sadd.s32 4294967295, %s10493_s24   ;;  %s10493_s24 = sphi %s10591_s24, %s14393_s24   ;;  %s10489_s23 = sphi %s10589_s23, %s14395_s23   ;;  %s10485_s22 = sphi %s10587_s22, %s14397_s22   ;;  %s10481_s21 = sphi %s10585_s21, %s14396_s21  }
   0xb   : > { %14302 = sst [smem:[#allocation9_spill]] %s10489_s23  ;;  %s8693_s26 = sadd.s32 4294967294, %s10493_s24  }
   0xc   : > { %14303 = sst [smem:[#allocation10_spill]] %s10493_s24  ;;  %s10610_s27 = sadd.s32 1, %s10493_s24  }
   0xd   : > { %14304 = sst [smem:[#allocation11_spill]] %s10610_s27  ;;  %s380_s28 = sadd.s32 1, %s10489_s23 }
   0xe   : > { %s377_s29 = ssub.s32 %s10493_s24, %s10610_s27  ;;  %p390_p0 = scmp.ne.s32.totalorder %s10489_s23, %s10485_s22 }
   0xf   : > { %p378_p1 = scmp.eq.s32.totalorder %s377_s29, 0  ;;  %p391_p2 = scmp.eq.s32.totalorder %s10606_s25, 1 }
  0x10   : > { %p396_p3 = scmp.ne.s32.totalorder %s10485_s22, %s10481_s21  ;;  %p397_p4 = scmp.eq.s32.totalorder %s8693_s26, 1 }
  0x11   : > { %s10621_s30 = scalar_select %p378_p1, %s10489_s23, %s380_s28  }
  0x12   : > { %p10623_p5 = por %p391_p2, %p390_p0  ;;  %p10627_p6 = por %p397_p4, %p396_p3 }
  0x13   : > { %14305 = sst [smem:[#allocation12_spill]] %s10621_s30  ;;  %p8696_p7 = scmp.ge.s32.totalorder %s10493_s24, 1 }
  0x14   : > { %s14307_s17 = scalar_select %p10627_p6, 1, 0 }
  0x15   : > { %p510_p8 = scmp.lt.s32.totalorder %s10493_s24, 3 }
  0x16   : > { %14308 = sst [smem:[#allocation13_spill]] %s14307_s17 }
  0x17   : > { %p511_p9 = pnand %p8696_p7, %p510_p8 }
  0x19   : > { %514 = sbr.rel (%p511_p9) target bundleno = 1774 (0x6ee), region = 80 }
  0x20   : > { %s14309_s6 = sld [smem:[#allocation34_spill]]  ;;  %p584_p10 = scmp.lt.s32.totalorder %s10606_s25, 1  ;;  %v14276_v6 = vmov 0.0   ;;  %vm613_vm0 = vcmask 64512   ;;  %v935_v17 = vld [vmem:[%s14262_s10 + $0x8] sm:$0xff]  ;;  %v937_v19 = vld [vmem:[%s14262_s10 + $0x18] sm:$0xff] }
  0x21   : > { %s14310_s8 = sld [smem:[#allocation35_spill]]  ;;  %681 = vmatprep.mubr.f32.mxu0 %v14276_v6  ;;  %752 = vmatprep.mubr.f32.mxu1 %v14276_v6  ;;  %v939_v18 = vld [vmem:[%s14262_s10 + $0x28] sm:$0xff]  ;;  %s14311_s28 = sld [smem:[#allocation33_spill]]  ;;  %v941_v20 = vld [vmem:[%s14262_s10 + $0x38] sm:$0xff]  ;;  %v934_v21 = vld [vmem:[%s14262_s10] sm:$0xff]  ;;  %vm769_vm1 = vcmask 130048  }
  0x22   : > { %s10654_s20 = scalar_select %p584_p10, %s10606_s25, 1  ;;  %v938_v22 = vld [vmem:[%s14262_s10 + $0x20] sm:$0xff]  ;;  %v9416_v24 = vpack.c.bf16 %v939_v18, %v935_v17  ;;  %v9424_v25 = vpack.c.bf16 %v941_v20, %v937_v19  ;;  %v936_v26 = vld [vmem:[%s14262_s10 + $0x10] sm:$0xff]  ;;  %v943_v28 = vld [vmem:[%s14262_s10 + $0x48] sm:$0xff]  ;;  %vm950_vm2 = vcmask 261120   ;;  %vm1181_vm3 = vcmask 523264  }
  0x23   : > { %v940_v27 = vld [vmem:[%s14262_s10 + $0x30] sm:$0xff]  ;;  %v947_v29 = vld [vmem:[%s14262_s10 + $0x68] sm:$0xff]  ;;  %v945_v30 = vld [vmem:[%s14262_s10 + $0x58] sm:$0xff]  ;;  %v9418_v33 = vpack.c.bf16 %v938_v22, %v934_v21 }
  0x24   : > { %s8699_s23 = sshll.u32 %s10654_s20, 3  ;;  %s9402_s17 = sshll.u32 %s10654_s20, 4  ;;  %v949_v32 = vld [vmem:[%s14262_s10 + $0x78] sm:$0xff]  ;;  %v9426_v34 = vpack.c.bf16 %v940_v27, %v936_v26  ;;  %v942_v35 = vld [vmem:[%s14262_s10 + $0x40] sm:$0xff]  ;;  %v9420_v37 = vpack.c.bf16 %v947_v29, %v943_v28  ;;  %v944_v39 = vld [vmem:[%s14262_s10 + $0x50] sm:$0xff] }
  0x25   : > { %s592_s24 = scalar_lea.vmem %s14253_s1, %s9402_s17  ;;  %v946_v36 = vld [vmem:[%s14262_s10 + $0x60] sm:$0xff]  ;;  %v9428_v38 = vpack.c.bf16 %v949_v32, %v945_v30  ;;  %v948_v40 = vld [vmem:[%s14262_s10 + $0x70] sm:$0xff]  ;;  %v1150_v41 = vld [vmem:[%s14264_s12 + $0x8] sm:$0xff]  ;;  %s9403_s29 = sshll.u32 %s10654_s20, 5 }
  0x26   : > { %v610_v0 = vld [vmem:[%s14309_s6 + $0x8] sm:$0xff]  ;;  %v612_v1 = vld [vmem:[%s14309_s6 + $0x18] sm:$0xff]  ;;  %v609_v2 = vld [vmem:[%s14309_s6] sm:$0xff]  ;;  %v9422_v46 = vpack.c.bf16 %v946_v36, %v942_v35  ;;  %v9430_v47 = vpack.c.bf16 %v948_v40, %v944_v39  ;;  %s10758_s30 = scalar_lea.vmem %s14254_s2, %s9403_s29 }
  0x27   : > { %617 = vmatprep.subr.mxu0 %v610_v0  ;;  %688 = vmatprep.subr.mxu1 %v612_v1  ;;  %v611_v3 = vld [vmem:[%s14309_s6 + $0x10] sm:$0xff]  ;;  %v762_v4 = vld [vmem:[%s14310_s8 + $0x8] sm:$0xff]  ;;  %v764_v8 = vld [vmem:[%s14310_s8 + $0x18] sm:$0xff]  ;;  %s9404_s6 = sshll.u32 %s10654_s20, 6 }
  0x28   : > { %v766_v5 = vld [vmem:[%s14310_s8 + $0x28] sm:$0xff]  ;;  %618 = vmatpush1.msra.mxu0 %v609_v2  ;;  %v768_v9 = vld [vmem:[%s14310_s8 + $0x38] sm:$0xff]  ;;  %v761_v10 = vld [vmem:[%s14310_s8] sm:$0xff]  ;;  %689 = vmatpush1.msra.mxu1 %v611_v3  ;;  %s10877_s27 = scalar_lea.vmem %s14255_s3, %s9404_s6  ;;  %s11010_s26 = scalar_lea.vmem %s14256_s4, %s9404_s6 }
  0x29   : > { %v9408_v7 = vpack.c.bf16 %v766_v5, %v762_v4  ;;  %v9412_v11 = vpack.c.bf16 %v768_v9, %v764_v8  ;;  %v765_v12 = vld [vmem:[%s14310_s8 + $0x20] sm:$0xff]  ;;  %v763_v13 = vld [vmem:[%s14310_s8 + $0x10] sm:$0xff]  ;;  %v1154_v42 = vld [vmem:[%s14264_s12 + $0x28] sm:$0xff] }
  0x2a   : > { %v767_v14 = vld [vmem:[%s14310_s8 + $0x30] sm:$0xff]  ;;  %v9410_v15 = vpack.c.bf16 %v765_v12, %v761_v10  ;;  %s587_s8 = scalar_lea.vmem %s14311_s28, %s8699_s23  ;;  %v759_v31 = vld [vmem:[%s592_s24] sm:$0xff]  ;;  %v1152_v43 = vld [vmem:[%s14264_s12 + $0x18] sm:$0xff]  ;;  %v9432_v49 = vpack.c.bf16 %v1154_v42, %v1150_v41 }
  0x2b   : > { %9409 = vmatprep.subr.bf16.mxu0 %v9408_v7  ;;  %v9414_v16 = vpack.c.bf16 %v767_v14, %v763_v13  ;;  %9413 = vmatprep.subr.bf16.mxu1 %v9412_v11  ;;  %v608_v23 = vld [vmem:[%s587_s8] sm:$0xff]  ;;  %v1156_v44 = vld [vmem:[%s14264_s12 + $0x38] sm:$0xff]  ;;  %v760_v45 = vld [vmem:[%s592_s24 + $0x8] sm:$0xff]  ;;  %s9406_s24 = sshll.u32 %s10606_s25, 15 }
  0x2c   : > { %8708 = vmatmul.mubr.msk.f32.vlgmr.msra.gmra.mrb[0].mxu0 %vm613_vm0, %v608_v23  ;;  %8709 = vmatmul.mubr.msk.f32.vlgmr.msra.gmra.mrb[0].mxu1 %vm613_vm0, %v608_v23  ;;  %v1149_v48 = vld [vmem:[%s14264_s12] sm:$0xff]  ;;  %v9448_v50 = vpack.c.bf16 %v1156_v44, %v1152_v43  ;;  %v1151_v52 = vld [vmem:[%s14264_s12 + $0x10] sm:$0xff]  ;;  %v1158_v54 = vld [vmem:[%s14264_s12 + $0x48] sm:$0xff]  ;;  %s14038_s23 = scalar_lea.hbm %s14267_s15, %s9406_s24 }
  0x2d   : > { %9411 = vmatpush1.bf16.msra.mxu0 %v9410_v15  ;;  %9415 = vmatpush1.bf16.msra.mxu1 %v9414_v16  ;;  %v1153_v51 = vld [vmem:[%s14264_s12 + $0x20] sm:$0xff]  ;;  %v1155_v53 = vld [vmem:[%s14264_s12 + $0x30] sm:$0xff]  ;;  %v1162_v55 = vld [vmem:[%s14264_s12 + $0x68] sm:$0xff] }
  0x2e   : > { %840 = vmatprep.mubr.f32.mxu0 %v14276_v6  ;;  %917 = vmatprep.mubr.f32.mxu1 %v14276_v6  ;;  %v1160_v56 = vld [vmem:[%s14264_s12 + $0x58] sm:$0xff]  ;;  %v930_v58 = vld [vmem:[%s10758_s30] sm:$0xff]  ;;  %v9434_v59 = vpack.c.bf16 %v1153_v51, %v1149_v48  ;;  %v9450_v60 = vpack.c.bf16 %v1155_v53, %v1151_v52  ;;  %v1159_v63 = vld [vmem:[%s14264_s12 + $0x50] sm:$0xff]  ;;  %v9436_v1 = vpack.c.bf16 %v1162_v55, %v1158_v54 }
  0x2f   : > { %9417 = vmatprep.subr.bf16.mxu0 %v9416_v24  ;;  %9425 = vmatprep.subr.bf16.mxu1 %v9424_v25  ;;  %v1164_v57 = vld [vmem:[%s14264_s12 + $0x78] sm:$0xff]  ;;  %v1157_v61 = vld [vmem:[%s14264_s12 + $0x40] sm:$0xff]  ;;  %v1163_v0 = vld [vmem:[%s14264_s12 + $0x70] sm:$0xff] }
  0x30   : > { %8710 = vmatmul.mubr.msk.f32.vlgmr.msra.gmra.mrb[2].mxu0 %vm769_vm1, %v759_v31  ;;  %8712 = vmatmul.mubr.msk.f32.vlgmr.msra.gmra.mrb[2].mxu1 %vm769_vm1, %v759_v31  ;;  %v1161_v62 = vld [vmem:[%s14264_s12 + $0x60] sm:$0xff]  ;;  %v9452_v2 = vpack.c.bf16 %v1164_v57, %v1160_v56  ;;  %v1166_v3 = vld [vmem:[%s14264_s12 + $0x88] sm:$0xff]  ;;  %v1168_v5 = vld [vmem:[%s14264_s12 + $0x98] sm:$0xff]  ;;  %v9454_v10 = vpack.c.bf16 %v1163_v0, %v1159_v63 }
  0x31   : > { %846 = vmatprep.mubr.f32.mxu0 %v14276_v6  ;;  %923 = vmatprep.mubr.f32.mxu1 %v14276_v6  ;;  %v1170_v4 = vld [vmem:[%s14264_s12 + $0xa8] sm:$0xff]  ;;  %v1172_v7 = vld [vmem:[%s14264_s12 + $0xb8] sm:$0xff]  ;;  %v9438_v9 = vpack.c.bf16 %v1161_v62, %v1157_v61  ;;  %v1165_v11 = vld [vmem:[%s14264_s12 + $0x80] sm:$0xff] }
  0x32   : > { %9419 = vmatpush1.bf16.msra.mxu0 %v9418_v33  ;;  %9427 = vmatpush1.bf16.msra.mxu1 %v9426_v34  ;;  %v931_v8 = vld [vmem:[%s10758_s30 + $0x8] sm:$0xff]  ;;  %v1169_v12 = vld [vmem:[%s14264_s12 + $0xa0] sm:$0xff]  ;;  %v1167_v13 = vld [vmem:[%s14264_s12 + $0x90] sm:$0xff]  ;;  %v9440_v15 = vpack.c.bf16 %v1170_v4, %v1166_v3  ;;  %v9456_v16 = vpack.c.bf16 %v1172_v7, %v1168_v5 }
  0x33   : > { %9421 = vmatprep.subr.bf16.mxu0 %v9420_v37  ;;  %9429 = vmatprep.subr.bf16.mxu1 %v9428_v38  ;;  %v1171_v14 = vld [vmem:[%s14264_s12 + $0xb0] sm:$0xff]  ;;  %v1174_v17 = vld [vmem:[%s14264_s12 + $0xc8] sm:$0xff]  ;;  %v1176_v19 = vld [vmem:[%s14264_s12 + $0xd8] sm:$0xff]  ;;  %v9442_v22 = vpack.c.bf16 %v1169_v12, %v1165_v11 }
  0x34   : > { %8711 = vmatmul.mubr.msk.f32.gmra.mrb[4].mxu0 %vm769_vm1, %v760_v45  ;;  %8713 = vmatmul.mubr.msk.f32.gmra.mrb[4].mxu1 %vm769_vm1, %v760_v45  ;;  %v1178_v18 = vld [vmem:[%s14264_s12 + $0xe8] sm:$0xff]  ;;  %v1180_v20 = vld [vmem:[%s14264_s12 + $0xf8] sm:$0xff]  ;;  %v932_v21 = vld [vmem:[%s10758_s30 + $0x10] sm:$0xff]  ;;  %v9458_v23 = vpack.c.bf16 %v1171_v14, %v1167_v13 }
  0x35   : > { %1027 = vmatprep.mubr.f32.mxu0 %v14276_v6  ;;  %1116 = vmatprep.mubr.f32.mxu1 %v14276_v6  ;;  %v1173_v24 = vld [vmem:[%s14264_s12 + $0xc0] sm:$0xff]  ;;  %v1175_v26 = vld [vmem:[%s14264_s12 + $0xd0] sm:$0xff]  ;;  %v9444_v28 = vpack.c.bf16 %v1178_v18, %v1174_v17  ;;  %v9460_v29 = vpack.c.bf16 %v1180_v20, %v1176_v19  ;;  %v1441_v30 = vld [vmem:[%s14266_s14 + $0x8] sm:$0xff] }
  0x36   : > { %9423 = vmatpush1.bf16.msra.mxu0 %v9422_v46  ;;  %9431 = vmatpush1.bf16.msra.mxu1 %v9430_v47  ;;  %v1177_v25 = vld [vmem:[%s14264_s12 + $0xe0] sm:$0xff]  ;;  %v1179_v27 = vld [vmem:[%s14264_s12 + $0xf0] sm:$0xff]  ;;  %v1445_v31 = vld [vmem:[%s14266_s14 + $0x28] sm:$0xff] }
  0x37   : > { %9433 = vmatprep.subr.bf16.mxu0 %v9432_v49  ;;  %9449 = vmatprep.subr.bf16.mxu1 %v9448_v50  ;;  %v1443_v32 = vld [vmem:[%s14266_s14 + $0x18] sm:$0xff]  ;;  %v9446_v35 = vpack.c.bf16 %v1177_v25, %v1173_v24  ;;  %v9462_v36 = vpack.c.bf16 %v1179_v27, %v1175_v26  ;;  %v1440_v37 = vld [vmem:[%s14266_s14] sm:$0xff]  ;;  %v9464_v39 = vpack.c.bf16 %v1445_v31, %v1441_v30  ;;  %v1442_v41 = vld [vmem:[%s14266_s14 + $0x10] sm:$0xff] }
  0x38   : > { %v1447_v33 = vld [vmem:[%s14266_s14 + $0x38] sm:$0xff]  ;;  %v1444_v38 = vld [vmem:[%s14266_s14 + $0x20] sm:$0xff]  ;;  %v1446_v42 = vld [vmem:[%s14266_s14 + $0x30] sm:$0xff] }
  0x39   : > { %8714 = vmatmul.mubr.msk.f32.vlgmr.msra.gmra.mrb[6].mxu0 %vm950_vm2, %v930_v58  ;;  %8718 = vmatmul.mubr.msk.f32.vlgmr.msra.gmra.mrb[6].mxu1 %vm950_vm2, %v930_v58  ;;  %v933_v34 = vld [vmem:[%s10758_s30 + $0x18] sm:$0xff]  ;;  %v9480_v40 = vpack.c.bf16 %v1447_v33, %v1443_v32  ;;  %v1449_v43 = vld [vmem:[%s14266_s14 + $0x48] sm:$0xff]  ;;  %v1141_v47 = vld [vmem:[%s10877_s27] sm:$0xff]  ;;  %v9466_v48 = vpack.c.bf16 %v1444_v38, %v1440_v37  ;;  %v9482_v49 = vpack.c.bf16 %v1446_v42, %v1442_v41  ;;  %s13103_s30 = sand.u32 1, %s10485_s22  }
  0x3a   : > { %9435 = vmatpush1.bf16.msra.mxu0 %v9434_v59  ;;  %9451 = vmatpush1.bf16.msra.mxu1 %v9450_v60  ;;  %v1453_v44 = vld [vmem:[%s14266_s14 + $0x68] sm:$0xff]  ;;  %v1451_v45 = vld [vmem:[%s14266_s14 + $0x58] sm:$0xff]  ;;  %v1448_v50 = vld [vmem:[%s14266_s14 + $0x40] sm:$0xff]  ;;  %s8697_s16 = sshll.u32 %s13103_s30, 11  ;;  %s8517_s19 = scalar_lea.sflag [#allocation3], %s13103_s30 }
  0x3b   : > { %1033 = vmatprep.mubr.f32.mxu0 %v14276_v6  ;;  %1122 = vmatprep.mubr.f32.mxu1 %v14276_v6  ;;  %v1455_v46 = vld [vmem:[%s14266_s14 + $0x78] sm:$0xff]  ;;  %v1452_v51 = vld [vmem:[%s14266_s14 + $0x60] sm:$0xff]  ;;  %v9468_v52 = vpack.c.bf16 %v1453_v44, %v1449_v43  ;;  %v1450_v54 = vld [vmem:[%s14266_s14 + $0x50] sm:$0xff]  ;;  %s13830_s29 = scalar_lea.vmem [#allocation4], %s8697_s16 }
  0x3c   : > { %9437 = vmatprep.subr.bf16.mxu0 %v9436_v1  ;;  %9453 = vmatprep.subr.bf16.mxu1 %v9452_v2  ;;  %v9484_v53 = vpack.c.bf16 %v1455_v46, %v1451_v45  ;;  %v1454_v55 = vld [vmem:[%s14266_s14 + $0x70] sm:$0xff]  ;;  %v1457_v56 = vld [vmem:[%s14266_s14 + $0x88] sm:$0xff]  ;;  %v1459_v58 = vld [vmem:[%s14266_s14 + $0x98] sm:$0xff]  ;;  %v9470_v61 = vpack.c.bf16 %v1452_v51, %v1448_v50 }
  0x3d   : > { %8715 = vmatmul.mubr.msk.f32.gmra.mrb[8].mxu0 %vm950_vm2, %v931_v8  ;;  %8719 = vmatmul.mubr.msk.f32.gmra.mrb[8].mxu1 %vm950_vm2, %v931_v8  ;;  %v1461_v57 = vld [vmem:[%s14266_s14 + $0xa8] sm:$0xff]  ;;  %v1463_v59 = vld [vmem:[%s14266_s14 + $0xb8] sm:$0xff]  ;;  %v9486_v62 = vpack.c.bf16 %v1454_v55, %v1450_v54  ;;  %v1456_v63 = vld [vmem:[%s14266_s14 + $0x80] sm:$0xff] }
  0x3e   : > { %9439 = vmatpush1.bf16.msra.mxu0 %v9438_v9  ;;  %9455 = vmatpush1.bf16.msra.mxu1 %v9454_v10  ;;  %v1142_v60 = vld [vmem:[%s10877_s27 + $0x8] sm:$0xff]  ;;  %v1460_v0 = vld [vmem:[%s14266_s14 + $0xa0] sm:$0xff]  ;;  %v9472_v1 = vpack.c.bf16 %v1461_v57, %v1457_v56  ;;  %v9488_v2 = vpack.c.bf16 %v1463_v59, %v1459_v58  ;;  %v1458_v3 = vld [vmem:[%s14266_s14 + $0x90] sm:$0xff] }
  0x3f   : > { %1039 = vmatprep.mubr.f32.mxu0 %v14276_v6  ;;  %1128 = vmatprep.mubr.f32.mxu1 %v14276_v6  ;;  %v1462_v4 = vld [vmem:[%s14266_s14 + $0xb0] sm:$0xff]  ;;  %v1465_v5 = vld [vmem:[%s14266_s14 + $0xc8] sm:$0xff]  ;;  %v1467_v8 = vld [vmem:[%s14266_s14 + $0xd8] sm:$0xff]  ;;  %v9474_v11 = vpack.c.bf16 %v1460_v0, %v1456_v63 }
  0x40   : > { %9441 = vmatprep.subr.bf16.mxu0 %v9440_v15  ;;  %9457 = vmatprep.subr.bf16.mxu1 %v9456_v16  ;;  %v1469_v7 = vld [vmem:[%s14266_s14 + $0xe8] sm:$0xff]  ;;  %v1471_v9 = vld [vmem:[%s14266_s14 + $0xf8] sm:$0xff]  ;;  %v1143_v10 = vld [vmem:[%s10877_s27 + $0x10] sm:$0xff]  ;;  %v9490_v12 = vpack.c.bf16 %v1462_v4, %v1458_v3 }
  0x41   : > { %8716 = vmatmul.mubr.msk.f32.gmra.mrb[10].mxu0 %vm950_vm2, %v932_v21  ;;  %8720 = vmatmul.mubr.msk.f32.gmra.mrb[10].mxu1 %vm950_vm2, %v932_v21  ;;  %v1464_v13 = vld [vmem:[%s14266_s14 + $0xc0] sm:$0xff]  ;;  %v9476_v14 = vpack.c.bf16 %v1469_v7, %v1465_v5  ;;  %v9492_v15 = vpack.c.bf16 %v1471_v9, %v1467_v8  ;;  %v1466_v17 = vld [vmem:[%s14266_s14 + $0xd0] sm:$0xff]  ;;  %v1144_v19 = vld [vmem:[%s10877_s27 + $0x18] sm:$0xff] }
  0x42   : > { %9443 = vmatpush1.bf16.msra.mxu0 %v9442_v22  ;;  %9459 = vmatpush1.bf16.msra.mxu1 %v9458_v23  ;;  %v1468_v16 = vld [vmem:[%s14266_s14 + $0xe0] sm:$0xff]  ;;  %v1470_v18 = vld [vmem:[%s14266_s14 + $0xf0] sm:$0xff]  ;;  %v1146_v23 = vld [vmem:[%s10877_s27 + $0x28] sm:$0xff] }
  0x43   : > { %1045 = vmatprep.mubr.f32.mxu0 %v14276_v6  ;;  %1134 = vmatprep.mubr.f32.mxu1 %v14276_v6  ;;  %v9478_v20 = vpack.c.bf16 %v1468_v16, %v1464_v13  ;;  %v9494_v21 = vpack.c.bf16 %v1470_v18, %v1466_v17  ;;  %v1145_v22 = vld [vmem:[%s10877_s27 + $0x20] sm:$0xff]  ;;  %v1147_v24 = vld [vmem:[%s10877_s27 + $0x30] sm:$0xff]  ;;  %v1148_v25 = vld [vmem:[%s10877_s27 + $0x38] sm:$0xff] }
  0x44   : > { %9445 = vmatprep.subr.bf16.mxu0 %v9444_v28  ;;  %9461 = vmatprep.subr.bf16.mxu1 %v9460_v29  ;;  %v1432_v26 = vld [vmem:[%s11010_s26] sm:$0xff]  ;;  %v1433_v27 = vld [vmem:[%s11010_s26 + $0x8] sm:$0xff]  ;;  %v1434_v28 = vld [vmem:[%s11010_s26 + $0x10] sm:$0xff] }
  0x45   : > { %8717 = vmatmul.mubr.msk.f32.gmra.mrb[12].mxu0 %vm950_vm2, %v933_v34  ;;  %8721 = vmatmul.mubr.msk.f32.gmra.mrb[12].mxu1 %vm950_vm2, %v933_v34  ;;  %v1435_v29 = vld [vmem:[%s11010_s26 + $0x18] sm:$0xff]  ;;  %v1436_v30 = vld [vmem:[%s11010_s26 + $0x20] sm:$0xff]  ;;  %v1437_v31 = vld [vmem:[%s11010_s26 + $0x28] sm:$0xff] }
  0x46   : > { %9447 = vmatpush1.bf16.msra.mxu0 %v9446_v35  ;;  %9463 = vmatpush1.bf16.msra.mxu1 %v9462_v36  ;;  %v1438_v32 = vld [vmem:[%s11010_s26 + $0x30] sm:$0xff]  ;;  %v1439_v33 = vld [vmem:[%s11010_s26 + $0x38] sm:$0xff]  ;;  %v1786_v50 = vld [vmem:[%s14259_s7] sm:$0xff]  ;;  %s13122_s26 = scalar_lea.vmem [#allocation2], %s8697_s16 }
  0x47   : > { %1270 = vmatprep.mubr.f32.mxu0 %v14276_v6  ;;  %1383 = vmatprep.mubr.f32.mxu1 %v14276_v6  ;;  %v1788_v63 = vld [vmem:[%s14259_s7 + $0x10] sm:$0xff]  ;;  %v1789_v3 = vld [vmem:[%s14259_s7 + $0x18] sm:$0xff]  ;;  %v1791_v18 = vld [vmem:[%s14259_s7 + $0x28] sm:$0xff]  ;;  %s8535_s16 = sshll.u32 %s13122_s26, 4  ;;  %s14041_s16 = int_to_ptr.vmem [resolvable:$true] %s8535_s16 }
  0x48   : > { %9465 = vmatprep.subr.bf16.mxu0 %v9464_v39  ;;  %9481 = vmatprep.subr.bf16.mxu1 %v9480_v40  ;;  %s10399_s21 = scalar_lea.vmem %s14041_s16, 32768 }
  0x49   : > { %8722 = vmatmul.mubr.msk.f32.vlgmr.msra.gmra.mrb[14].mxu0 %vm1181_vm3, %v1141_v47  ;;  %8730 = vmatmul.mubr.msk.f32.vlgmr.msra.gmra.mrb[14].mxu1 %vm1181_vm3, %v1141_v47  ;;  %p10400_p11 = scmp.ne.s32.totalorder %s14041_s16, %s10399_s21 }
  0x4a   : > { %1276 = vmatprep.mubr.f32.mxu0 %v14276_v6  ;;  %1389 = vmatprep.mubr.f32.mxu1 %v14276_v6 }
  0x4b   : > { %9467 = vmatpush1.bf16.msra.mxu0 %v9466_v48  ;;  %9483 = vmatpush1.bf16.msra.mxu1 %v9482_v49  ;;  %p10401_p12 = pnand %p10400_p11, %p10623_p5 }
  0x4c   : > { %9469 = vmatprep.subr.bf16.mxu0 %v9468_v52  ;;  %9485 = vmatprep.subr.bf16.mxu1 %v9484_v53  ;;  %v1787_v53 = vld [vmem:[%s14259_s7 + $0x8] sm:$0xff] }
  0x4d   : > { %8723 = vmatmul.mubr.msk.f32.gmra.mrb[16].mxu0 %vm1181_vm3, %v1142_v60  ;;  %8731 = vmatmul.mubr.msk.f32.gmra.mrb[16].mxu1 %vm1181_vm3, %v1142_v60  ;;  %p10402_p13 = pneg %p10401_p12 }
  0x4e   : > { %1282 = vmatprep.mubr.f32.mxu0 %v14276_v6  ;;  %1395 = vmatprep.mubr.f32.mxu1 %v14276_v6 }
  0x4f   : > { %9471 = vmatpush1.bf16.msra.mxu0 %v9470_v61  ;;  %9487 = vmatpush1.bf16.msra.mxu1 %v9486_v62 }
  0x50   : > { %9473 = vmatprep.subr.bf16.mxu0 %v9472_v1  ;;  %9489 = vmatprep.subr.bf16.mxu1 %v9488_v2 }
  0x51   : > { %8724 = vmatmul.mubr.msk.f32.gmra.mrb[18].mxu0 %vm1181_vm3, %v1143_v10  ;;  %8732 = vmatmul.mubr.msk.f32.gmra.mrb[18].mxu1 %vm1181_vm3, %v1143_v10 }
  0x52   : > { %1288 = vmatprep.mubr.f32.mxu0 %v14276_v6  ;;  %1401 = vmatprep.mubr.f32.mxu1 %v14276_v6 }
  0x53   : > { %9475 = vmatpush1.bf16.msra.mxu0 %v9474_v11  ;;  %9491 = vmatpush1.bf16.msra.mxu1 %v9490_v12 }
  0x54   : > { %9477 = vmatprep.subr.bf16.mxu0 %v9476_v14  ;;  %9493 = vmatprep.subr.bf16.mxu1 %v9492_v15  ;;  %v1790_v14 = vld [vmem:[%s14259_s7 + $0x20] sm:$0xff] }
  0x55   : > { %8725 = vmatmul.mubr.msk.f32.gmra.mrb[20].mxu0 %vm1181_vm3, %v1144_v19  ;;  %8733 = vmatmul.mubr.msk.f32.gmra.mrb[20].mxu1 %vm1181_vm3, %v1144_v19 }
  0x56   : > { %1294 = vmatprep.mubr.f32.mxu0 %v14276_v6  ;;  %1407 = vmatprep.mubr.f32.mxu1 %v14276_v6 }
  0x57   : > { %9479 = vmatpush1.bf16.msra.mxu0 %v9478_v20  ;;  %9495 = vmatpush1.bf16.msra.mxu1 %v9494_v21 }
  0x59   : > { %8726 = vmatmul.mubr.msk.f32.gmra.mrb[22].mxu0 %vm1181_vm3, %v1145_v22  ;;  %8734 = vmatmul.mubr.msk.f32.gmra.mrb[22].mxu1 %vm1181_vm3, %v1145_v22 }
  0x5a   : > { %1300 = vmatprep.mubr.f32.mxu0 %v14276_v6  ;;  %1413 = vmatprep.mubr.f32.mxu1 %v14276_v6 }
  0x5d   : > { %8727 = vmatmul.mubr.msk.f32.gmra.mrb[24].mxu0 %vm1181_vm3, %v1146_v23  ;;  %8735 = vmatmul.mubr.msk.f32.gmra.mrb[24].mxu1 %vm1181_vm3, %v1146_v23 }
  0x5e   : > { %1306 = vmatprep.mubr.f32.mxu0 %v14276_v6  ;;  %1419 = vmatprep.mubr.f32.mxu1 %v14276_v6 }
  0x61   : > { %8728 = vmatmul.mubr.msk.f32.gmra.mrb[26].mxu0 %vm1181_vm3, %v1147_v24  ;;  %8736 = vmatmul.mubr.msk.f32.gmra.mrb[26].mxu1 %vm1181_vm3, %v1147_v24 }
  0x62   : > { %1312 = vmatprep.mubr.f32.mxu0 %v14276_v6  ;;  %1425 = vmatprep.mubr.f32.mxu1 %v14276_v6 }
  0x65   : > { %8729 = vmatmul.mubr.msk.f32.gmra.mrb[28].mxu0 %vm1181_vm3, %v1148_v25  ;;  %8737 = vmatmul.mubr.msk.f32.gmra.mrb[28].mxu1 %vm1181_vm3, %v1148_v25 }
  0x66   : > { %1560 = vmatprep.mubr.f32.mxu0 %v14276_v6  ;;  %1673 = vmatprep.mubr.f32.mxu1 %v14276_v6 }
  0x69   : > { %8738 = vmatmul.mubr.msk.f32.vlgmr.msra.gmra.mrb[30].mxu0 %vm1181_vm3, %v1432_v26  ;;  %8746 = vmatmul.mubr.msk.f32.vlgmr.msra.gmra.mrb[30].mxu1 %vm1181_vm3, %v1432_v26 }
  0x6a   : > { %1566 = vmatprep.mubr.f32.mxu0 %v14276_v6  ;;  %1679 = vmatprep.mubr.f32.mxu1 %v14276_v6 }
  0x6d   : > { %8739 = vmatmul.mubr.msk.f32.gmra.mrb[32].mxu0 %vm1181_vm3, %v1433_v27  ;;  %8747 = vmatmul.mubr.msk.f32.gmra.mrb[32].mxu1 %vm1181_vm3, %v1433_v27  ;;  %v1800_v27 = vld [vmem:[%s14259_s7 + $0x70] sm:$0xff] }
  0x6e   : > { %1572 = vmatprep.mubr.f32.mxu0 %v14276_v6  ;;  %1685 = vmatprep.mubr.f32.mxu1 %v14276_v6 }
  0x71   : > { %8740 = vmatmul.mubr.msk.f32.gmra.mrb[34].mxu0 %vm1181_vm3, %v1434_v28  ;;  %8748 = vmatmul.mubr.msk.f32.gmra.mrb[34].mxu1 %vm1181_vm3, %v1434_v28  ;;  %v1792_v28 = vld [vmem:[%s14259_s7 + $0x30] sm:$0xff] }
  0x72   : > { %1578 = vmatprep.mubr.f32.mxu0 %v14276_v6  ;;  %1691 = vmatprep.mubr.f32.mxu1 %v14276_v6 }
  0x75   : > { %8741 = vmatmul.mubr.msk.f32.gmra.mrb[36].mxu0 %vm1181_vm3, %v1435_v29  ;;  %8749 = vmatmul.mubr.msk.f32.gmra.mrb[36].mxu1 %vm1181_vm3, %v1435_v29  ;;  %v1801_v29 = vld [vmem:[%s14259_s7 + $0x78] sm:$0xff] }
  0x76   : > { %1584 = vmatprep.mubr.f32.mxu0 %v14276_v6  ;;  %1697 = vmatprep.mubr.f32.mxu1 %v14276_v6 }
  0x79   : > { %8742 = vmatmul.mubr.msk.f32.gmra.mrb[38].mxu0 %vm1181_vm3, %v1436_v30  ;;  %8750 = vmatmul.mubr.msk.f32.gmra.mrb[38].mxu1 %vm1181_vm3, %v1436_v30 }
  0x7a   : > { %1590 = vmatprep.mubr.f32.mxu0 %v14276_v6  ;;  %1703 = vmatprep.mubr.f32.mxu1 %v14276_v6 }
  0x7d   : > { %8743 = vmatmul.mubr.msk.f32.gmra.mrb[40].mxu0 %vm1181_vm3, %v1437_v31  ;;  %8751 = vmatmul.mubr.msk.f32.gmra.mrb[40].mxu1 %vm1181_vm3, %v1437_v31 }
  0x7e   : > { %1596 = vmatprep.mubr.f32.mxu0 %v14276_v6  ;;  %1709 = vmatprep.mubr.f32.mxu1 %v14276_v6 }
  0x81   : > { %8744 = vmatmul.mubr.msk.f32.gmra.mrb[42].mxu0 %vm1181_vm3, %v1438_v32  ;;  %8752 = vmatmul.mubr.msk.f32.gmra.mrb[42].mxu1 %vm1181_vm3, %v1438_v32  ;;  %v1793_v32 = vld [vmem:[%s14259_s7 + $0x38] sm:$0xff] }
  0x82   : > { %1602 = vmatprep.mubr.f32.mxu0 %v14276_v6  ;;  %1715 = vmatprep.mubr.f32.mxu1 %v14276_v6 }
  0x85   : > { %8745 = vmatmul.mubr.msk.f32.gmra.mrb[44].mxu0 %vm1181_vm3, %v1439_v33  ;;  %8753 = vmatmul.mubr.msk.f32.gmra.mrb[44].mxu1 %vm1181_vm3, %v1439_v33 }
  0x86   : > { %2106 = vmatprep.mubr.f32.mxu0 %v14276_v6  ;;  %2555 = vmatprep.mubr.f32.mxu1 %v14276_v6 }
  0xff   : > { %v683_v34 = vpop.f32.mrb[0].mxu0  ;;  %v754_v35 = vpop.f32.mrb[0].mxu1 }
 0x100   : > { %v685_v36 = vpop.f32.mrb[1].mxu0  ;;  %v756_v37 = vpop.f32.mrb[1].mxu1 }
 0x103   : > { %v842_v38 = vpop.f32.mrb[2].mxu0  ;;  %v919_v39 = vpop.f32.mrb[2].mxu1 }
 0x104   : > { %v844_v40 = vpop.f32.mrb[3].mxu0  ;;  %v921_v41 = vpop.f32.mrb[3].mxu1 }
 0x107   : > { %v848_v42 = vpop.f32.mrb[4].mxu0  ;;  %v925_v43 = vpop.f32.mrb[4].mxu1 }
 0x108   : > { %v9498_v44 = vpack.c.bf16 %v848_v42, %v842_v38  ;;  %v9502_v45 = vpack.c.bf16 %v925_v43, %v919_v39  ;;  %v850_v46 = vpop.f32.mrb[5].mxu0  ;;  %v927_v47 = vpop.f32.mrb[5].mxu1  ;;  %v1794_v42 = vld [vmem:[%s14259_s7 + $0x40] sm:$0xff] }
 0x109   : > { %v9496_v48 = vpack.c.bf16 %v850_v46, %v844_v40  ;;  %v9500_v49 = vpack.c.bf16 %v927_v47, %v921_v41  ;;  %v1795_v46 = vld [vmem:[%s14259_s7 + $0x48] sm:$0xff] }
 0x10b   : > { %9497 = vmatprep.subr.bf16.mxu0 %v9496_v48  ;;  %9501 = vmatprep.subr.bf16.mxu1 %v9500_v49 }
 0x10c   : > { %9499 = vmatpush1.bf16.msra.mxu0 %v9498_v44  ;;  %9503 = vmatpush1.bf16.msra.mxu1 %v9502_v45  ;;  %v11061_v51 = vpop.f32.mrb[6].mxu0  ;;  %v11063_v52 = vpop.f32.mrb[6].mxu1 }
 0x10d   : > { %3132 = vmatprep.subr.mxu0 %v685_v36  ;;  %3581 = vmatprep.subr.mxu1 %v756_v37  ;;  %v1031_v54 = vpop.f32.mrb[7].mxu0  ;;  %v1120_v55 = vpop.f32.mrb[7].mxu1 }
 0x10f   : > { %8754 = vmatmul.mubr.msk.f32.vlgmr.msra.gmra.mrb[46].mxu0 %vm769_vm1, %v1786_v50  ;;  %8818 = vmatmul.mubr.msk.f32.vlgmr.msra.gmra.mrb[46].mxu1 %vm769_vm1, %v1786_v50 }
 0x110   : > { %3133 = vmatpush1.msra.mxu0 %v683_v34  ;;  %3582 = vmatpush1.msra.mxu1 %v754_v35  ;;  %v11070_v56 = vpop.f32.mrb[8].mxu0  ;;  %v11072_v57 = vpop.f32.mrb[8].mxu1 }
 0x111   : > { %2112 = vmatprep.mubr.f32.mxu0 %v14276_v6  ;;  %2561 = vmatprep.mubr.f32.mxu1 %v14276_v6  ;;  %v1037_v58 = vpop.f32.mrb[9].mxu0  ;;  %v1126_v59 = vpop.f32.mrb[9].mxu1 }
 0x112   : > { %v9504_v62 = vpack.c.bf16 %v1037_v58, %v1031_v54  ;;  %v9512_v0 = vpack.c.bf16 %v1126_v59, %v1120_v55  ;;  %v1798_v59 = vld [vmem:[%s14259_s7 + $0x60] sm:$0xff] }
 0x113   : > { %8755 = vmatmul.mubr.msk.f32.gmra.mrb[48].mxu0 %vm769_vm1, %v1787_v53  ;;  %8819 = vmatmul.mubr.msk.f32.gmra.mrb[48].mxu1 %vm769_vm1, %v1787_v53 }
 0x114   : > { %2118 = vmatprep.mubr.f32.mxu0 %v14276_v6  ;;  %2567 = vmatprep.mubr.f32.mxu1 %v14276_v6  ;;  %v11087_v1 = vpop.f32.mrb[10].mxu0  ;;  %v11089_v2 = vpop.f32.mrb[10].mxu1 }
 0x115   : > { %9505 = vmatprep.subr.bf16.mxu0 %v9504_v62  ;;  %9513 = vmatprep.subr.bf16.mxu1 %v9512_v0  ;;  %v11096_v4 = vpop.f32.mrb[11].mxu0  ;;  %v11098_v5 = vpop.f32.mrb[11].mxu1  ;;  %v1796_v62 = vld [vmem:[%s14259_s7 + $0x50] sm:$0xff] }
 0x117   : > { %8756 = vmatmul.mubr.msk.f32.gmra.mrb[50].mxu0 %vm769_vm1, %v1788_v63  ;;  %8820 = vmatmul.mubr.msk.f32.gmra.mrb[50].mxu1 %vm769_vm1, %v1788_v63  ;;  %v1799_v63 = vld [vmem:[%s14259_s7 + $0x68] sm:$0xff] }
 0x118   : > { %2124 = vmatprep.mubr.f32.mxu0 %v14276_v6  ;;  %2573 = vmatprep.mubr.f32.mxu1 %v14276_v6  ;;  %v11100_v7 = vpop.f32.mrb[12].mxu0  ;;  %v11102_v8 = vpop.f32.mrb[12].mxu1 }
 0x119   : > { %v11104_v9 = vpop.f32.mrb[13].mxu0  ;;  %v11106_v10 = vpop.f32.mrb[13].mxu1 }
 0x11b   : > { %8757 = vmatmul.mubr.msk.f32.gmra.mrb[52].mxu0 %vm769_vm1, %v1789_v3  ;;  %8821 = vmatmul.mubr.msk.f32.gmra.mrb[52].mxu1 %vm769_vm1, %v1789_v3 }
 0x11c   : > { %2130 = vmatprep.mubr.f32.mxu0 %v14276_v6  ;;  %2579 = vmatprep.mubr.f32.mxu1 %v14276_v6  ;;  %v11125_v16 = vpop.f32.mrb[14].mxu0  ;;  %v11127_v17 = vpop.f32.mrb[14].mxu1 }
 0x11d   : > { %v11134_v19 = vpop.f32.mrb[15].mxu0  ;;  %v11136_v20 = vpop.f32.mrb[15].mxu1 }
 0x11f   : > { %8758 = vmatmul.mubr.msk.f32.gmra.mrb[54].mxu0 %vm769_vm1, %v1790_v14  ;;  %8822 = vmatmul.mubr.msk.f32.gmra.mrb[54].mxu1 %vm769_vm1, %v1790_v14  ;;  %v1797_v14 = vld [vmem:[%s14259_s7 + $0x58] sm:$0xff] }
 0x120   : > { %2136 = vmatprep.mubr.f32.mxu0 %v14276_v6  ;;  %2585 = vmatprep.mubr.f32.mxu1 %v14276_v6  ;;  %v11138_v21 = vpop.f32.mrb[16].mxu0  ;;  %v11140_v22 = vpop.f32.mrb[16].mxu1 }
 0x121   : > { %v11142_v23 = vpop.f32.mrb[17].mxu0  ;;  %v11144_v24 = vpop.f32.mrb[17].mxu1 }
 0x123   : > { %8759 = vmatmul.mubr.msk.f32.gmra.mrb[56].mxu0 %vm769_vm1, %v1791_v18  ;;  %8823 = vmatmul.mubr.msk.f32.gmra.mrb[56].mxu1 %vm769_vm1, %v1791_v18 }
 0x124   : > { %2142 = vmatprep.mubr.f32.mxu0 %v14276_v6  ;;  %2591 = vmatprep.mubr.f32.mxu1 %v14276_v6  ;;  %v11163_v30 = vpop.f32.mrb[18].mxu0  ;;  %v11165_v31 = vpop.f32.mrb[18].mxu1 }
 0x125   : > { %v11172_v33 = vpop.f32.mrb[19].mxu0  ;;  %v11174_v34 = vpop.f32.mrb[19].mxu1 }
 0x127   : > { %8760 = vmatmul.mubr.msk.f32.gmra.mrb[58].mxu0 %vm769_vm1, %v1792_v28  ;;  %8824 = vmatmul.mubr.msk.f32.gmra.mrb[58].mxu1 %vm769_vm1, %v1792_v28 }
 0x128   : > { %2148 = vmatprep.mubr.f32.mxu0 %v14276_v6  ;;  %2597 = vmatprep.mubr.f32.mxu1 %v14276_v6  ;;  %v11176_v35 = vpop.f32.mrb[20].mxu0  ;;  %v11178_v36 = vpop.f32.mrb[20].mxu1 }
 0x129   : > { %v11180_v37 = vpop.f32.mrb[21].mxu0  ;;  %v11182_v38 = vpop.f32.mrb[21].mxu1 }
 0x12b   : > { %8761 = vmatmul.mubr.msk.f32.gmra.mrb[60].mxu0 %vm769_vm1, %v1793_v32  ;;  %8825 = vmatmul.mubr.msk.f32.gmra.mrb[60].mxu1 %vm769_vm1, %v1793_v32 }
 0x12c   : > { %2154 = vmatprep.mubr.f32.mxu0 %v14276_v6  ;;  %2603 = vmatprep.mubr.f32.mxu1 %v14276_v6  ;;  %v11201_v44 = vpop.f32.mrb[22].mxu0  ;;  %v11203_v45 = vpop.f32.mrb[22].mxu1 }
 0x12d   : > { %v11210_v47 = vpop.f32.mrb[23].mxu0  ;;  %v11212_v48 = vpop.f32.mrb[23].mxu1 }
 0x12f   : > { %8762 = vmatmul.mubr.msk.f32.gmra.mrb[62].mxu0 %vm769_vm1, %v1794_v42  ;;  %8826 = vmatmul.mubr.msk.f32.gmra.mrb[62].mxu1 %vm769_vm1, %v1794_v42 }
 0x130   : > { %2160 = vmatprep.mubr.f32.mxu0 %v14276_v6  ;;  %2609 = vmatprep.mubr.f32.mxu1 %v14276_v6  ;;  %v11214_v49 = vpop.f32.mrb[24].mxu0  ;;  %v11216_v50 = vpop.f32.mrb[24].mxu1 }
 0x131   : > { %v11218_v53 = vpop.f32.mrb[25].mxu0  ;;  %v11220_v54 = vpop.f32.mrb[25].mxu1 }
 0x133   : > { %8763 = vmatmul.mubr.msk.f32.gmra.mrb[64].mxu0 %vm769_vm1, %v1795_v46  ;;  %8827 = vmatmul.mubr.msk.f32.gmra.mrb[64].mxu1 %vm769_vm1, %v1795_v46 }
 0x134   : > { %2166 = vmatprep.mubr.f32.mxu0 %v14276_v6  ;;  %2615 = vmatprep.mubr.f32.mxu1 %v14276_v6  ;;  %v11239_v0 = vpop.f32.mrb[26].mxu0  ;;  %v11241_v3 = vpop.f32.mrb[26].mxu1 }
 0x135   : > { %v11248_v18 = vpop.f32.mrb[27].mxu0  ;;  %v11250_v28 = vpop.f32.mrb[27].mxu1 }
 0x137   : > { %8764 = vmatmul.mubr.msk.f32.gmra.mrb[66].mxu0 %vm769_vm1, %v1796_v62  ;;  %8828 = vmatmul.mubr.msk.f32.gmra.mrb[66].mxu1 %vm769_vm1, %v1796_v62 }
 0x138   : > { %2172 = vmatprep.mubr.f32.mxu0 %v14276_v6  ;;  %2621 = vmatprep.mubr.f32.mxu1 %v14276_v6  ;;  %v11252_v32 = vpop.f32.mrb[28].mxu0  ;;  %v11254_v42 = vpop.f32.mrb[28].mxu1 }
 0x139   : > { %v11256_v46 = vpop.f32.mrb[29].mxu0  ;;  %v11258_v62 = vpop.f32.mrb[29].mxu1 }
 0x13b   : > { %8765 = vmatmul.mubr.msk.f32.gmra.mrb[68].mxu0 %vm769_vm1, %v1797_v14  ;;  %8829 = vmatmul.mubr.msk.f32.gmra.mrb[68].mxu1 %vm769_vm1, %v1797_v14 }
 0x13c   : > { %2178 = vmatprep.mubr.f32.mxu0 %v14276_v6  ;;  %2627 = vmatprep.mubr.f32.mxu1 %v14276_v6  ;;  %v11277_v58 = vpop.f32.mrb[30].mxu0  ;;  %v11279_v55 = vpop.f32.mrb[30].mxu1 }
 0x13d   : > { %14312 = vst [vmem:[#allocation14_spill] sm:$0xff] %v11279_v55  ;;  %v11286_v40 = vpop.f32.mrb[31].mxu0  ;;  %v11288_v39 = vpop.f32.mrb[31].mxu1  ;;  %v14322_v55 = vmov 0.0  }
 0x13f   : > { %8766 = vmatmul.mubr.msk.f32.gmra.mrb[70].mxu0 %vm769_vm1, %v1798_v59  ;;  %8830 = vmatmul.mubr.msk.f32.gmra.mrb[70].mxu1 %vm769_vm1, %v1798_v59 }
 0x140   : > { %2184 = vmatprep.mubr.f32.mxu0 %v14276_v6  ;;  %2633 = vmatprep.mubr.f32.mxu1 %v14276_v6  ;;  %v11290_v14 = vpop.f32.mrb[32].mxu0  ;;  %v11292_v43 = vpop.f32.mrb[32].mxu1 }
 0x141   : > { %14313 = vst [vmem:[#allocation15_spill] sm:$0xff] %v11292_v43  ;;  %v11294_v59 = vpop.f32.mrb[33].mxu0  ;;  %v11296_v41 = vpop.f32.mrb[33].mxu1  ;;  %v1802_v43 = vld [vmem:[%s14259_s7 + $0x80] sm:$0xff] }
 0x143   : > { %8767 = vmatmul.mubr.msk.f32.gmra.mrb[72].mxu0 %vm769_vm1, %v1799_v63  ;;  %8831 = vmatmul.mubr.msk.f32.gmra.mrb[72].mxu1 %vm769_vm1, %v1799_v63 }
 0x144   : > { %2190 = vmatprep.mubr.f32.mxu0 %v14276_v6  ;;  %2639 = vmatprep.mubr.f32.mxu1 %v14276_v6  ;;  %v11315_v26 = vpop.f32.mrb[34].mxu0  ;;  %v11317_v25 = vpop.f32.mrb[34].mxu1 }
 0x145   : > { %14314 = vst [vmem:[#allocation16_spill] sm:$0xff] %v11315_v26  ;;  %14315 = vst [vmem:[#allocation17_spill] sm:$0xff] %v11317_v25  ;;  %v11324_v12 = vpop.f32.mrb[35].mxu0  ;;  %v11326_v11 = vpop.f32.mrb[35].mxu1 }
 0x146   : > { %14316 = vst [vmem:[#allocation18_spill] sm:$0xff] %v11324_v12  ;;  %14317 = vst [vmem:[#allocation19_spill] sm:$0xff] %v11326_v11  ;;  %v1805_v12 = vld [vmem:[%s14259_s7 + $0x98] sm:$0xff] }
 0x147   : > { %8768 = vmatmul.mubr.msk.f32.gmra.mrb[74].mxu0 %vm769_vm1, %v1800_v27  ;;  %8832 = vmatmul.mubr.msk.f32.gmra.mrb[74].mxu1 %vm769_vm1, %v1800_v27 }
 0x148   : > { %2196 = vmatprep.mubr.f32.mxu0 %v14276_v6  ;;  %2645 = vmatprep.mubr.f32.mxu1 %v14276_v6  ;;  %v11328_v63 = vpop.f32.mrb[36].mxu0  ;;  %v11330_v15 = vpop.f32.mrb[36].mxu1  ;;  %v1803_v6 = vld [vmem:[%s14259_s7 + $0x88] sm:$0xff] }
 0x149   : > { %14318 = vst [vmem:[#allocation20_spill] sm:$0xff] %v11328_v63  ;;  %14319 = vst [vmem:[#allocation21_spill] sm:$0xff] %v11330_v15  ;;  %v11332_v27 = vpop.f32.mrb[37].mxu0  ;;  %v11334_v13 = vpop.f32.mrb[37].mxu1 }
 0x14a   : > { %14320 = vst [vmem:[#allocation22_spill] sm:$0xff] %v11332_v27  ;;  %14321 = vst [vmem:[#allocation23_spill] sm:$0xff] %v11334_v13  ;;  %v1804_v27 = vld [vmem:[%s14259_s7 + $0x90] sm:$0xff] }
 0x14b   : > { %8769 = vmatmul.mubr.msk.f32.gmra.mrb[76].mxu0 %vm769_vm1, %v1801_v29  ;;  %8833 = vmatmul.mubr.msk.f32.gmra.mrb[76].mxu1 %vm769_vm1, %v1801_v29 }
 0x14c   : > { %2202 = vmatprep.mubr.f32.mxu0 %v14322_v55  ;;  %2651 = vmatprep.mubr.f32.mxu1 %v14322_v55  ;;  %v11353_v61 = vpop.f32.mrb[38].mxu0  ;;  %v11355_v60 = vpop.f32.mrb[38].mxu1 }
 0x14d   : > { %14323 = vst [vmem:[#allocation24_spill] sm:$0xff] %v11353_v61  ;;  %14324 = vst [vmem:[#allocation25_spill] sm:$0xff] %v11355_v60  ;;  %v11362_v25 = vpop.f32.mrb[39].mxu0  ;;  %v11364_v15 = vpop.f32.mrb[39].mxu1 }
 0x14e   : > { %14325 = vst [vmem:[#allocation26_spill] sm:$0xff] %v11362_v25  ;;  %14326 = vst [vmem:[#allocation27_spill] sm:$0xff] %v11364_v15  ;;  %v14332_v15 = vpack.c.bf16 %v11070_v56, %v11061_v51  ;;  %v14334_v25 = vpack.c.bf16 %v11104_v9, %v11096_v4  ;;  %v14336_v51 = vpack.c.bf16 %v11100_v7, %v11087_v1  ;;  %v1724_v56 = vld [vmem:[%s14257_s5 + $0x10] sm:$0xff]  ;;  %v1725_v1 = vld [vmem:[%s14257_s5 + $0x18] sm:$0xff] }
 0x14f   : > { %8770 = vmatmul.mubr.msk.f32.gmra.mrb[78].mxu0 %vm769_vm1, %v1802_v43  ;;  %8834 = vmatmul.mubr.msk.f32.gmra.mrb[78].mxu1 %vm769_vm1, %v1802_v43  ;;  %v14339_v4 = vpack.c.bf16 %v11144_v24, %v11136_v20  ;;  %v1728_v7 = vld [vmem:[%s14257_s5 + $0x30] sm:$0xff]  ;;  %v1730_v9 = vld [vmem:[%s14257_s5 + $0x40] sm:$0xff]  ;;  %v1735_v20 = vld [vmem:[%s14257_s5 + $0x68] sm:$0xff] }
 0x150   : > { %2208 = vmatprep.mubr.f32.mxu0 %v14322_v55  ;;  %2657 = vmatprep.mubr.f32.mxu1 %v14322_v55  ;;  %v11366_v29 = vpop.f32.mrb[40].mxu0  ;;  %v11368_v26 = vpop.f32.mrb[40].mxu1  ;;  %v1737_v24 = vld [vmem:[%s14257_s5 + $0x78] sm:$0xff] }
 0x151   : > { %14327 = vst [vmem:[#allocation28_spill] sm:$0xff] %v11366_v29  ;;  %14328 = vst [vmem:[#allocation29_spill] sm:$0xff] %v11368_v26  ;;  %v11370_v43 = vpop.f32.mrb[41].mxu0  ;;  %v11372_v63 = vpop.f32.mrb[41].mxu1 }
 0x152   : > { %14329 = vst [vmem:[#allocation30_spill] sm:$0xff] %v11370_v43  ;;  %14330 = vst [vmem:[#allocation31_spill] sm:$0xff] %v11372_v63  ;;  %v1806_v43 = vld [vmem:[%s14259_s7 + $0xa0] sm:$0xff]  ;;  %v1807_v63 = vld [vmem:[%s14259_s7 + $0xa8] sm:$0xff] }
 0x153   : > { %8771 = vmatmul.mubr.msk.f32.gmra.mrb[80].mxu0 %vm769_vm1, %v1803_v6  ;;  %8835 = vmatmul.mubr.msk.f32.gmra.mrb[80].mxu1 %vm769_vm1, %v1803_v6 }
 0x154   : > { %2214 = vmatprep.mubr.f32.mxu0 %v14322_v55  ;;  %2663 = vmatprep.mubr.f32.mxu1 %v14322_v55  ;;  %v11391_v11 = vpop.f32.mrb[42].mxu0  ;;  %v11393_v13 = vpop.f32.mrb[42].mxu1 }
 0x155   : > { %14331 = vst [vmem:[#allocation32_spill] sm:$0xff] %v11393_v13  ;;  %v11400_v60 = vpop.f32.mrb[43].mxu0  ;;  %v11402_v26 = vpop.f32.mrb[43].mxu1  ;;  %v14335_v13 = vpack.c.bf16 %v11106_v10, %v11098_v5  ;;  %v1727_v5 = vld [vmem:[%s14257_s5 + $0x28] sm:$0xff] }
 0x156   : > { %v1731_v10 = vld [vmem:[%s14257_s5 + $0x48] sm:$0xff] }
 0x157   : > { %8772 = vmatmul.mubr.msk.f32.gmra.mrb[82].mxu0 %vm769_vm1, %v1804_v27  ;;  %8836 = vmatmul.mubr.msk.f32.gmra.mrb[82].mxu1 %vm769_vm1, %v1804_v27 }
 0x158   : > { %2220 = vmatprep.mubr.f32.mxu0 %v14322_v55  ;;  %2669 = vmatprep.mubr.f32.mxu1 %v14322_v55  ;;  %v11404_v6 = vpop.f32.mrb[44].mxu0  ;;  %v11406_v61 = vpop.f32.mrb[44].mxu1 }
 0x159   : > { %v11408_v27 = vpop.f32.mrb[45].mxu0  ;;  %v11410_v29 = vpop.f32.mrb[45].mxu1 }
 0x15b   : > { %8773 = vmatmul.mubr.msk.f32.gmra.mrb[84].mxu0 %vm769_vm1, %v1805_v12  ;;  %8837 = vmatmul.mubr.msk.f32.gmra.mrb[84].mxu1 %vm769_vm1, %v1805_v12  ;;  %v14333_v12 = vpack.c.bf16 %v11072_v57, %v11063_v52  ;;  %v14337_v52 = vpack.c.bf16 %v11102_v8, %v11089_v2  ;;  %v14338_v57 = vpack.c.bf16 %v11142_v23, %v11134_v19  ;;  %v1726_v2 = vld [vmem:[%s14257_s5 + $0x20] sm:$0xff]  ;;  %v1729_v8 = vld [vmem:[%s14257_s5 + $0x38] sm:$0xff]  ;;  %v1736_v23 = vld [vmem:[%s14257_s5 + $0x70] sm:$0xff] }
 0x15c   : > { %2226 = vmatprep.mubr.f32.mxu0 %v14322_v55  ;;  %2675 = vmatprep.mubr.f32.mxu1 %v14322_v55  ;;  %v1734_v19 = vld [vmem:[%s14257_s5 + $0x60] sm:$0xff] }
 0x15f   : > { %8774 = vmatmul.mubr.msk.f32.gmra.mrb[86].mxu0 %vm769_vm1, %v1806_v43  ;;  %8838 = vmatmul.mubr.msk.f32.gmra.mrb[86].mxu1 %vm769_vm1, %v1806_v43  ;;  %v1808_v43 = vld [vmem:[%s14259_s7 + $0xb0] sm:$0xff] }
 0x160   : > { %2232 = vmatprep.mubr.f32.mxu0 %v14322_v55  ;;  %2681 = vmatprep.mubr.f32.mxu1 %v14322_v55 }
 0x163   : > { %8775 = vmatmul.mubr.msk.f32.gmra.mrb[88].mxu0 %vm769_vm1, %v1807_v63  ;;  %8839 = vmatmul.mubr.msk.f32.gmra.mrb[88].mxu1 %vm769_vm1, %v1807_v63  ;;  %v1809_v63 = vld [vmem:[%s14259_s7 + $0xb8] sm:$0xff] }
 0x164   : > { %2238 = vmatprep.mubr.f32.mxu0 %v14322_v55  ;;  %2687 = vmatprep.mubr.f32.mxu1 %v14322_v55 }
 0x167   : > { %8776 = vmatmul.mubr.msk.f32.gmra.mrb[90].mxu0 %vm769_vm1, %v1808_v43  ;;  %8840 = vmatmul.mubr.msk.f32.gmra.mrb[90].mxu1 %vm769_vm1, %v1808_v43  ;;  %v1810_v43 = vld [vmem:[%s14259_s7 + $0xc0] sm:$0xff] }
 0x168   : > { %2244 = vmatprep.mubr.f32.mxu0 %v14322_v55  ;;  %2693 = vmatprep.mubr.f32.mxu1 %v14322_v55 }
 0x16b   : > { %8777 = vmatmul.mubr.msk.f32.gmra.mrb[92].mxu0 %vm769_vm1, %v1809_v63  ;;  %8841 = vmatmul.mubr.msk.f32.gmra.mrb[92].mxu1 %vm769_vm1, %v1809_v63  ;;  %v1811_v63 = vld [vmem:[%s14259_s7 + $0xc8] sm:$0xff] }
 0x16c   : > { %2250 = vmatprep.mubr.f32.mxu0 %v14322_v55  ;;  %2699 = vmatprep.mubr.f32.mxu1 %v14322_v55 }
 0x16f   : > { %8778 = vmatmul.mubr.msk.f32.gmra.mrb[94].mxu0 %vm769_vm1, %v1810_v43  ;;  %8842 = vmatmul.mubr.msk.f32.gmra.mrb[94].mxu1 %vm769_vm1, %v1810_v43  ;;  %v1812_v43 = vld [vmem:[%s14259_s7 + $0xd0] sm:$0xff] }
 0x170   : > { %2256 = vmatprep.mubr.f32.mxu0 %v14322_v55  ;;  %2705 = vmatprep.mubr.f32.mxu1 %v14322_v55 }
 0x173   : > { %8779 = vmatmul.mubr.msk.f32.gmra.mrb[96].mxu0 %vm769_vm1, %v1811_v63  ;;  %8843 = vmatmul.mubr.msk.f32.gmra.mrb[96].mxu1 %vm769_vm1, %v1811_v63  ;;  %v1813_v63 = vld [vmem:[%s14259_s7 + $0xd8] sm:$0xff] }
 0x174   : > { %2262 = vmatprep.mubr.f32.mxu0 %v14322_v55  ;;  %2711 = vmatprep.mubr.f32.mxu1 %v14322_v55 }
 0x177   : > { %8780 = vmatmul.mubr.msk.f32.gmra.mrb[98].mxu0 %vm769_vm1, %v1812_v43  ;;  %8844 = vmatmul.mubr.msk.f32.gmra.mrb[98].mxu1 %vm769_vm1, %v1812_v43  ;;  %v1814_v43 = vld [vmem:[%s14259_s7 + $0xe0] sm:$0xff] }
 0x178   : > { %2268 = vmatprep.mubr.f32.mxu0 %v14322_v55  ;;  %2717 = vmatprep.mubr.f32.mxu1 %v14322_v55 }
 0x17b   : > { %8781 = vmatmul.mubr.msk.f32.gmra.mrb[100].mxu0 %vm769_vm1, %v1813_v63  ;;  %8845 = vmatmul.mubr.msk.f32.gmra.mrb[100].mxu1 %vm769_vm1, %v1813_v63  ;;  %v1815_v63 = vld [vmem:[%s14259_s7 + $0xe8] sm:$0xff] }
 0x17c   : > { %2274 = vmatprep.mubr.f32.mxu0 %v14322_v55  ;;  %2723 = vmatprep.mubr.f32.mxu1 %v14322_v55 }
 0x17f   : > { %8782 = vmatmul.mubr.msk.f32.gmra.mrb[102].mxu0 %vm769_vm1, %v1814_v43  ;;  %8846 = vmatmul.mubr.msk.f32.gmra.mrb[102].mxu1 %vm769_vm1, %v1814_v43  ;;  %v1816_v43 = vld [vmem:[%s14259_s7 + $0xf0] sm:$0xff] }
 0x180   : > { %2280 = vmatprep.mubr.f32.mxu0 %v14322_v55  ;;  %2729 = vmatprep.mubr.f32.mxu1 %v14322_v55 }
 0x183   : > { %8783 = vmatmul.mubr.msk.f32.gmra.mrb[104].mxu0 %vm769_vm1, %v1815_v63  ;;  %8847 = vmatmul.mubr.msk.f32.gmra.mrb[104].mxu1 %vm769_vm1, %v1815_v63  ;;  %v1817_v63 = vld [vmem:[%s14259_s7 + $0xf8] sm:$0xff] }
 0x184   : > { %2286 = vmatprep.mubr.f32.mxu0 %v14322_v55  ;;  %2735 = vmatprep.mubr.f32.mxu1 %v14322_v55 }
 0x187   : > { %8784 = vmatmul.mubr.msk.f32.gmra.mrb[106].mxu0 %vm769_vm1, %v1816_v43  ;;  %8848 = vmatmul.mubr.msk.f32.gmra.mrb[106].mxu1 %vm769_vm1, %v1816_v43  ;;  %v1818_v43 = vld [vmem:[%s14259_s7 + $0x100] sm:$0xff] }
 0x188   : > { %2292 = vmatprep.mubr.f32.mxu0 %v14322_v55  ;;  %2741 = vmatprep.mubr.f32.mxu1 %v14322_v55 }
 0x18b   : > { %8785 = vmatmul.mubr.msk.f32.gmra.mrb[108].mxu0 %vm769_vm1, %v1817_v63  ;;  %8849 = vmatmul.mubr.msk.f32.gmra.mrb[108].mxu1 %vm769_vm1, %v1817_v63  ;;  %v1819_v63 = vld [vmem:[%s14259_s7 + $0x108] sm:$0xff] }
 0x18c   : > { %2298 = vmatprep.mubr.f32.mxu0 %v14322_v55  ;;  %2747 = vmatprep.mubr.f32.mxu1 %v14322_v55 }
 0x18f   : > { %8786 = vmatmul.mubr.msk.f32.gmra.mrb[110].mxu0 %vm769_vm1, %v1818_v43  ;;  %8850 = vmatmul.mubr.msk.f32.gmra.mrb[110].mxu1 %vm769_vm1, %v1818_v43  ;;  %v1820_v43 = vld [vmem:[%s14259_s7 + $0x110] sm:$0xff] }
 0x190   : > { %2304 = vmatprep.mubr.f32.mxu0 %v14322_v55  ;;  %2753 = vmatprep.mubr.f32.mxu1 %v14322_v55 }
 0x193   : > { %8787 = vmatmul.mubr.msk.f32.gmra.mrb[112].mxu0 %vm769_vm1, %v1819_v63  ;;  %8851 = vmatmul.mubr.msk.f32.gmra.mrb[112].mxu1 %vm769_vm1, %v1819_v63  ;;  %v1821_v63 = vld [vmem:[%s14259_s7 + $0x118] sm:$0xff] }
 0x194   : > { %2310 = vmatprep.mubr.f32.mxu0 %v14322_v55  ;;  %2759 = vmatprep.mubr.f32.mxu1 %v14322_v55 }
 0x197   : > { %8788 = vmatmul.mubr.msk.f32.gmra.mrb[114].mxu0 %vm769_vm1, %v1820_v43  ;;  %8852 = vmatmul.mubr.msk.f32.gmra.mrb[114].mxu1 %vm769_vm1, %v1820_v43  ;;  %v1822_v43 = vld [vmem:[%s14259_s7 + $0x120] sm:$0xff] }
 0x198   : > { %2316 = vmatprep.mubr.f32.mxu0 %v14322_v55  ;;  %2765 = vmatprep.mubr.f32.mxu1 %v14322_v55 }
 0x19b   : > { %8789 = vmatmul.mubr.msk.f32.gmra.mrb[116].mxu0 %vm769_vm1, %v1821_v63  ;;  %8853 = vmatmul.mubr.msk.f32.gmra.mrb[116].mxu1 %vm769_vm1, %v1821_v63  ;;  %v1823_v63 = vld [vmem:[%s14259_s7 + $0x128] sm:$0xff] }
 0x19c   : > { %2322 = vmatprep.mubr.f32.mxu0 %v14322_v55  ;;  %2771 = vmatprep.mubr.f32.mxu1 %v14322_v55 }
 0x19f   : > { %8790 = vmatmul.mubr.msk.f32.gmra.mrb[118].mxu0 %vm769_vm1, %v1822_v43  ;;  %8854 = vmatmul.mubr.msk.f32.gmra.mrb[118].mxu1 %vm769_vm1, %v1822_v43  ;;  %v1824_v43 = vld [vmem:[%s14259_s7 + $0x130] sm:$0xff] }
 0x1a0   : > { %2328 = vmatprep.mubr.f32.mxu0 %v14322_v55  ;;  %2777 = vmatprep.mubr.f32.mxu1 %v14322_v55 }
 0x1a3   : > { %8791 = vmatmul.mubr.msk.f32.gmra.mrb[120].mxu0 %vm769_vm1, %v1823_v63  ;;  %8855 = vmatmul.mubr.msk.f32.gmra.mrb[120].mxu1 %vm769_vm1, %v1823_v63  ;;  %v1825_v63 = vld [vmem:[%s14259_s7 + $0x138] sm:$0xff] }
 0x1a4   : > { %2334 = vmatprep.mubr.f32.mxu0 %v14322_v55  ;;  %2783 = vmatprep.mubr.f32.mxu1 %v14322_v55 }
 0x1a7   : > { %8792 = vmatmul.mubr.msk.f32.gmra.mrb[122].mxu0 %vm769_vm1, %v1824_v43  ;;  %8856 = vmatmul.mubr.msk.f32.gmra.mrb[122].mxu1 %vm769_vm1, %v1824_v43  ;;  %v1826_v43 = vld [vmem:[%s14259_s7 + $0x140] sm:$0xff] }
 0x1a8   : > { %2340 = vmatprep.mubr.f32.mxu0 %v14322_v55  ;;  %2789 = vmatprep.mubr.f32.mxu1 %v14322_v55 }
 0x1ab   : > { %8793 = vmatmul.mubr.msk.f32.gmra.mrb[124].mxu0 %vm769_vm1, %v1825_v63  ;;  %8857 = vmatmul.mubr.msk.f32.gmra.mrb[124].mxu1 %vm769_vm1, %v1825_v63  ;;  %v1827_v63 = vld [vmem:[%s14259_s7 + $0x148] sm:$0xff] }
 0x1ac   : > { %2346 = vmatprep.mubr.f32.mxu0 %v14322_v55  ;;  %2795 = vmatprep.mubr.f32.mxu1 %v14322_v55 }
 0x1af   : > { %8794 = vmatmul.mubr.msk.f32.gmra.mrb[126].mxu0 %vm769_vm1, %v1826_v43  ;;  %8858 = vmatmul.mubr.msk.f32.gmra.mrb[126].mxu1 %vm769_vm1, %v1826_v43  ;;  %v1828_v43 = vld [vmem:[%s14259_s7 + $0x150] sm:$0xff] }
 0x1b0   : > { %2352 = vmatprep.mubr.f32.mxu0 %v14322_v55  ;;  %2801 = vmatprep.mubr.f32.mxu1 %v14322_v55 }
 0x1b3   : > { %8795 = vmatmul.mubr.msk.f32.gmra.mrb[128].mxu0 %vm769_vm1, %v1827_v63  ;;  %8859 = vmatmul.mubr.msk.f32.gmra.mrb[128].mxu1 %vm769_vm1, %v1827_v63  ;;  %v1829_v63 = vld [vmem:[%s14259_s7 + $0x158] sm:$0xff] }
 0x1b4   : > { %2358 = vmatprep.mubr.f32.mxu0 %v14322_v55  ;;  %2807 = vmatprep.mubr.f32.mxu1 %v14322_v55 }
 0x1b7   : > { %8796 = vmatmul.mubr.msk.f32.gmra.mrb[130].mxu0 %vm769_vm1, %v1828_v43  ;;  %8860 = vmatmul.mubr.msk.f32.gmra.mrb[130].mxu1 %vm769_vm1, %v1828_v43  ;;  %v1830_v43 = vld [vmem:[%s14259_s7 + $0x160] sm:$0xff] }
 0x1b8   : > { %2364 = vmatprep.mubr.f32.mxu0 %v14322_v55  ;;  %2813 = vmatprep.mubr.f32.mxu1 %v14322_v55 }
 0x1bb   : > { %8797 = vmatmul.mubr.msk.f32.gmra.mrb[132].mxu0 %vm769_vm1, %v1829_v63  ;;  %8861 = vmatmul.mubr.msk.f32.gmra.mrb[132].mxu1 %vm769_vm1, %v1829_v63  ;;  %v1831_v63 = vld [vmem:[%s14259_s7 + $0x168] sm:$0xff] }
 0x1bc   : > { %2370 = vmatprep.mubr.f32.mxu0 %v14322_v55  ;;  %2819 = vmatprep.mubr.f32.mxu1 %v14322_v55 }
 0x1bf   : > { %8798 = vmatmul.mubr.msk.f32.gmra.mrb[134].mxu0 %vm769_vm1, %v1830_v43  ;;  %8862 = vmatmul.mubr.msk.f32.gmra.mrb[134].mxu1 %vm769_vm1, %v1830_v43  ;;  %v1832_v43 = vld [vmem:[%s14259_s7 + $0x170] sm:$0xff] }
 0x1c0   : > { %2376 = vmatprep.mubr.f32.mxu0 %v14322_v55  ;;  %2825 = vmatprep.mubr.f32.mxu1 %v14322_v55 }
 0x1c3   : > { %8799 = vmatmul.mubr.msk.f32.gmra.mrb[136].mxu0 %vm769_vm1, %v1831_v63  ;;  %8863 = vmatmul.mubr.msk.f32.gmra.mrb[136].mxu1 %vm769_vm1, %v1831_v63  ;;  %v1833_v63 = vld [vmem:[%s14259_s7 + $0x178] sm:$0xff] }
 0x1c4   : > { %2382 = vmatprep.mubr.f32.mxu0 %v14322_v55  ;;  %2831 = vmatprep.mubr.f32.mxu1 %v14322_v55 }
 0x1c7   : > { %8800 = vmatmul.mubr.msk.f32.gmra.mrb[138].mxu0 %vm769_vm1, %v1832_v43  ;;  %8864 = vmatmul.mubr.msk.f32.gmra.mrb[138].mxu1 %vm769_vm1, %v1832_v43  ;;  %v1834_v43 = vld [vmem:[%s14259_s7 + $0x180] sm:$0xff] }
 0x1c8   : > { %2388 = vmatprep.mubr.f32.mxu0 %v14322_v55  ;;  %2837 = vmatprep.mubr.f32.mxu1 %v14322_v55 }
 0x1cb   : > { %8801 = vmatmul.mubr.msk.f32.gmra.mrb[140].mxu0 %vm769_vm1, %v1833_v63  ;;  %8865 = vmatmul.mubr.msk.f32.gmra.mrb[140].mxu1 %vm769_vm1, %v1833_v63  ;;  %v1835_v63 = vld [vmem:[%s14259_s7 + $0x188] sm:$0xff] }
 0x1cc   : > { %2394 = vmatprep.mubr.f32.mxu0 %v14322_v55  ;;  %2843 = vmatprep.mubr.f32.mxu1 %v14322_v55 }
 0x1cf   : > { %8802 = vmatmul.mubr.msk.f32.gmra.mrb[142].mxu0 %vm769_vm1, %v1834_v43  ;;  %8866 = vmatmul.mubr.msk.f32.gmra.mrb[142].mxu1 %vm769_vm1, %v1834_v43  ;;  %v1836_v43 = vld [vmem:[%s14259_s7 + $0x190] sm:$0xff] }
 0x1d0   : > { %2400 = vmatprep.mubr.f32.mxu0 %v14322_v55  ;;  %2849 = vmatprep.mubr.f32.mxu1 %v14322_v55 }
 0x1d3   : > { %8803 = vmatmul.mubr.msk.f32.gmra.mrb[144].mxu0 %vm769_vm1, %v1835_v63  ;;  %8867 = vmatmul.mubr.msk.f32.gmra.mrb[144].mxu1 %vm769_vm1, %v1835_v63  ;;  %v1837_v63 = vld [vmem:[%s14259_s7 + $0x198] sm:$0xff] }
 0x1d4   : > { %2406 = vmatprep.mubr.f32.mxu0 %v14322_v55  ;;  %2855 = vmatprep.mubr.f32.mxu1 %v14322_v55 }
 0x1d7   : > { %8804 = vmatmul.mubr.msk.f32.gmra.mrb[146].mxu0 %vm769_vm1, %v1836_v43  ;;  %8868 = vmatmul.mubr.msk.f32.gmra.mrb[146].mxu1 %vm769_vm1, %v1836_v43  ;;  %v1838_v43 = vld [vmem:[%s14259_s7 + $0x1a0] sm:$0xff] }
 0x1d8   : > { %2412 = vmatprep.mubr.f32.mxu0 %v14322_v55  ;;  %2861 = vmatprep.mubr.f32.mxu1 %v14322_v55 }
 0x1db   : > { %8805 = vmatmul.mubr.msk.f32.gmra.mrb[148].mxu0 %vm769_vm1, %v1837_v63  ;;  %8869 = vmatmul.mubr.msk.f32.gmra.mrb[148].mxu1 %vm769_vm1, %v1837_v63  ;;  %v1839_v63 = vld [vmem:[%s14259_s7 + $0x1a8] sm:$0xff] }
 0x1dc   : > { %2418 = vmatprep.mubr.f32.mxu0 %v14322_v55  ;;  %2867 = vmatprep.mubr.f32.mxu1 %v14322_v55 }
 0x1df   : > { %8806 = vmatmul.mubr.msk.f32.gmra.mrb[150].mxu0 %vm769_vm1, %v1838_v43  ;;  %8870 = vmatmul.mubr.msk.f32.gmra.mrb[150].mxu1 %vm769_vm1, %v1838_v43  ;;  %v1840_v43 = vld [vmem:[%s14259_s7 + $0x1b0] sm:$0xff] }
 0x1e0   : > { %2424 = vmatprep.mubr.f32.mxu0 %v14322_v55  ;;  %2873 = vmatprep.mubr.f32.mxu1 %v14322_v55 }
 0x1e3   : > { %8807 = vmatmul.mubr.msk.f32.gmra.mrb[152].mxu0 %vm769_vm1, %v1839_v63  ;;  %8871 = vmatmul.mubr.msk.f32.gmra.mrb[152].mxu1 %vm769_vm1, %v1839_v63  ;;  %v1841_v63 = vld [vmem:[%s14259_s7 + $0x1b8] sm:$0xff] }
 0x1e4   : > { %2430 = vmatprep.mubr.f32.mxu0 %v14322_v55  ;;  %2879 = vmatprep.mubr.f32.mxu1 %v14322_v55 }
 0x1e7   : > { %8808 = vmatmul.mubr.msk.f32.gmra.mrb[154].mxu0 %vm769_vm1, %v1840_v43  ;;  %8872 = vmatmul.mubr.msk.f32.gmra.mrb[154].mxu1 %vm769_vm1, %v1840_v43  ;;  %v1842_v43 = vld [vmem:[%s14259_s7 + $0x1c0] sm:$0xff] }
 0x1e8   : > { %2436 = vmatprep.mubr.f32.mxu0 %v14322_v55  ;;  %2885 = vmatprep.mubr.f32.mxu1 %v14322_v55 }
 0x1eb   : > { %8809 = vmatmul.mubr.msk.f32.gmra.mrb[156].mxu0 %vm769_vm1, %v1841_v63  ;;  %8873 = vmatmul.mubr.msk.f32.gmra.mrb[156].mxu1 %vm769_vm1, %v1841_v63  ;;  %v1843_v63 = vld [vmem:[%s14259_s7 + $0x1c8] sm:$0xff] }
 0x1ec   : > { %2442 = vmatprep.mubr.f32.mxu0 %v14322_v55  ;;  %2891 = vmatprep.mubr.f32.mxu1 %v14322_v55 }
 0x1ef   : > { %8810 = vmatmul.mubr.msk.f32.gmra.mrb[158].mxu0 %vm769_vm1, %v1842_v43  ;;  %8874 = vmatmul.mubr.msk.f32.gmra.mrb[158].mxu1 %vm769_vm1, %v1842_v43  ;;  %v1844_v43 = vld [vmem:[%s14259_s7 + $0x1d0] sm:$0xff] }
 0x1f0   : > { %2448 = vmatprep.mubr.f32.mxu0 %v14322_v55  ;;  %2897 = vmatprep.mubr.f32.mxu1 %v14322_v55 }
 0x1f3   : > { %8811 = vmatmul.mubr.msk.f32.gmra.mrb[160].mxu0 %vm769_vm1, %v1843_v63  ;;  %8875 = vmatmul.mubr.msk.f32.gmra.mrb[160].mxu1 %vm769_vm1, %v1843_v63  ;;  %v1845_v63 = vld [vmem:[%s14259_s7 + $0x1d8] sm:$0xff] }
 0x1f4   : > { %2454 = vmatprep.mubr.f32.mxu0 %v14322_v55  ;;  %2903 = vmatprep.mubr.f32.mxu1 %v14322_v55 }
 0x1f7   : > { %8812 = vmatmul.mubr.msk.f32.gmra.mrb[162].mxu0 %vm769_vm1, %v1844_v43  ;;  %8876 = vmatmul.mubr.msk.f32.gmra.mrb[162].mxu1 %vm769_vm1, %v1844_v43  ;;  %v1846_v43 = vld [vmem:[%s14259_s7 + $0x1e0] sm:$0xff] }
 0x1f8   : > { %2460 = vmatprep.mubr.f32.mxu0 %v14322_v55  ;;  %2909 = vmatprep.mubr.f32.mxu1 %v14322_v55 }
 0x1fb   : > { %8813 = vmatmul.mubr.msk.f32.gmra.mrb[164].mxu0 %vm769_vm1, %v1845_v63  ;;  %8877 = vmatmul.mubr.msk.f32.gmra.mrb[164].mxu1 %vm769_vm1, %v1845_v63  ;;  %v1847_v63 = vld [vmem:[%s14259_s7 + $0x1e8] sm:$0xff] }
 0x1fc   : > { %2466 = vmatprep.mubr.f32.mxu0 %v14322_v55  ;;  %2915 = vmatprep.mubr.f32.mxu1 %v14322_v55 }
 0x1ff   : > { %8814 = vmatmul.mubr.msk.f32.gmra.mrb[166].mxu0 %vm769_vm1, %v1846_v43  ;;  %8878 = vmatmul.mubr.msk.f32.gmra.mrb[166].mxu1 %vm769_vm1, %v1846_v43  ;;  %v1848_v43 = vld [vmem:[%s14259_s7 + $0x1f0] sm:$0xff] }
 0x200   : > { %2472 = vmatprep.mubr.f32.mxu0 %v14322_v55  ;;  %2921 = vmatprep.mubr.f32.mxu1 %v14322_v55 }
 0x203   : > { %8815 = vmatmul.mubr.msk.f32.gmra.mrb[168].mxu0 %vm769_vm1, %v1847_v63  ;;  %8879 = vmatmul.mubr.msk.f32.gmra.mrb[168].mxu1 %vm769_vm1, %v1847_v63  ;;  %v1849_v63 = vld [vmem:[%s14259_s7 + $0x1f8] sm:$0xff] }
 0x204   : > { %2478 = vmatprep.mubr.f32.mxu0 %v14322_v55  ;;  %2927 = vmatprep.mubr.f32.mxu1 %v14322_v55 }
 0x207   : > { %8816 = vmatmul.mubr.msk.f32.gmra.mrb[170].mxu0 %vm769_vm1, %v1848_v43  ;;  %8880 = vmatmul.mubr.msk.f32.gmra.mrb[170].mxu1 %vm769_vm1, %v1848_v43  ;;  %v1722_v43 = vld [vmem:[%s14257_s5] sm:$0xff] }
 0x208   : > { %2484 = vmatprep.mubr.f32.mxu0 %v14322_v55  ;;  %2933 = vmatprep.mubr.f32.mxu1 %v14322_v55 }
 0x20b   : > { %8817 = vmatmul.mubr.msk.f32.gmra.mrb[172].mxu0 %vm769_vm1, %v1849_v63  ;;  %8881 = vmatmul.mubr.msk.f32.gmra.mrb[172].mxu1 %vm769_vm1, %v1849_v63  ;;  %v1723_v63 = vld [vmem:[%s14257_s5 + $0x8] sm:$0xff] }
 0x20c   : > { %3196 = vmatprep.mubr.f32.mxu0 %v14322_v55  ;;  %3645 = vmatprep.mubr.f32.mxu1 %v14322_v55 }
 0x20f   : > { %8882 = vmatmul.mubr.msk.f32.vlgmr.msra.gmra.mrb[46].mxu0 %vm613_vm0, %v1722_v43  ;;  %8946 = vmatmul.mubr.msk.f32.vlgmr.msra.gmra.mrb[46].mxu1 %vm613_vm0, %v1722_v43  ;;  %v1740_v43 = vld [vmem:[%s14257_s5 + $0x90] sm:$0xff] }
 0x210   : > { %9507 = vmatpush1.bf16.msra.mxu0 %v14332_v15  ;;  %9515 = vmatpush1.bf16.msra.mxu1 %v14333_v12  ;;  %v1733_v15 = vld [vmem:[%s14257_s5 + $0x58] sm:$0xff]  ;;  %v1739_v12 = vld [vmem:[%s14257_s5 + $0x88] sm:$0xff] }
 0x211   : > { %9509 = vmatprep.subr.bf16.mxu0 %v14334_v25  ;;  %9517 = vmatprep.subr.bf16.mxu1 %v14335_v13  ;;  %v1732_v13 = vld [vmem:[%s14257_s5 + $0x50] sm:$0xff]  ;;  %v1738_v25 = vld [vmem:[%s14257_s5 + $0x80] sm:$0xff] }
 0x212   : > { %3202 = vmatprep.mubr.f32.mxu0 %v14322_v55  ;;  %3651 = vmatprep.mubr.f32.mxu1 %v14322_v55 }
 0x213   : > { %8883 = vmatmul.mubr.msk.f32.gmra.mrb[48].mxu0 %vm613_vm0, %v1723_v63  ;;  %8947 = vmatmul.mubr.msk.f32.gmra.mrb[48].mxu1 %vm613_vm0, %v1723_v63  ;;  %v1741_v63 = vld [vmem:[%s14257_s5 + $0x98] sm:$0xff] }
 0x214   : > { %9511 = vmatpush1.bf16.msra.mxu0 %v14336_v51  ;;  %9519 = vmatpush1.bf16.msra.mxu1 %v14337_v52  ;;  %v1742_v51 = vld [vmem:[%s14257_s5 + $0xa0] sm:$0xff]  ;;  %v1743_v52 = vld [vmem:[%s14257_s5 + $0xa8] sm:$0xff] }
 0x215   : > { %9521 = vmatprep.subr.bf16.mxu0 %v14338_v57  ;;  %9537 = vmatprep.subr.bf16.mxu1 %v14339_v4  ;;  %v1745_v57 = vld [vmem:[%s14257_s5 + $0xb8] sm:$0xff]  ;;  %v1746_v4 = vld [vmem:[%s14257_s5 + $0xc0] sm:$0xff] }
 0x216   : > { %3208 = vmatprep.mubr.f32.mxu0 %v14322_v55  ;;  %3657 = vmatprep.mubr.f32.mxu1 %v14322_v55 }
 0x217   : > { %8884 = vmatmul.mubr.msk.f32.gmra.mrb[50].mxu0 %vm613_vm0, %v1724_v56  ;;  %8948 = vmatmul.mubr.msk.f32.gmra.mrb[50].mxu1 %vm613_vm0, %v1724_v56  ;;  %v1744_v56 = vld [vmem:[%s14257_s5 + $0xb0] sm:$0xff] }
 0x218   : > { %3214 = vmatprep.mubr.f32.mxu0 %v14322_v55  ;;  %3663 = vmatprep.mubr.f32.mxu1 %v14322_v55 }
 0x21b   : > { %8885 = vmatmul.mubr.msk.f32.gmra.mrb[52].mxu0 %vm613_vm0, %v1725_v1  ;;  %8949 = vmatmul.mubr.msk.f32.gmra.mrb[52].mxu1 %vm613_vm0, %v1725_v1  ;;  %v1747_v1 = vld [vmem:[%s14257_s5 + $0xc8] sm:$0xff] }
 0x21c   : > { %3220 = vmatprep.mubr.f32.mxu0 %v14322_v55  ;;  %3669 = vmatprep.mubr.f32.mxu1 %v14322_v55 }
 0x21f   : > { %8886 = vmatmul.mubr.msk.f32.gmra.mrb[54].mxu0 %vm613_vm0, %v1726_v2  ;;  %8950 = vmatmul.mubr.msk.f32.gmra.mrb[54].mxu1 %vm613_vm0, %v1726_v2  ;;  %v1748_v2 = vld [vmem:[%s14257_s5 + $0xd0] sm:$0xff] }
 0x220   : > { %3226 = vmatprep.mubr.f32.mxu0 %v14322_v55  ;;  %3675 = vmatprep.mubr.f32.mxu1 %v14322_v55 }
 0x223   : > { %8887 = vmatmul.mubr.msk.f32.gmra.mrb[56].mxu0 %vm613_vm0, %v1727_v5  ;;  %8951 = vmatmul.mubr.msk.f32.gmra.mrb[56].mxu1 %vm613_vm0, %v1727_v5  ;;  %v1749_v5 = vld [vmem:[%s14257_s5 + $0xd8] sm:$0xff] }
 0x224   : > { %3232 = vmatprep.mubr.f32.mxu0 %v14322_v55  ;;  %3681 = vmatprep.mubr.f32.mxu1 %v14322_v55 }
 0x227   : > { %8888 = vmatmul.mubr.msk.f32.gmra.mrb[58].mxu0 %vm613_vm0, %v1728_v7  ;;  %8952 = vmatmul.mubr.msk.f32.gmra.mrb[58].mxu1 %vm613_vm0, %v1728_v7  ;;  %v1750_v7 = vld [vmem:[%s14257_s5 + $0xe0] sm:$0xff] }
 0x228   : > { %3238 = vmatprep.mubr.f32.mxu0 %v14322_v55  ;;  %3687 = vmatprep.mubr.f32.mxu1 %v14322_v55 }
 0x22b   : > { %8889 = vmatmul.mubr.msk.f32.gmra.mrb[60].mxu0 %vm613_vm0, %v1729_v8  ;;  %8953 = vmatmul.mubr.msk.f32.gmra.mrb[60].mxu1 %vm613_vm0, %v1729_v8  ;;  %v1751_v8 = vld [vmem:[%s14257_s5 + $0xe8] sm:$0xff] }
 0x22c   : > { %3244 = vmatprep.mubr.f32.mxu0 %v14322_v55  ;;  %3693 = vmatprep.mubr.f32.mxu1 %v14322_v55 }
 0x22f   : > { %8890 = vmatmul.mubr.msk.f32.gmra.mrb[62].mxu0 %vm613_vm0, %v1730_v9  ;;  %8954 = vmatmul.mubr.msk.f32.gmra.mrb[62].mxu1 %vm613_vm0, %v1730_v9  ;;  %v1752_v9 = vld [vmem:[%s14257_s5 + $0xf0] sm:$0xff] }
 0x230   : > { %3250 = vmatprep.mubr.f32.mxu0 %v14322_v55  ;;  %3699 = vmatprep.mubr.f32.mxu1 %v14322_v55 }
 0x233   : > { %8891 = vmatmul.mubr.msk.f32.gmra.mrb[64].mxu0 %vm613_vm0, %v1731_v10  ;;  %8955 = vmatmul.mubr.msk.f32.gmra.mrb[64].mxu1 %vm613_vm0, %v1731_v10  ;;  %v1753_v10 = vld [vmem:[%s14257_s5 + $0xf8] sm:$0xff] }
 0x234   : > { %3256 = vmatprep.mubr.f32.mxu0 %v14322_v55  ;;  %3705 = vmatprep.mubr.f32.mxu1 %v14322_v55 }
 0x237   : > { %8892 = vmatmul.mubr.msk.f32.gmra.mrb[66].mxu0 %vm613_vm0, %v1732_v13  ;;  %8956 = vmatmul.mubr.msk.f32.gmra.mrb[66].mxu1 %vm613_vm0, %v1732_v13  ;;  %v1754_v13 = vld [vmem:[%s14257_s5 + $0x100] sm:$0xff] }
 0x238   : > { %3262 = vmatprep.mubr.f32.mxu0 %v14322_v55  ;;  %3711 = vmatprep.mubr.f32.mxu1 %v14322_v55 }
 0x23b   : > { %8893 = vmatmul.mubr.msk.f32.gmra.mrb[68].mxu0 %vm613_vm0, %v1733_v15  ;;  %8957 = vmatmul.mubr.msk.f32.gmra.mrb[68].mxu1 %vm613_vm0, %v1733_v15  ;;  %v1755_v15 = vld [vmem:[%s14257_s5 + $0x108] sm:$0xff] }
 0x23c   : > { %3268 = vmatprep.mubr.f32.mxu0 %v14322_v55  ;;  %3717 = vmatprep.mubr.f32.mxu1 %v14322_v55 }
 0x23f   : > { %8894 = vmatmul.mubr.msk.f32.gmra.mrb[70].mxu0 %vm613_vm0, %v1734_v19  ;;  %8958 = vmatmul.mubr.msk.f32.gmra.mrb[70].mxu1 %vm613_vm0, %v1734_v19  ;;  %v1756_v19 = vld [vmem:[%s14257_s5 + $0x110] sm:$0xff] }
 0x240   : > { %3274 = vmatprep.mubr.f32.mxu0 %v14322_v55  ;;  %3723 = vmatprep.mubr.f32.mxu1 %v14322_v55 }
 0x243   : > { %8895 = vmatmul.mubr.msk.f32.gmra.mrb[72].mxu0 %vm613_vm0, %v1735_v20  ;;  %8959 = vmatmul.mubr.msk.f32.gmra.mrb[72].mxu1 %vm613_vm0, %v1735_v20  ;;  %v1757_v20 = vld [vmem:[%s14257_s5 + $0x118] sm:$0xff] }
 0x244   : > { %3280 = vmatprep.mubr.f32.mxu0 %v14322_v55  ;;  %3729 = vmatprep.mubr.f32.mxu1 %v14322_v55 }
 0x247   : > { %8896 = vmatmul.mubr.msk.f32.gmra.mrb[74].mxu0 %vm613_vm0, %v1736_v23  ;;  %8960 = vmatmul.mubr.msk.f32.gmra.mrb[74].mxu1 %vm613_vm0, %v1736_v23  ;;  %v1758_v23 = vld [vmem:[%s14257_s5 + $0x120] sm:$0xff] }
 0x248   : > { %3286 = vmatprep.mubr.f32.mxu0 %v14322_v55  ;;  %3735 = vmatprep.mubr.f32.mxu1 %v14322_v55 }
 0x24b   : > { %8897 = vmatmul.mubr.msk.f32.gmra.mrb[76].mxu0 %vm613_vm0, %v1737_v24  ;;  %8961 = vmatmul.mubr.msk.f32.gmra.mrb[76].mxu1 %vm613_vm0, %v1737_v24  ;;  %v1759_v24 = vld [vmem:[%s14257_s5 + $0x128] sm:$0xff] }
 0x24c   : > { %3292 = vmatprep.mubr.f32.mxu0 %v14322_v55  ;;  %3741 = vmatprep.mubr.f32.mxu1 %v14322_v55 }
 0x24f   : > { %8898 = vmatmul.mubr.msk.f32.gmra.mrb[78].mxu0 %vm613_vm0, %v1738_v25  ;;  %8962 = vmatmul.mubr.msk.f32.gmra.mrb[78].mxu1 %vm613_vm0, %v1738_v25  ;;  %v1760_v25 = vld [vmem:[%s14257_s5 + $0x130] sm:$0xff] }
 0x250   : > { %3298 = vmatprep.mubr.f32.mxu0 %v14322_v55  ;;  %3747 = vmatprep.mubr.f32.mxu1 %v14322_v55 }
 0x253   : > { %8899 = vmatmul.mubr.msk.f32.gmra.mrb[80].mxu0 %vm613_vm0, %v1739_v12  ;;  %8963 = vmatmul.mubr.msk.f32.gmra.mrb[80].mxu1 %vm613_vm0, %v1739_v12  ;;  %v1761_v12 = vld [vmem:[%s14257_s5 + $0x138] sm:$0xff] }
 0x254   : > { %3304 = vmatprep.mubr.f32.mxu0 %v14322_v55  ;;  %3753 = vmatprep.mubr.f32.mxu1 %v14322_v55 }
 0x257   : > { %8900 = vmatmul.mubr.msk.f32.gmra.mrb[82].mxu0 %vm613_vm0, %v1740_v43  ;;  %8964 = vmatmul.mubr.msk.f32.gmra.mrb[82].mxu1 %vm613_vm0, %v1740_v43  ;;  %v1762_v43 = vld [vmem:[%s14257_s5 + $0x140] sm:$0xff] }
 0x258   : > { %3310 = vmatprep.mubr.f32.mxu0 %v14322_v55  ;;  %3759 = vmatprep.mubr.f32.mxu1 %v14322_v55 }
 0x25b   : > { %8901 = vmatmul.mubr.msk.f32.gmra.mrb[84].mxu0 %vm613_vm0, %v1741_v63  ;;  %8965 = vmatmul.mubr.msk.f32.gmra.mrb[84].mxu1 %vm613_vm0, %v1741_v63  ;;  %v1763_v63 = vld [vmem:[%s14257_s5 + $0x148] sm:$0xff] }
 0x25c   : > { %3316 = vmatprep.mubr.f32.mxu0 %v14322_v55  ;;  %3765 = vmatprep.mubr.f32.mxu1 %v14322_v55 }
 0x25f   : > { %8902 = vmatmul.mubr.msk.f32.gmra.mrb[86].mxu0 %vm613_vm0, %v1742_v51  ;;  %8966 = vmatmul.mubr.msk.f32.gmra.mrb[86].mxu1 %vm613_vm0, %v1742_v51  ;;  %v1764_v51 = vld [vmem:[%s14257_s5 + $0x150] sm:$0xff] }
 0x260   : > { %3322 = vmatprep.mubr.f32.mxu0 %v14322_v55  ;;  %3771 = vmatprep.mubr.f32.mxu1 %v14322_v55 }
 0x263   : > { %8903 = vmatmul.mubr.msk.f32.gmra.mrb[88].mxu0 %vm613_vm0, %v1743_v52  ;;  %8967 = vmatmul.mubr.msk.f32.gmra.mrb[88].mxu1 %vm613_vm0, %v1743_v52  ;;  %v1765_v52 = vld [vmem:[%s14257_s5 + $0x158] sm:$0xff] }
 0x264   : > { %3328 = vmatprep.mubr.f32.mxu0 %v14322_v55  ;;  %3777 = vmatprep.mubr.f32.mxu1 %v14322_v55 }
 0x267   : > { %8904 = vmatmul.mubr.msk.f32.gmra.mrb[90].mxu0 %vm613_vm0, %v1744_v56  ;;  %8968 = vmatmul.mubr.msk.f32.gmra.mrb[90].mxu1 %vm613_vm0, %v1744_v56  ;;  %v1766_v56 = vld [vmem:[%s14257_s5 + $0x160] sm:$0xff] }
 0x268   : > { %3334 = vmatprep.mubr.f32.mxu0 %v14322_v55  ;;  %3783 = vmatprep.mubr.f32.mxu1 %v14322_v55 }
 0x26b   : > { %8905 = vmatmul.mubr.msk.f32.gmra.mrb[92].mxu0 %vm613_vm0, %v1745_v57  ;;  %8969 = vmatmul.mubr.msk.f32.gmra.mrb[92].mxu1 %vm613_vm0, %v1745_v57  ;;  %v1767_v57 = vld [vmem:[%s14257_s5 + $0x168] sm:$0xff] }
 0x26c   : > { %3340 = vmatprep.mubr.f32.mxu0 %v14322_v55  ;;  %3789 = vmatprep.mubr.f32.mxu1 %v14322_v55 }
 0x26f   : > { %8906 = vmatmul.mubr.msk.f32.gmra.mrb[94].mxu0 %vm613_vm0, %v1746_v4  ;;  %8970 = vmatmul.mubr.msk.f32.gmra.mrb[94].mxu1 %vm613_vm0, %v1746_v4  ;;  %v1768_v4 = vld [vmem:[%s14257_s5 + $0x170] sm:$0xff] }
 0x270   : > { %3346 = vmatprep.mubr.f32.mxu0 %v14322_v55  ;;  %3795 = vmatprep.mubr.f32.mxu1 %v14322_v55 }
 0x273   : > { %8907 = vmatmul.mubr.msk.f32.gmra.mrb[96].mxu0 %vm613_vm0, %v1747_v1  ;;  %8971 = vmatmul.mubr.msk.f32.gmra.mrb[96].mxu1 %vm613_vm0, %v1747_v1  ;;  %v1769_v1 = vld [vmem:[%s14257_s5 + $0x178] sm:$0xff] }
 0x274   : > { %3352 = vmatprep.mubr.f32.mxu0 %v14322_v55  ;;  %3801 = vmatprep.mubr.f32.mxu1 %v14322_v55 }
 0x277   : > { %8908 = vmatmul.mubr.msk.f32.gmra.mrb[98].mxu0 %vm613_vm0, %v1748_v2  ;;  %8972 = vmatmul.mubr.msk.f32.gmra.mrb[98].mxu1 %vm613_vm0, %v1748_v2  ;;  %v1770_v2 = vld [vmem:[%s14257_s5 + $0x180] sm:$0xff] }
 0x278   : > { %3358 = vmatprep.mubr.f32.mxu0 %v14322_v55  ;;  %3807 = vmatprep.mubr.f32.mxu1 %v14322_v55 }
 0x27b   : > { %8909 = vmatmul.mubr.msk.f32.gmra.mrb[100].mxu0 %vm613_vm0, %v1749_v5  ;;  %8973 = vmatmul.mubr.msk.f32.gmra.mrb[100].mxu1 %vm613_vm0, %v1749_v5  ;;  %v1771_v5 = vld [vmem:[%s14257_s5 + $0x188] sm:$0xff] }
 0x27c   : > { %3364 = vmatprep.mubr.f32.mxu0 %v14322_v55  ;;  %3813 = vmatprep.mubr.f32.mxu1 %v14322_v55 }
 0x27f   : > { %8910 = vmatmul.mubr.msk.f32.gmra.mrb[102].mxu0 %vm613_vm0, %v1750_v7  ;;  %8974 = vmatmul.mubr.msk.f32.gmra.mrb[102].mxu1 %vm613_vm0, %v1750_v7  ;;  %v1772_v7 = vld [vmem:[%s14257_s5 + $0x190] sm:$0xff] }
 0x280   : > { %3370 = vmatprep.mubr.f32.mxu0 %v14322_v55  ;;  %3819 = vmatprep.mubr.f32.mxu1 %v14322_v55 }
 0x283   : > { %8911 = vmatmul.mubr.msk.f32.gmra.mrb[104].mxu0 %vm613_vm0, %v1751_v8  ;;  %8975 = vmatmul.mubr.msk.f32.gmra.mrb[104].mxu1 %vm613_vm0, %v1751_v8  ;;  %v1773_v8 = vld [vmem:[%s14257_s5 + $0x198] sm:$0xff] }
 0x284   : > { %3376 = vmatprep.mubr.f32.mxu0 %v14322_v55  ;;  %3825 = vmatprep.mubr.f32.mxu1 %v14322_v55 }
 0x287   : > { %8912 = vmatmul.mubr.msk.f32.gmra.mrb[106].mxu0 %vm613_vm0, %v1752_v9  ;;  %8976 = vmatmul.mubr.msk.f32.gmra.mrb[106].mxu1 %vm613_vm0, %v1752_v9  ;;  %v1774_v9 = vld [vmem:[%s14257_s5 + $0x1a0] sm:$0xff] }
 0x288   : > { %3382 = vmatprep.mubr.f32.mxu0 %v14322_v55  ;;  %3831 = vmatprep.mubr.f32.mxu1 %v14322_v55 }
 0x28b   : > { %8913 = vmatmul.mubr.msk.f32.gmra.mrb[108].mxu0 %vm613_vm0, %v1753_v10  ;;  %8977 = vmatmul.mubr.msk.f32.gmra.mrb[108].mxu1 %vm613_vm0, %v1753_v10  ;;  %v1775_v10 = vld [vmem:[%s14257_s5 + $0x1a8] sm:$0xff] }
 0x28c   : > { %3388 = vmatprep.mubr.f32.mxu0 %v14322_v55  ;;  %3837 = vmatprep.mubr.f32.mxu1 %v14322_v55 }
 0x28f   : > { %8914 = vmatmul.mubr.msk.f32.gmra.mrb[110].mxu0 %vm613_vm0, %v1754_v13  ;;  %8978 = vmatmul.mubr.msk.f32.gmra.mrb[110].mxu1 %vm613_vm0, %v1754_v13  ;;  %v1776_v13 = vld [vmem:[%s14257_s5 + $0x1b0] sm:$0xff] }
 0x290   : > { %3394 = vmatprep.mubr.f32.mxu0 %v14322_v55  ;;  %3843 = vmatprep.mubr.f32.mxu1 %v14322_v55 }
 0x293   : > { %8915 = vmatmul.mubr.msk.f32.gmra.mrb[112].mxu0 %vm613_vm0, %v1755_v15  ;;  %8979 = vmatmul.mubr.msk.f32.gmra.mrb[112].mxu1 %vm613_vm0, %v1755_v15  ;;  %v1777_v15 = vld [vmem:[%s14257_s5 + $0x1b8] sm:$0xff] }
 0x294   : > { %3400 = vmatprep.mubr.f32.mxu0 %v14322_v55  ;;  %3849 = vmatprep.mubr.f32.mxu1 %v14322_v55 }
 0x297   : > { %8916 = vmatmul.mubr.msk.f32.gmra.mrb[114].mxu0 %vm613_vm0, %v1756_v19  ;;  %8980 = vmatmul.mubr.msk.f32.gmra.mrb[114].mxu1 %vm613_vm0, %v1756_v19  ;;  %v1778_v19 = vld [vmem:[%s14257_s5 + $0x1c0] sm:$0xff] }
 0x298   : > { %3406 = vmatprep.mubr.f32.mxu0 %v14322_v55  ;;  %3855 = vmatprep.mubr.f32.mxu1 %v14322_v55 }
 0x29b   : > { %8917 = vmatmul.mubr.msk.f32.gmra.mrb[116].mxu0 %vm613_vm0, %v1757_v20  ;;  %8981 = vmatmul.mubr.msk.f32.gmra.mrb[116].mxu1 %vm613_vm0, %v1757_v20  ;;  %v1779_v20 = vld [vmem:[%s14257_s5 + $0x1c8] sm:$0xff] }
 0x29c   : > { %3412 = vmatprep.mubr.f32.mxu0 %v14322_v55  ;;  %3861 = vmatprep.mubr.f32.mxu1 %v14322_v55 }
 0x29f   : > { %8918 = vmatmul.mubr.msk.f32.gmra.mrb[118].mxu0 %vm613_vm0, %v1758_v23  ;;  %8982 = vmatmul.mubr.msk.f32.gmra.mrb[118].mxu1 %vm613_vm0, %v1758_v23  ;;  %v1780_v23 = vld [vmem:[%s14257_s5 + $0x1d0] sm:$0xff] }
 0x2a0   : > { %3418 = vmatprep.mubr.f32.mxu0 %v14322_v55  ;;  %3867 = vmatprep.mubr.f32.mxu1 %v14322_v55 }
 0x2a3   : > { %8919 = vmatmul.mubr.msk.f32.gmra.mrb[120].mxu0 %vm613_vm0, %v1759_v24  ;;  %8983 = vmatmul.mubr.msk.f32.gmra.mrb[120].mxu1 %vm613_vm0, %v1759_v24  ;;  %v1781_v24 = vld [vmem:[%s14257_s5 + $0x1d8] sm:$0xff] }
 0x2a4   : > { %3424 = vmatprep.mubr.f32.mxu0 %v14322_v55  ;;  %3873 = vmatprep.mubr.f32.mxu1 %v14322_v55 }
 0x2a7   : > { %8920 = vmatmul.mubr.msk.f32.gmra.mrb[122].mxu0 %vm613_vm0, %v1760_v25  ;;  %8984 = vmatmul.mubr.msk.f32.gmra.mrb[122].mxu1 %vm613_vm0, %v1760_v25  ;;  %v1782_v25 = vld [vmem:[%s14257_s5 + $0x1e0] sm:$0xff] }
 0x2a8   : > { %3430 = vmatprep.mubr.f32.mxu0 %v14322_v55  ;;  %3879 = vmatprep.mubr.f32.mxu1 %v14322_v55 }
 0x2ab   : > { %8921 = vmatmul.mubr.msk.f32.gmra.mrb[124].mxu0 %vm613_vm0, %v1761_v12  ;;  %8985 = vmatmul.mubr.msk.f32.gmra.mrb[124].mxu1 %vm613_vm0, %v1761_v12  ;;  %v1783_v12 = vld [vmem:[%s14257_s5 + $0x1e8] sm:$0xff] }
 0x2ac   : > { %3436 = vmatprep.mubr.f32.mxu0 %v14322_v55  ;;  %3885 = vmatprep.mubr.f32.mxu1 %v14322_v55 }
 0x2af   : > { %8922 = vmatmul.mubr.msk.f32.gmra.mrb[126].mxu0 %vm613_vm0, %v1762_v43  ;;  %8986 = vmatmul.mubr.msk.f32.gmra.mrb[126].mxu1 %vm613_vm0, %v1762_v43  ;;  %v1784_v43 = vld [vmem:[%s14257_s5 + $0x1f0] sm:$0xff] }
 0x2b0   : > { %3442 = vmatprep.mubr.f32.mxu0 %v14322_v55  ;;  %3891 = vmatprep.mubr.f32.mxu1 %v14322_v55 }
 0x2b3   : > { %8923 = vmatmul.mubr.msk.f32.gmra.mrb[128].mxu0 %vm613_vm0, %v1763_v63  ;;  %8987 = vmatmul.mubr.msk.f32.gmra.mrb[128].mxu1 %vm613_vm0, %v1763_v63  ;;  %v1785_v63 = vld [vmem:[%s14257_s5 + $0x1f8] sm:$0xff] }
 0x2b4   : > { %3448 = vmatprep.mubr.f32.mxu0 %v14322_v55  ;;  %3897 = vmatprep.mubr.f32.mxu1 %v14322_v55 }
 0x2b7   : > { %8924 = vmatmul.mubr.msk.f32.gmra.mrb[130].mxu0 %vm613_vm0, %v1764_v51  ;;  %8988 = vmatmul.mubr.msk.f32.gmra.mrb[130].mxu1 %vm613_vm0, %v1764_v51  ;;  %v4030_v51 = vld [vmem:[%s14261_s9] sm:$0xff] }
 0x2b8   : > { %3454 = vmatprep.mubr.f32.mxu0 %v14322_v55  ;;  %3903 = vmatprep.mubr.f32.mxu1 %v14322_v55 }
 0x2bb   : > { %8925 = vmatmul.mubr.msk.f32.gmra.mrb[132].mxu0 %vm613_vm0, %v1765_v52  ;;  %8989 = vmatmul.mubr.msk.f32.gmra.mrb[132].mxu1 %vm613_vm0, %v1765_v52  ;;  %v14340_v52 = vpack.c.bf16 %v11138_v21, %v11125_v16  ;;  %v14344_v16 = vpack.c.bf16 %v11176_v35, %v11163_v30  ;;  %v4032_v21 = vld [vmem:[%s14261_s9 + $0x10] sm:$0xff]  ;;  %v14348_v30 = vpack.c.bf16 %v11214_v49, %v11201_v44  ;;  %v4034_v44 = vld [vmem:[%s14261_s9 + $0x20] sm:$0xff]  ;;  %v4039_v49 = vld [vmem:[%s14261_s9 + $0x48] sm:$0xff] }
 0x2bc   : > { %3460 = vmatprep.mubr.f32.mxu0 %v14322_v55  ;;  %3909 = vmatprep.mubr.f32.mxu1 %v14322_v55  ;;  %v14350_v35 = vpack.c.bf16 %v11256_v46, %v11248_v18  ;;  %v4045_v18 = vld [vmem:[%s14261_s9 + $0x78] sm:$0xff] }
 0x2bd   : > { %v4049_v46 = vld [vmem:[%s14261_s9 + $0x98] sm:$0xff] }
 0x2bf   : > { %8926 = vmatmul.mubr.msk.f32.gmra.mrb[134].mxu0 %vm613_vm0, %v1766_v56  ;;  %8990 = vmatmul.mubr.msk.f32.gmra.mrb[134].mxu1 %vm613_vm0, %v1766_v56  ;;  %v14341_v56 = vpack.c.bf16 %v11140_v22, %v11127_v17  ;;  %v14345_v17 = vpack.c.bf16 %v11178_v36, %v11165_v31  ;;  %v14346_v22 = vpack.c.bf16 %v11218_v53, %v11210_v47  ;;  %v4041_v53 = vld [vmem:[%s14261_s9 + $0x58] sm:$0xff] }
 0x2c0   : > { %3466 = vmatprep.mubr.f32.mxu0 %v14322_v55  ;;  %3915 = vmatprep.mubr.f32.mxu1 %v14322_v55  ;;  %v14349_v31 = vpack.c.bf16 %v11216_v50, %v11203_v45  ;;  %v14351_v36 = vpack.c.bf16 %v11258_v62, %v11250_v28  ;;  %v14354_v45 = vpack.c.bf16 %v11294_v59, %v11286_v40  ;;  %v4035_v40 = vld [vmem:[%s14261_s9 + $0x28] sm:$0xff]  ;;  %v4040_v50 = vld [vmem:[%s14261_s9 + $0x50] sm:$0xff]  ;;  %v4046_v28 = vld [vmem:[%s14261_s9 + $0x80] sm:$0xff] }
 0x2c1   : > { %v14355_v47 = vpack.c.bf16 %v11296_v41, %v11288_v39  ;;  %v4036_v39 = vld [vmem:[%s14261_s9 + $0x30] sm:$0xff]  ;;  %v4037_v41 = vld [vmem:[%s14261_s9 + $0x38] sm:$0xff]  ;;  %v4050_v62 = vld [vmem:[%s14261_s9 + $0xa0] sm:$0xff] }
 0x2c2   : > { %v4051_v59 = vld [vmem:[%s14261_s9 + $0xa8] sm:$0xff] }
 0x2c3   : > { %8927 = vmatmul.mubr.msk.f32.gmra.mrb[136].mxu0 %vm613_vm0, %v1767_v57  ;;  %8991 = vmatmul.mubr.msk.f32.gmra.mrb[136].mxu1 %vm613_vm0, %v1767_v57  ;;  %v4031_v57 = vld [vmem:[%s14261_s9 + $0x8] sm:$0xff] }
 0x2c4   : > { %3472 = vmatprep.mubr.f32.mxu0 %v14322_v55  ;;  %3921 = vmatprep.mubr.f32.mxu1 %v14322_v55 }
 0x2c7   : > { %8928 = vmatmul.mubr.msk.f32.gmra.mrb[138].mxu0 %vm613_vm0, %v1768_v4  ;;  %8992 = vmatmul.mubr.msk.f32.gmra.mrb[138].mxu1 %vm613_vm0, %v1768_v4  ;;  %v14342_v4 = vpack.c.bf16 %v11180_v37, %v11172_v33  ;;  %v14347_v33 = vpack.c.bf16 %v11220_v54, %v11212_v48  ;;  %v14352_v37 = vpack.c.bf16 %v11252_v32, %v11239_v0  ;;  %v4038_v48 = vld [vmem:[%s14261_s9 + $0x40] sm:$0xff]  ;;  %v4043_v0 = vld [vmem:[%s14261_s9 + $0x68] sm:$0xff] }
 0x2c8   : > { %3478 = vmatprep.mubr.f32.mxu0 %v14322_v55  ;;  %3927 = vmatprep.mubr.f32.mxu1 %v14322_v55  ;;  %v4042_v54 = vld [vmem:[%s14261_s9 + $0x60] sm:$0xff]  ;;  %v4047_v32 = vld [vmem:[%s14261_s9 + $0x88] sm:$0xff] }
 0x2cb   : > { %8929 = vmatmul.mubr.msk.f32.gmra.mrb[140].mxu0 %vm613_vm0, %v1769_v1  ;;  %8993 = vmatmul.mubr.msk.f32.gmra.mrb[140].mxu1 %vm613_vm0, %v1769_v1  ;;  %v14343_v1 = vpack.c.bf16 %v11182_v38, %v11174_v34  ;;  %v4033_v34 = vld [vmem:[%s14261_s9 + $0x18] sm:$0xff]  ;;  %v14353_v38 = vpack.c.bf16 %v11254_v42, %v11241_v3  ;;  %v4044_v3 = vld [vmem:[%s14261_s9 + $0x70] sm:$0xff] }
 0x2cc   : > { %3484 = vmatprep.mubr.f32.mxu0 %v14322_v55  ;;  %3933 = vmatprep.mubr.f32.mxu1 %v14322_v55  ;;  %v4048_v42 = vld [vmem:[%s14261_s9 + $0x90] sm:$0xff] }
 0x2cf   : > { %8930 = vmatmul.mubr.msk.f32.gmra.mrb[142].mxu0 %vm613_vm0, %v1770_v2  ;;  %8994 = vmatmul.mubr.msk.f32.gmra.mrb[142].mxu1 %vm613_vm0, %v1770_v2  ;;  %v4052_v2 = vld [vmem:[%s14261_s9 + $0xb0] sm:$0xff] }
 0x2d0   : > { %3490 = vmatprep.mubr.f32.mxu0 %v14322_v55  ;;  %3939 = vmatprep.mubr.f32.mxu1 %v14322_v55 }
 0x2d3   : > { %8931 = vmatmul.mubr.msk.f32.gmra.mrb[144].mxu0 %vm613_vm0, %v1771_v5  ;;  %8995 = vmatmul.mubr.msk.f32.gmra.mrb[144].mxu1 %vm613_vm0, %v1771_v5  ;;  %v4053_v5 = vld [vmem:[%s14261_s9 + $0xb8] sm:$0xff] }
 0x2d4   : > { %3496 = vmatprep.mubr.f32.mxu0 %v14322_v55  ;;  %3945 = vmatprep.mubr.f32.mxu1 %v14322_v55 }
 0x2d7   : > { %8932 = vmatmul.mubr.msk.f32.gmra.mrb[146].mxu0 %vm613_vm0, %v1772_v7  ;;  %8996 = vmatmul.mubr.msk.f32.gmra.mrb[146].mxu1 %vm613_vm0, %v1772_v7  ;;  %v4054_v7 = vld [vmem:[%s14261_s9 + $0xc0] sm:$0xff] }
 0x2d8   : > { %3502 = vmatprep.mubr.f32.mxu0 %v14322_v55  ;;  %3951 = vmatprep.mubr.f32.mxu1 %v14322_v55 }
 0x2db   : > { %8933 = vmatmul.mubr.msk.f32.gmra.mrb[148].mxu0 %vm613_vm0, %v1773_v8  ;;  %8997 = vmatmul.mubr.msk.f32.gmra.mrb[148].mxu1 %vm613_vm0, %v1773_v8  ;;  %v4055_v8 = vld [vmem:[%s14261_s9 + $0xc8] sm:$0xff] }
 0x2dc   : > { %3508 = vmatprep.mubr.f32.mxu0 %v14322_v55  ;;  %3957 = vmatprep.mubr.f32.mxu1 %v14322_v55 }
 0x2df   : > { %8934 = vmatmul.mubr.msk.f32.gmra.mrb[150].mxu0 %vm613_vm0, %v1774_v9  ;;  %8998 = vmatmul.mubr.msk.f32.gmra.mrb[150].mxu1 %vm613_vm0, %v1774_v9  ;;  %v4056_v9 = vld [vmem:[%s14261_s9 + $0xd0] sm:$0xff] }
 0x2e0   : > { %3514 = vmatprep.mubr.f32.mxu0 %v14322_v55  ;;  %3963 = vmatprep.mubr.f32.mxu1 %v14322_v55 }
 0x2e3   : > { %8935 = vmatmul.mubr.msk.f32.gmra.mrb[152].mxu0 %vm613_vm0, %v1775_v10  ;;  %8999 = vmatmul.mubr.msk.f32.gmra.mrb[152].mxu1 %vm613_vm0, %v1775_v10  ;;  %v4057_v10 = vld [vmem:[%s14261_s9 + $0xd8] sm:$0xff] }
 0x2e4   : > { %3520 = vmatprep.mubr.f32.mxu0 %v14322_v55  ;;  %3969 = vmatprep.mubr.f32.mxu1 %v14322_v55 }
 0x2e7   : > { %8936 = vmatmul.mubr.msk.f32.gmra.mrb[154].mxu0 %vm613_vm0, %v1776_v13  ;;  %9000 = vmatmul.mubr.msk.f32.gmra.mrb[154].mxu1 %vm613_vm0, %v1776_v13  ;;  %v4058_v13 = vld [vmem:[%s14261_s9 + $0xe0] sm:$0xff] }
 0x2e8   : > { %3526 = vmatprep.mubr.f32.mxu0 %v14322_v55  ;;  %3975 = vmatprep.mubr.f32.mxu1 %v14322_v55 }
 0x2eb   : > { %8937 = vmatmul.mubr.msk.f32.gmra.mrb[156].mxu0 %vm613_vm0, %v1777_v15  ;;  %9001 = vmatmul.mubr.msk.f32.gmra.mrb[156].mxu1 %vm613_vm0, %v1777_v15  ;;  %v4059_v15 = vld [vmem:[%s14261_s9 + $0xe8] sm:$0xff] }
 0x2ec   : > { %3532 = vmatprep.mubr.f32.mxu0 %v14322_v55  ;;  %3981 = vmatprep.mubr.f32.mxu1 %v14322_v55 }
 0x2ef   : > { %8938 = vmatmul.mubr.msk.f32.gmra.mrb[158].mxu0 %vm613_vm0, %v1778_v19  ;;  %9002 = vmatmul.mubr.msk.f32.gmra.mrb[158].mxu1 %vm613_vm0, %v1778_v19  ;;  %v4060_v19 = vld [vmem:[%s14261_s9 + $0xf0] sm:$0xff] }
 0x2f0   : > { %3538 = vmatprep.mubr.f32.mxu0 %v14322_v55  ;;  %3987 = vmatprep.mubr.f32.mxu1 %v14322_v55 }
 0x2f3   : > { %8939 = vmatmul.mubr.msk.f32.gmra.mrb[160].mxu0 %vm613_vm0, %v1779_v20  ;;  %9003 = vmatmul.mubr.msk.f32.gmra.mrb[160].mxu1 %vm613_vm0, %v1779_v20  ;;  %v4061_v20 = vld [vmem:[%s14261_s9 + $0xf8] sm:$0xff] }
 0x2f4   : > { %3544 = vmatprep.mubr.f32.mxu0 %v14322_v55  ;;  %3993 = vmatprep.mubr.f32.mxu1 %v14322_v55 }
 0x2f7   : > { %8940 = vmatmul.mubr.msk.f32.gmra.mrb[162].mxu0 %vm613_vm0, %v1780_v23  ;;  %9004 = vmatmul.mubr.msk.f32.gmra.mrb[162].mxu1 %vm613_vm0, %v1780_v23  ;;  %v4062_v23 = vld [vmem:[%s14261_s9 + $0x100] sm:$0xff] }
 0x2f8   : > { %3550 = vmatprep.mubr.f32.mxu0 %v14322_v55  ;;  %3999 = vmatprep.mubr.f32.mxu1 %v14322_v55 }
 0x2fb   : > { %8941 = vmatmul.mubr.msk.f32.gmra.mrb[164].mxu0 %vm613_vm0, %v1781_v24  ;;  %9005 = vmatmul.mubr.msk.f32.gmra.mrb[164].mxu1 %vm613_vm0, %v1781_v24  ;;  %v4063_v24 = vld [vmem:[%s14261_s9 + $0x108] sm:$0xff] }
 0x2fc   : > { %3556 = vmatprep.mubr.f32.mxu0 %v14322_v55  ;;  %4005 = vmatprep.mubr.f32.mxu1 %v14322_v55 }
 0x2ff   : > { %8942 = vmatmul.mubr.msk.f32.gmra.mrb[166].mxu0 %vm613_vm0, %v1782_v25  ;;  %9006 = vmatmul.mubr.msk.f32.gmra.mrb[166].mxu1 %vm613_vm0, %v1782_v25  ;;  %v4064_v25 = vld [vmem:[%s14261_s9 + $0x110] sm:$0xff] }
 0x300   : > { %3562 = vmatprep.mubr.f32.mxu0 %v14322_v55  ;;  %4011 = vmatprep.mubr.f32.mxu1 %v14322_v55 }
 0x303   : > { %8943 = vmatmul.mubr.msk.f32.gmra.mrb[168].mxu0 %vm613_vm0, %v1783_v12  ;;  %9007 = vmatmul.mubr.msk.f32.gmra.mrb[168].mxu1 %vm613_vm0, %v1783_v12  ;;  %v4065_v12 = vld [vmem:[%s14261_s9 + $0x118] sm:$0xff] }
 0x304   : > { %3568 = vmatprep.mubr.f32.mxu0 %v14322_v55  ;;  %4017 = vmatprep.mubr.f32.mxu1 %v14322_v55 }
 0x307   : > { %8944 = vmatmul.mubr.msk.f32.gmra.mrb[170].mxu0 %vm613_vm0, %v1784_v43  ;;  %9008 = vmatmul.mubr.msk.f32.gmra.mrb[170].mxu1 %vm613_vm0, %v1784_v43  ;;  %v4066_v43 = vld [vmem:[%s14261_s9 + $0x120] sm:$0xff] }
 0x308   : > { %3574 = vmatprep.mubr.f32.mxu0 %v14322_v55  ;;  %4023 = vmatprep.mubr.f32.mxu1 %v14322_v55 }
 0x30b   : > { %8945 = vmatmul.mubr.msk.f32.gmra.mrb[172].mxu0 %vm613_vm0, %v1785_v63  ;;  %9009 = vmatmul.mubr.msk.f32.gmra.mrb[172].mxu1 %vm613_vm0, %v1785_v63  ;;  %v4067_v63 = vld [vmem:[%s14261_s9 + $0x128] sm:$0xff] }
 0x30c   : > { %4350 = vmatprep.mubr.f32.mxu0 %v14322_v55  ;;  %4799 = vmatprep.mubr.f32.mxu1 %v14322_v55 }
 0x30f   : > { %9010 = vmatmul.mubr.msk.f32.vlgmr.msra.gmra.mrb[46].mxu0 %vm950_vm2, %v4030_v51  ;;  %9074 = vmatmul.mubr.msk.f32.vlgmr.msra.gmra.mrb[46].mxu1 %vm950_vm2, %v4030_v51  ;;  %v4068_v51 = vld [vmem:[%s14261_s9 + $0x130] sm:$0xff] }
 0x310   : > { %9523 = vmatpush1.bf16.msra.mxu0 %v14340_v52  ;;  %9539 = vmatpush1.bf16.msra.mxu1 %v14341_v56  ;;  %v4069_v52 = vld [vmem:[%s14261_s9 + $0x138] sm:$0xff]  ;;  %v4070_v56 = vld [vmem:[%s14261_s9 + $0x140] sm:$0xff] }
 0x311   : > { %9525 = vmatprep.subr.bf16.mxu0 %v14342_v4  ;;  %9541 = vmatprep.subr.bf16.mxu1 %v14343_v1  ;;  %v4072_v4 = vld [vmem:[%s14261_s9 + $0x150] sm:$0xff]  ;;  %v4073_v1 = vld [vmem:[%s14261_s9 + $0x158] sm:$0xff] }
 0x312   : > { %4356 = vmatprep.mubr.f32.mxu0 %v14322_v55  ;;  %4805 = vmatprep.mubr.f32.mxu1 %v14322_v55 }
 0x313   : > { %9011 = vmatmul.mubr.msk.f32.gmra.mrb[48].mxu0 %vm950_vm2, %v4031_v57  ;;  %9075 = vmatmul.mubr.msk.f32.gmra.mrb[48].mxu1 %vm950_vm2, %v4031_v57  ;;  %v4071_v57 = vld [vmem:[%s14261_s9 + $0x148] sm:$0xff] }
 0x314   : > { %9527 = vmatpush1.bf16.msra.mxu0 %v14344_v16  ;;  %9543 = vmatpush1.bf16.msra.mxu1 %v14345_v17  ;;  %v4074_v16 = vld [vmem:[%s14261_s9 + $0x160] sm:$0xff]  ;;  %v4075_v17 = vld [vmem:[%s14261_s9 + $0x168] sm:$0xff] }
 0x315   : > { %9529 = vmatprep.subr.bf16.mxu0 %v14346_v22  ;;  %9545 = vmatprep.subr.bf16.mxu1 %v14347_v33  ;;  %v4077_v22 = vld [vmem:[%s14261_s9 + $0x178] sm:$0xff]  ;;  %v4078_v33 = vld [vmem:[%s14261_s9 + $0x180] sm:$0xff] }
 0x316   : > { %4362 = vmatprep.mubr.f32.mxu0 %v14322_v55  ;;  %4811 = vmatprep.mubr.f32.mxu1 %v14322_v55 }
 0x317   : > { %9012 = vmatmul.mubr.msk.f32.gmra.mrb[50].mxu0 %vm950_vm2, %v4032_v21  ;;  %9076 = vmatmul.mubr.msk.f32.gmra.mrb[50].mxu1 %vm950_vm2, %v4032_v21  ;;  %v4076_v21 = vld [vmem:[%s14261_s9 + $0x170] sm:$0xff] }
 0x318   : > { %9531 = vmatpush1.bf16.msra.mxu0 %v14348_v30  ;;  %9547 = vmatpush1.bf16.msra.mxu1 %v14349_v31  ;;  %v4079_v30 = vld [vmem:[%s14261_s9 + $0x188] sm:$0xff]  ;;  %v4080_v31 = vld [vmem:[%s14261_s9 + $0x190] sm:$0xff] }
 0x319   : > { %9533 = vmatprep.subr.bf16.mxu0 %v14350_v35  ;;  %9549 = vmatprep.subr.bf16.mxu1 %v14351_v36  ;;  %v4082_v35 = vld [vmem:[%s14261_s9 + $0x1a0] sm:$0xff]  ;;  %v4083_v36 = vld [vmem:[%s14261_s9 + $0x1a8] sm:$0xff] }
 0x31a   : > { %4368 = vmatprep.mubr.f32.mxu0 %v14322_v55  ;;  %4817 = vmatprep.mubr.f32.mxu1 %v14322_v55 }
 0x31b   : > { %9013 = vmatmul.mubr.msk.f32.gmra.mrb[52].mxu0 %vm950_vm2, %v4033_v34  ;;  %9077 = vmatmul.mubr.msk.f32.gmra.mrb[52].mxu1 %vm950_vm2, %v4033_v34  ;;  %v4081_v34 = vld [vmem:[%s14261_s9 + $0x198] sm:$0xff] }
 0x31c   : > { %9535 = vmatpush1.bf16.msra.mxu0 %v14352_v37  ;;  %9551 = vmatpush1.bf16.msra.mxu1 %v14353_v38  ;;  %v4084_v37 = vld [vmem:[%s14261_s9 + $0x1b0] sm:$0xff]  ;;  %v4085_v38 = vld [vmem:[%s14261_s9 + $0x1b8] sm:$0xff] }
 0x31d   : > { %9553 = vmatprep.subr.bf16.mxu0 %v14354_v45  ;;  %9569 = vmatprep.subr.bf16.mxu1 %v14355_v47  ;;  %v4087_v45 = vld [vmem:[%s14261_s9 + $0x1c8] sm:$0xff]  ;;  %v4088_v47 = vld [vmem:[%s14261_s9 + $0x1d0] sm:$0xff] }
 0x31e   : > { %4374 = vmatprep.mubr.f32.mxu0 %v14322_v55  ;;  %4823 = vmatprep.mubr.f32.mxu1 %v14322_v55 }
 0x31f   : > { %9014 = vmatmul.mubr.msk.f32.gmra.mrb[54].mxu0 %vm950_vm2, %v4034_v44  ;;  %9078 = vmatmul.mubr.msk.f32.gmra.mrb[54].mxu1 %vm950_vm2, %v4034_v44  ;;  %v4086_v44 = vld [vmem:[%s14261_s9 + $0x1c0] sm:$0xff] }
 0x320   : > { %4380 = vmatprep.mubr.f32.mxu0 %v14322_v55  ;;  %4829 = vmatprep.mubr.f32.mxu1 %v14322_v55 }
 0x323   : > { %9015 = vmatmul.mubr.msk.f32.gmra.mrb[56].mxu0 %vm950_vm2, %v4035_v40  ;;  %9079 = vmatmul.mubr.msk.f32.gmra.mrb[56].mxu1 %vm950_vm2, %v4035_v40  ;;  %v4089_v40 = vld [vmem:[%s14261_s9 + $0x1d8] sm:$0xff] }
 0x324   : > { %4386 = vmatprep.mubr.f32.mxu0 %v14322_v55  ;;  %4835 = vmatprep.mubr.f32.mxu1 %v14322_v55 }
 0x327   : > { %9016 = vmatmul.mubr.msk.f32.gmra.mrb[58].mxu0 %vm950_vm2, %v4036_v39  ;;  %9080 = vmatmul.mubr.msk.f32.gmra.mrb[58].mxu1 %vm950_vm2, %v4036_v39  ;;  %v4090_v39 = vld [vmem:[%s14261_s9 + $0x1e0] sm:$0xff] }
 0x328   : > { %4392 = vmatprep.mubr.f32.mxu0 %v14322_v55  ;;  %4841 = vmatprep.mubr.f32.mxu1 %v14322_v55 }
 0x32b   : > { %9017 = vmatmul.mubr.msk.f32.gmra.mrb[60].mxu0 %vm950_vm2, %v4037_v41  ;;  %9081 = vmatmul.mubr.msk.f32.gmra.mrb[60].mxu1 %vm950_vm2, %v4037_v41  ;;  %v4091_v41 = vld [vmem:[%s14261_s9 + $0x1e8] sm:$0xff] }
 0x32c   : > { %4398 = vmatprep.mubr.f32.mxu0 %v14322_v55  ;;  %4847 = vmatprep.mubr.f32.mxu1 %v14322_v55 }
 0x32f   : > { %9018 = vmatmul.mubr.msk.f32.gmra.mrb[62].mxu0 %vm950_vm2, %v4038_v48  ;;  %9082 = vmatmul.mubr.msk.f32.gmra.mrb[62].mxu1 %vm950_vm2, %v4038_v48  ;;  %v4092_v48 = vld [vmem:[%s14261_s9 + $0x1f0] sm:$0xff] }
 0x330   : > { %4404 = vmatprep.mubr.f32.mxu0 %v14322_v55  ;;  %4853 = vmatprep.mubr.f32.mxu1 %v14322_v55 }
 0x333   : > { %9019 = vmatmul.mubr.msk.f32.gmra.mrb[64].mxu0 %vm950_vm2, %v4039_v49  ;;  %9083 = vmatmul.mubr.msk.f32.gmra.mrb[64].mxu1 %vm950_vm2, %v4039_v49  ;;  %v4093_v49 = vld [vmem:[%s14261_s9 + $0x1f8] sm:$0xff] }
 0x334   : > { %4410 = vmatprep.mubr.f32.mxu0 %v14322_v55  ;;  %4859 = vmatprep.mubr.f32.mxu1 %v14322_v55 }
 0x337   : > { %9020 = vmatmul.mubr.msk.f32.gmra.mrb[66].mxu0 %vm950_vm2, %v4040_v50  ;;  %9084 = vmatmul.mubr.msk.f32.gmra.mrb[66].mxu1 %vm950_vm2, %v4040_v50  ;;  %v5440_v50 = vld [vmem:[%s14263_s11] sm:$0xff] }
 0x338   : > { %4416 = vmatprep.mubr.f32.mxu0 %v14322_v55  ;;  %4865 = vmatprep.mubr.f32.mxu1 %v14322_v55 }
 0x33b   : > { %9021 = vmatmul.mubr.msk.f32.gmra.mrb[68].mxu0 %vm950_vm2, %v4041_v53  ;;  %9085 = vmatmul.mubr.msk.f32.gmra.mrb[68].mxu1 %vm950_vm2, %v4041_v53  ;;  %v14356_v53 = vpack.c.bf16 %v11290_v14, %v11277_v58  ;;  %v14366_v58 = vld [vmem:[#allocation20_spill] sm:$0xff] }
 0x33c   : > { %4422 = vmatprep.mubr.f32.mxu0 %v14322_v55  ;;  %4871 = vmatprep.mubr.f32.mxu1 %v14322_v55  ;;  %v14367_v14 = vld [vmem:[#allocation16_spill] sm:$0xff] }
 0x33f   : > { %9022 = vmatmul.mubr.msk.f32.gmra.mrb[70].mxu0 %vm950_vm2, %v4042_v54  ;;  %9086 = vmatmul.mubr.msk.f32.gmra.mrb[70].mxu1 %vm950_vm2, %v4042_v54  ;;  %v14357_v54 = vld [vmem:[#allocation15_spill] sm:$0xff] }
 0x340   : > { %4428 = vmatprep.mubr.f32.mxu0 %v14322_v55  ;;  %4877 = vmatprep.mubr.f32.mxu1 %v14322_v55 }
 0x343   : > { %9023 = vmatmul.mubr.msk.f32.gmra.mrb[72].mxu0 %vm950_vm2, %v4043_v0  ;;  %9087 = vmatmul.mubr.msk.f32.gmra.mrb[72].mxu1 %vm950_vm2, %v4043_v0  ;;  %v14358_v0 = vld [vmem:[#allocation14_spill] sm:$0xff] }
 0x344   : > { %4434 = vmatprep.mubr.f32.mxu0 %v14322_v55  ;;  %4883 = vmatprep.mubr.f32.mxu1 %v14322_v55 }
 0x347   : > { %9024 = vmatmul.mubr.msk.f32.gmra.mrb[74].mxu0 %vm950_vm2, %v4044_v3  ;;  %9088 = vmatmul.mubr.msk.f32.gmra.mrb[74].mxu1 %vm950_vm2, %v4044_v3  ;;  %v14359_v3 = vpack.c.bf16 %v14357_v54, %v14358_v0  ;;  %v5472_v54 = vld [vmem:[%s14263_s11 + $0x100] sm:$0xff]  ;;  %v5473_v0 = vld [vmem:[%s14263_s11 + $0x108] sm:$0xff] }
 0x348   : > { %4440 = vmatprep.mubr.f32.mxu0 %v14322_v55  ;;  %4889 = vmatprep.mubr.f32.mxu1 %v14322_v55 }
 0x34b   : > { %9025 = vmatmul.mubr.msk.f32.gmra.mrb[76].mxu0 %vm950_vm2, %v4045_v18  ;;  %9089 = vmatmul.mubr.msk.f32.gmra.mrb[76].mxu1 %vm950_vm2, %v4045_v18  ;;  %v5441_v18 = vld [vmem:[%s14263_s11 + $0x8] sm:$0xff] }
 0x34c   : > { %4446 = vmatprep.mubr.f32.mxu0 %v14322_v55  ;;  %4895 = vmatprep.mubr.f32.mxu1 %v14322_v55 }
 0x34f   : > { %9026 = vmatmul.mubr.msk.f32.gmra.mrb[78].mxu0 %vm950_vm2, %v4046_v28  ;;  %9090 = vmatmul.mubr.msk.f32.gmra.mrb[78].mxu1 %vm950_vm2, %v4046_v28  ;;  %v14360_v28 = vld [vmem:[#allocation22_spill] sm:$0xff] }
 0x350   : > { %4452 = vmatprep.mubr.f32.mxu0 %v14322_v55  ;;  %4901 = vmatprep.mubr.f32.mxu1 %v14322_v55 }
 0x353   : > { %9027 = vmatmul.mubr.msk.f32.gmra.mrb[80].mxu0 %vm950_vm2, %v4047_v32  ;;  %9091 = vmatmul.mubr.msk.f32.gmra.mrb[80].mxu1 %vm950_vm2, %v4047_v32  ;;  %v14361_v32 = vld [vmem:[#allocation18_spill] sm:$0xff] }
 0x354   : > { %4458 = vmatprep.mubr.f32.mxu0 %v14322_v55  ;;  %4907 = vmatprep.mubr.f32.mxu1 %v14322_v55 }
 0x357   : > { %9028 = vmatmul.mubr.msk.f32.gmra.mrb[82].mxu0 %vm950_vm2, %v4048_v42  ;;  %9092 = vmatmul.mubr.msk.f32.gmra.mrb[82].mxu1 %vm950_vm2, %v4048_v42  ;;  %v14362_v42 = vpack.c.bf16 %v14360_v28, %v14361_v32  ;;  %v5476_v28 = vld [vmem:[%s14263_s11 + $0x120] sm:$0xff]  ;;  %v5477_v32 = vld [vmem:[%s14263_s11 + $0x128] sm:$0xff] }
 0x358   : > { %4464 = vmatprep.mubr.f32.mxu0 %v14322_v55  ;;  %4913 = vmatprep.mubr.f32.mxu1 %v14322_v55 }
 0x35b   : > { %9029 = vmatmul.mubr.msk.f32.gmra.mrb[84].mxu0 %vm950_vm2, %v4049_v46  ;;  %9093 = vmatmul.mubr.msk.f32.gmra.mrb[84].mxu1 %vm950_vm2, %v4049_v46  ;;  %v14363_v46 = vld [vmem:[#allocation23_spill] sm:$0xff] }
 0x35c   : > { %4470 = vmatprep.mubr.f32.mxu0 %v14322_v55  ;;  %4919 = vmatprep.mubr.f32.mxu1 %v14322_v55 }
 0x35f   : > { %9030 = vmatmul.mubr.msk.f32.gmra.mrb[86].mxu0 %vm950_vm2, %v4050_v62  ;;  %9094 = vmatmul.mubr.msk.f32.gmra.mrb[86].mxu1 %vm950_vm2, %v4050_v62  ;;  %v14364_v62 = vld [vmem:[#allocation19_spill] sm:$0xff] }
 0x360   : > { %4476 = vmatprep.mubr.f32.mxu0 %v14322_v55  ;;  %4925 = vmatprep.mubr.f32.mxu1 %v14322_v55 }
 0x363   : > { %9031 = vmatmul.mubr.msk.f32.gmra.mrb[88].mxu0 %vm950_vm2, %v4051_v59  ;;  %9095 = vmatmul.mubr.msk.f32.gmra.mrb[88].mxu1 %vm950_vm2, %v4051_v59  ;;  %v14365_v59 = vpack.c.bf16 %v14363_v46, %v14364_v62  ;;  %v5479_v46 = vld [vmem:[%s14263_s11 + $0x138] sm:$0xff]  ;;  %v5480_v62 = vld [vmem:[%s14263_s11 + $0x140] sm:$0xff] }
 0x364   : > { %4482 = vmatprep.mubr.f32.mxu0 %v14322_v55  ;;  %4931 = vmatprep.mubr.f32.mxu1 %v14322_v55 }
 0x367   : > { %9032 = vmatmul.mubr.msk.f32.gmra.mrb[90].mxu0 %vm950_vm2, %v4052_v2  ;;  %9096 = vmatmul.mubr.msk.f32.gmra.mrb[90].mxu1 %vm950_vm2, %v4052_v2  ;;  %v14368_v2 = vpack.c.bf16 %v14366_v58, %v14367_v14  ;;  %v5482_v58 = vld [vmem:[%s14263_s11 + $0x150] sm:$0xff]  ;;  %v5483_v14 = vld [vmem:[%s14263_s11 + $0x158] sm:$0xff] }
 0x368   : > { %4488 = vmatprep.mubr.f32.mxu0 %v14322_v55  ;;  %4937 = vmatprep.mubr.f32.mxu1 %v14322_v55 }
 0x36b   : > { %9033 = vmatmul.mubr.msk.f32.gmra.mrb[92].mxu0 %vm950_vm2, %v4053_v5  ;;  %9097 = vmatmul.mubr.msk.f32.gmra.mrb[92].mxu1 %vm950_vm2, %v4053_v5  ;;  %v14369_v5 = vld [vmem:[#allocation21_spill] sm:$0xff] }
 0x36c   : > { %4494 = vmatprep.mubr.f32.mxu0 %v14322_v55  ;;  %4943 = vmatprep.mubr.f32.mxu1 %v14322_v55 }
 0x36f   : > { %9034 = vmatmul.mubr.msk.f32.gmra.mrb[94].mxu0 %vm950_vm2, %v4054_v7  ;;  %9098 = vmatmul.mubr.msk.f32.gmra.mrb[94].mxu1 %vm950_vm2, %v4054_v7  ;;  %v14370_v7 = vld [vmem:[#allocation17_spill] sm:$0xff] }
 0x370   : > { %4500 = vmatprep.mubr.f32.mxu0 %v14322_v55  ;;  %4949 = vmatprep.mubr.f32.mxu1 %v14322_v55 }
 0x373   : > { %9035 = vmatmul.mubr.msk.f32.gmra.mrb[96].mxu0 %vm950_vm2, %v4055_v8  ;;  %9099 = vmatmul.mubr.msk.f32.gmra.mrb[96].mxu1 %vm950_vm2, %v4055_v8  ;;  %v14371_v8 = vpack.c.bf16 %v14369_v5, %v14370_v7  ;;  %v5485_v5 = vld [vmem:[%s14263_s11 + $0x168] sm:$0xff]  ;;  %v5486_v7 = vld [vmem:[%s14263_s11 + $0x170] sm:$0xff] }
 0x374   : > { %4506 = vmatprep.mubr.f32.mxu0 %v14322_v55  ;;  %4955 = vmatprep.mubr.f32.mxu1 %v14322_v55 }
 0x377   : > { %9036 = vmatmul.mubr.msk.f32.gmra.mrb[98].mxu0 %vm950_vm2, %v4056_v9  ;;  %9100 = vmatmul.mubr.msk.f32.gmra.mrb[98].mxu1 %vm950_vm2, %v4056_v9  ;;  %v5442_v9 = vld [vmem:[%s14263_s11 + $0x10] sm:$0xff] }
 0x378   : > { %4512 = vmatprep.mubr.f32.mxu0 %v14322_v55  ;;  %4961 = vmatprep.mubr.f32.mxu1 %v14322_v55 }
 0x37b   : > { %9037 = vmatmul.mubr.msk.f32.gmra.mrb[100].mxu0 %vm950_vm2, %v4057_v10  ;;  %9101 = vmatmul.mubr.msk.f32.gmra.mrb[100].mxu1 %vm950_vm2, %v4057_v10  ;;  %v14372_v10 = vld [vmem:[#allocation30_spill] sm:$0xff] }
 0x37c   : > { %4518 = vmatprep.mubr.f32.mxu0 %v14322_v55  ;;  %4967 = vmatprep.mubr.f32.mxu1 %v14322_v55 }
 0x37f   : > { %9038 = vmatmul.mubr.msk.f32.gmra.mrb[102].mxu0 %vm950_vm2, %v4058_v13  ;;  %9102 = vmatmul.mubr.msk.f32.gmra.mrb[102].mxu1 %vm950_vm2, %v4058_v13  ;;  %v14373_v13 = vld [vmem:[#allocation26_spill] sm:$0xff] }
 0x380   : > { %4524 = vmatprep.mubr.f32.mxu0 %v14322_v55  ;;  %4973 = vmatprep.mubr.f32.mxu1 %v14322_v55 }
 0x383   : > { %9039 = vmatmul.mubr.msk.f32.gmra.mrb[104].mxu0 %vm950_vm2, %v4059_v15  ;;  %9103 = vmatmul.mubr.msk.f32.gmra.mrb[104].mxu1 %vm950_vm2, %v4059_v15  ;;  %v14374_v15 = vpack.c.bf16 %v14372_v10, %v14373_v13  ;;  %v5489_v10 = vld [vmem:[%s14263_s11 + $0x188] sm:$0xff]  ;;  %v5490_v13 = vld [vmem:[%s14263_s11 + $0x190] sm:$0xff] }
 0x384   : > { %4530 = vmatprep.mubr.f32.mxu0 %v14322_v55  ;;  %4979 = vmatprep.mubr.f32.mxu1 %v14322_v55 }
 0x387   : > { %9040 = vmatmul.mubr.msk.f32.gmra.mrb[106].mxu0 %vm950_vm2, %v4060_v19  ;;  %9104 = vmatmul.mubr.msk.f32.gmra.mrb[106].mxu1 %vm950_vm2, %v4060_v19  ;;  %v14375_v19 = vld [vmem:[#allocation31_spill] sm:$0xff] }
 0x388   : > { %4536 = vmatprep.mubr.f32.mxu0 %v14322_v55  ;;  %4985 = vmatprep.mubr.f32.mxu1 %v14322_v55 }
 0x38b   : > { %9041 = vmatmul.mubr.msk.f32.gmra.mrb[108].mxu0 %vm950_vm2, %v4061_v20  ;;  %9105 = vmatmul.mubr.msk.f32.gmra.mrb[108].mxu1 %vm950_vm2, %v4061_v20  ;;  %v14376_v20 = vld [vmem:[#allocation27_spill] sm:$0xff] }
 0x38c   : > { %4542 = vmatprep.mubr.f32.mxu0 %v14322_v55  ;;  %4991 = vmatprep.mubr.f32.mxu1 %v14322_v55 }
 0x38f   : > { %9042 = vmatmul.mubr.msk.f32.gmra.mrb[110].mxu0 %vm950_vm2, %v4062_v23  ;;  %9106 = vmatmul.mubr.msk.f32.gmra.mrb[110].mxu1 %vm950_vm2, %v4062_v23  ;;  %v14377_v23 = vpack.c.bf16 %v14375_v19, %v14376_v20  ;;  %v5492_v19 = vld [vmem:[%s14263_s11 + $0x1a0] sm:$0xff]  ;;  %v5493_v20 = vld [vmem:[%s14263_s11 + $0x1a8] sm:$0xff] }
 0x390   : > { %4548 = vmatprep.mubr.f32.mxu0 %v14322_v55  ;;  %4997 = vmatprep.mubr.f32.mxu1 %v14322_v55 }
 0x393   : > { %9043 = vmatmul.mubr.msk.f32.gmra.mrb[112].mxu0 %vm950_vm2, %v4063_v24  ;;  %9107 = vmatmul.mubr.msk.f32.gmra.mrb[112].mxu1 %vm950_vm2, %v4063_v24  ;;  %v14378_v24 = vld [vmem:[#allocation28_spill] sm:$0xff] }
 0x394   : > { %4554 = vmatprep.mubr.f32.mxu0 %v14322_v55  ;;  %5003 = vmatprep.mubr.f32.mxu1 %v14322_v55 }
 0x397   : > { %9044 = vmatmul.mubr.msk.f32.gmra.mrb[114].mxu0 %vm950_vm2, %v4064_v25  ;;  %9108 = vmatmul.mubr.msk.f32.gmra.mrb[114].mxu1 %vm950_vm2, %v4064_v25  ;;  %v14379_v25 = vld [vmem:[#allocation24_spill] sm:$0xff] }
 0x398   : > { %4560 = vmatprep.mubr.f32.mxu0 %v14322_v55  ;;  %5009 = vmatprep.mubr.f32.mxu1 %v14322_v55 }
 0x39b   : > { %9045 = vmatmul.mubr.msk.f32.gmra.mrb[116].mxu0 %vm950_vm2, %v4065_v12  ;;  %9109 = vmatmul.mubr.msk.f32.gmra.mrb[116].mxu1 %vm950_vm2, %v4065_v12  ;;  %v14380_v12 = vpack.c.bf16 %v14378_v24, %v14379_v25 }
 0x39c   : > { %4566 = vmatprep.mubr.f32.mxu0 %v14322_v55  ;;  %5015 = vmatprep.mubr.f32.mxu1 %v14322_v55 }
 0x39f   : > { %9046 = vmatmul.mubr.msk.f32.gmra.mrb[118].mxu0 %vm950_vm2, %v4066_v43  ;;  %9110 = vmatmul.mubr.msk.f32.gmra.mrb[118].mxu1 %vm950_vm2, %v4066_v43  ;;  %v14381_v43 = vld [vmem:[#allocation29_spill] sm:$0xff] }
 0x3a0   : > { %4572 = vmatprep.mubr.f32.mxu0 %v14322_v55  ;;  %5021 = vmatprep.mubr.f32.mxu1 %v14322_v55 }
 0x3a3   : > { %9047 = vmatmul.mubr.msk.f32.gmra.mrb[120].mxu0 %vm950_vm2, %v4067_v63  ;;  %9111 = vmatmul.mubr.msk.f32.gmra.mrb[120].mxu1 %vm950_vm2, %v4067_v63  ;;  %v14382_v63 = vld [vmem:[#allocation25_spill] sm:$0xff] }
 0x3a4   : > { %4578 = vmatprep.mubr.f32.mxu0 %v14322_v55  ;;  %5027 = vmatprep.mubr.f32.mxu1 %v14322_v55 }
 0x3a7   : > { %9048 = vmatmul.mubr.msk.f32.gmra.mrb[122].mxu0 %vm950_vm2, %v4068_v51  ;;  %9112 = vmatmul.mubr.msk.f32.gmra.mrb[122].mxu1 %vm950_vm2, %v4068_v51  ;;  %v14383_v51 = vpack.c.bf16 %v14381_v43, %v14382_v63  ;;  %v5494_v43 = vld [vmem:[%s14263_s11 + $0x1b0] sm:$0xff] }
 0x3a8   : > { %4584 = vmatprep.mubr.f32.mxu0 %v14322_v55  ;;  %5033 = vmatprep.mubr.f32.mxu1 %v14322_v55 }
 0x3ab   : > { %9049 = vmatmul.mubr.msk.f32.gmra.mrb[124].mxu0 %vm950_vm2, %v4069_v52  ;;  %9113 = vmatmul.mubr.msk.f32.gmra.mrb[124].mxu1 %vm950_vm2, %v4069_v52  ;;  %v5443_v52 = vld [vmem:[%s14263_s11 + $0x18] sm:$0xff] }
 0x3ac   : > { %4590 = vmatprep.mubr.f32.mxu0 %v14322_v55  ;;  %5039 = vmatprep.mubr.f32.mxu1 %v14322_v55 }
 0x3af   : > { %9050 = vmatmul.mubr.msk.f32.gmra.mrb[126].mxu0 %vm950_vm2, %v4070_v56  ;;  %9114 = vmatmul.mubr.msk.f32.gmra.mrb[126].mxu1 %vm950_vm2, %v4070_v56  ;;  %v14384_v56 = vpack.c.bf16 %v11408_v27, %v11400_v60  ;;  %v5449_v27 = vld [vmem:[%s14263_s11 + $0x48] sm:$0xff] }
 0x3b0   : > { %4596 = vmatprep.mubr.f32.mxu0 %v14322_v55  ;;  %5045 = vmatprep.mubr.f32.mxu1 %v14322_v55 }
 0x3b3   : > { %9051 = vmatmul.mubr.msk.f32.gmra.mrb[128].mxu0 %vm950_vm2, %v4071_v57  ;;  %9115 = vmatmul.mubr.msk.f32.gmra.mrb[128].mxu1 %vm950_vm2, %v4071_v57  ;;  %v14385_v57 = vpack.c.bf16 %v11410_v29, %v11402_v26  ;;  %v5444_v26 = vld [vmem:[%s14263_s11 + $0x20] sm:$0xff]  ;;  %v5447_v29 = vld [vmem:[%s14263_s11 + $0x38] sm:$0xff] }
 0x3b4   : > { %4602 = vmatprep.mubr.f32.mxu0 %v14322_v55  ;;  %5051 = vmatprep.mubr.f32.mxu1 %v14322_v55 }
 0x3b7   : > { %9052 = vmatmul.mubr.msk.f32.gmra.mrb[130].mxu0 %vm950_vm2, %v4072_v4  ;;  %9116 = vmatmul.mubr.msk.f32.gmra.mrb[130].mxu1 %vm950_vm2, %v4072_v4  ;;  %v14386_v4 = vpack.c.bf16 %v11404_v6, %v11391_v11  ;;  %v5446_v11 = vld [vmem:[%s14263_s11 + $0x30] sm:$0xff]  ;;  %v5448_v6 = vld [vmem:[%s14263_s11 + $0x40] sm:$0xff] }
 0x3b8   : > { %4608 = vmatprep.mubr.f32.mxu0 %v14322_v55  ;;  %5057 = vmatprep.mubr.f32.mxu1 %v14322_v55 }
 0x3bb   : > { %9053 = vmatmul.mubr.msk.f32.gmra.mrb[132].mxu0 %vm950_vm2, %v4073_v1  ;;  %9117 = vmatmul.mubr.msk.f32.gmra.mrb[132].mxu1 %vm950_vm2, %v4073_v1  ;;  %v14387_v1 = vld [vmem:[#allocation32_spill] sm:$0xff] }
 0x3bc   : > { %4614 = vmatprep.mubr.f32.mxu0 %v14322_v55  ;;  %5063 = vmatprep.mubr.f32.mxu1 %v14322_v55  ;;  %v14388_v60 = vpack.c.bf16 %v11406_v61, %v14387_v1  ;;  %v5445_v61 = vld [vmem:[%s14263_s11 + $0x28] sm:$0xff] }
 0x3bf   : > { %9054 = vmatmul.mubr.msk.f32.gmra.mrb[134].mxu0 %vm950_vm2, %v4074_v16  ;;  %9118 = vmatmul.mubr.msk.f32.gmra.mrb[134].mxu1 %vm950_vm2, %v4074_v16  ;;  %v5450_v16 = vld [vmem:[%s14263_s11 + $0x50] sm:$0xff] }
 0x3c0   : > { %4620 = vmatprep.mubr.f32.mxu0 %v14322_v55  ;;  %5069 = vmatprep.mubr.f32.mxu1 %v14322_v55 }
 0x3c3   : > { %9055 = vmatmul.mubr.msk.f32.gmra.mrb[136].mxu0 %vm950_vm2, %v4075_v17  ;;  %9119 = vmatmul.mubr.msk.f32.gmra.mrb[136].mxu1 %vm950_vm2, %v4075_v17  ;;  %v5451_v17 = vld [vmem:[%s14263_s11 + $0x58] sm:$0xff] }
 0x3c4   : > { %4626 = vmatprep.mubr.f32.mxu0 %v14322_v55  ;;  %5075 = vmatprep.mubr.f32.mxu1 %v14322_v55 }
 0x3c7   : > { %9056 = vmatmul.mubr.msk.f32.gmra.mrb[138].mxu0 %vm950_vm2, %v4076_v21  ;;  %9120 = vmatmul.mubr.msk.f32.gmra.mrb[138].mxu1 %vm950_vm2, %v4076_v21  ;;  %v5452_v21 = vld [vmem:[%s14263_s11 + $0x60] sm:$0xff] }
 0x3c8   : > { %4632 = vmatprep.mubr.f32.mxu0 %v14322_v55  ;;  %5081 = vmatprep.mubr.f32.mxu1 %v14322_v55 }
 0x3cb   : > { %9057 = vmatmul.mubr.msk.f32.gmra.mrb[140].mxu0 %vm950_vm2, %v4077_v22  ;;  %9121 = vmatmul.mubr.msk.f32.gmra.mrb[140].mxu1 %vm950_vm2, %v4077_v22  ;;  %v5453_v22 = vld [vmem:[%s14263_s11 + $0x68] sm:$0xff] }
 0x3cc   : > { %4638 = vmatprep.mubr.f32.mxu0 %v14322_v55  ;;  %5087 = vmatprep.mubr.f32.mxu1 %v14322_v55 }
 0x3cf   : > { %9058 = vmatmul.mubr.msk.f32.gmra.mrb[142].mxu0 %vm950_vm2, %v4078_v33  ;;  %9122 = vmatmul.mubr.msk.f32.gmra.mrb[142].mxu1 %vm950_vm2, %v4078_v33  ;;  %v5454_v33 = vld [vmem:[%s14263_s11 + $0x70] sm:$0xff] }
 0x3d0   : > { %4644 = vmatprep.mubr.f32.mxu0 %v14322_v55  ;;  %5093 = vmatprep.mubr.f32.mxu1 %v14322_v55 }
 0x3d3   : > { %9059 = vmatmul.mubr.msk.f32.gmra.mrb[144].mxu0 %vm950_vm2, %v4079_v30  ;;  %9123 = vmatmul.mubr.msk.f32.gmra.mrb[144].mxu1 %vm950_vm2, %v4079_v30  ;;  %v5455_v30 = vld [vmem:[%s14263_s11 + $0x78] sm:$0xff] }
 0x3d4   : > { %4650 = vmatprep.mubr.f32.mxu0 %v14322_v55  ;;  %5099 = vmatprep.mubr.f32.mxu1 %v14322_v55 }
 0x3d7   : > { %9060 = vmatmul.mubr.msk.f32.gmra.mrb[146].mxu0 %vm950_vm2, %v4080_v31  ;;  %9124 = vmatmul.mubr.msk.f32.gmra.mrb[146].mxu1 %vm950_vm2, %v4080_v31  ;;  %v5456_v31 = vld [vmem:[%s14263_s11 + $0x80] sm:$0xff] }
 0x3d8   : > { %4656 = vmatprep.mubr.f32.mxu0 %v14322_v55  ;;  %5105 = vmatprep.mubr.f32.mxu1 %v14322_v55 }
 0x3db   : > { %9061 = vmatmul.mubr.msk.f32.gmra.mrb[148].mxu0 %vm950_vm2, %v4081_v34  ;;  %9125 = vmatmul.mubr.msk.f32.gmra.mrb[148].mxu1 %vm950_vm2, %v4081_v34  ;;  %v5457_v34 = vld [vmem:[%s14263_s11 + $0x88] sm:$0xff] }
 0x3dc   : > { %4662 = vmatprep.mubr.f32.mxu0 %v14322_v55  ;;  %5111 = vmatprep.mubr.f32.mxu1 %v14322_v55 }
 0x3df   : > { %9062 = vmatmul.mubr.msk.f32.gmra.mrb[150].mxu0 %vm950_vm2, %v4082_v35  ;;  %9126 = vmatmul.mubr.msk.f32.gmra.mrb[150].mxu1 %vm950_vm2, %v4082_v35  ;;  %v5458_v35 = vld [vmem:[%s14263_s11 + $0x90] sm:$0xff] }
 0x3e0   : > { %4668 = vmatprep.mubr.f32.mxu0 %v14322_v55  ;;  %5117 = vmatprep.mubr.f32.mxu1 %v14322_v55 }
 0x3e3   : > { %9063 = vmatmul.mubr.msk.f32.gmra.mrb[152].mxu0 %vm950_vm2, %v4083_v36  ;;  %9127 = vmatmul.mubr.msk.f32.gmra.mrb[152].mxu1 %vm950_vm2, %v4083_v36  ;;  %v5459_v36 = vld [vmem:[%s14263_s11 + $0x98] sm:$0xff] }
 0x3e4   : > { %4674 = vmatprep.mubr.f32.mxu0 %v14322_v55  ;;  %5123 = vmatprep.mubr.f32.mxu1 %v14322_v55 }
 0x3e7   : > { %9064 = vmatmul.mubr.msk.f32.gmra.mrb[154].mxu0 %vm950_vm2, %v4084_v37  ;;  %9128 = vmatmul.mubr.msk.f32.gmra.mrb[154].mxu1 %vm950_vm2, %v4084_v37  ;;  %v5460_v37 = vld [vmem:[%s14263_s11 + $0xa0] sm:$0xff] }
 0x3e8   : > { %4680 = vmatprep.mubr.f32.mxu0 %v14322_v55  ;;  %5129 = vmatprep.mubr.f32.mxu1 %v14322_v55 }
 0x3eb   : > { %9065 = vmatmul.mubr.msk.f32.gmra.mrb[156].mxu0 %vm950_vm2, %v4085_v38  ;;  %9129 = vmatmul.mubr.msk.f32.gmra.mrb[156].mxu1 %vm950_vm2, %v4085_v38  ;;  %v5461_v38 = vld [vmem:[%s14263_s11 + $0xa8] sm:$0xff] }
 0x3ec   : > { %4686 = vmatprep.mubr.f32.mxu0 %v14322_v55  ;;  %5135 = vmatprep.mubr.f32.mxu1 %v14322_v55 }
 0x3ef   : > { %9066 = vmatmul.mubr.msk.f32.gmra.mrb[158].mxu0 %vm950_vm2, %v4086_v44  ;;  %9130 = vmatmul.mubr.msk.f32.gmra.mrb[158].mxu1 %vm950_vm2, %v4086_v44  ;;  %v5462_v44 = vld [vmem:[%s14263_s11 + $0xb0] sm:$0xff] }
 0x3f0   : > { %4692 = vmatprep.mubr.f32.mxu0 %v14322_v55  ;;  %5141 = vmatprep.mubr.f32.mxu1 %v14322_v55 }
 0x3f3   : > { %9067 = vmatmul.mubr.msk.f32.gmra.mrb[160].mxu0 %vm950_vm2, %v4087_v45  ;;  %9131 = vmatmul.mubr.msk.f32.gmra.mrb[160].mxu1 %vm950_vm2, %v4087_v45  ;;  %v5463_v45 = vld [vmem:[%s14263_s11 + $0xb8] sm:$0xff] }
 0x3f4   : > { %4698 = vmatprep.mubr.f32.mxu0 %v14322_v55  ;;  %5147 = vmatprep.mubr.f32.mxu1 %v14322_v55 }
 0x3f7   : > { %9068 = vmatmul.mubr.msk.f32.gmra.mrb[162].mxu0 %vm950_vm2, %v4088_v47  ;;  %9132 = vmatmul.mubr.msk.f32.gmra.mrb[162].mxu1 %vm950_vm2, %v4088_v47  ;;  %v5464_v47 = vld [vmem:[%s14263_s11 + $0xc0] sm:$0xff] }
 0x3f8   : > { %4704 = vmatprep.mubr.f32.mxu0 %v14322_v55  ;;  %5153 = vmatprep.mubr.f32.mxu1 %v14322_v55 }
 0x3fb   : > { %9069 = vmatmul.mubr.msk.f32.gmra.mrb[164].mxu0 %vm950_vm2, %v4089_v40  ;;  %9133 = vmatmul.mubr.msk.f32.gmra.mrb[164].mxu1 %vm950_vm2, %v4089_v40  ;;  %v5465_v40 = vld [vmem:[%s14263_s11 + $0xc8] sm:$0xff] }
 0x3fc   : > { %4710 = vmatprep.mubr.f32.mxu0 %v14322_v55  ;;  %5159 = vmatprep.mubr.f32.mxu1 %v14322_v55 }
 0x3ff   : > { %9070 = vmatmul.mubr.msk.f32.gmra.mrb[166].mxu0 %vm950_vm2, %v4090_v39  ;;  %9134 = vmatmul.mubr.msk.f32.gmra.mrb[166].mxu1 %vm950_vm2, %v4090_v39  ;;  %v5466_v39 = vld [vmem:[%s14263_s11 + $0xd0] sm:$0xff] }
 0x400   : > { %4716 = vmatprep.mubr.f32.mxu0 %v14322_v55  ;;  %5165 = vmatprep.mubr.f32.mxu1 %v14322_v55 }
 0x403   : > { %9071 = vmatmul.mubr.msk.f32.gmra.mrb[168].mxu0 %vm950_vm2, %v4091_v41  ;;  %9135 = vmatmul.mubr.msk.f32.gmra.mrb[168].mxu1 %vm950_vm2, %v4091_v41  ;;  %v5467_v41 = vld [vmem:[%s14263_s11 + $0xd8] sm:$0xff] }
 0x404   : > { %4722 = vmatprep.mubr.f32.mxu0 %v14322_v55  ;;  %5171 = vmatprep.mubr.f32.mxu1 %v14322_v55 }
 0x407   : > { %9072 = vmatmul.mubr.msk.f32.gmra.mrb[170].mxu0 %vm950_vm2, %v4092_v48  ;;  %9136 = vmatmul.mubr.msk.f32.gmra.mrb[170].mxu1 %vm950_vm2, %v4092_v48  ;;  %v5468_v48 = vld [vmem:[%s14263_s11 + $0xe0] sm:$0xff] }
 0x408   : > { %4728 = vmatprep.mubr.f32.mxu0 %v14322_v55  ;;  %5177 = vmatprep.mubr.f32.mxu1 %v14322_v55 }
 0x40b   : > { %9073 = vmatmul.mubr.msk.f32.gmra.mrb[172].mxu0 %vm950_vm2, %v4093_v49  ;;  %9137 = vmatmul.mubr.msk.f32.gmra.mrb[172].mxu1 %vm950_vm2, %v4093_v49  ;;  %v5469_v49 = vld [vmem:[%s14263_s11 + $0xe8] sm:$0xff] }
 0x40c   : > { %5760 = vmatprep.mubr.f32.mxu0 %v14322_v55  ;;  %6209 = vmatprep.mubr.f32.mxu1 %v14322_v55 }
 0x40f   : > { %9138 = vmatmul.mubr.msk.f32.vlgmr.msra.gmra.mrb[46].mxu0 %vm1181_vm3, %v5440_v50  ;;  %9202 = vmatmul.mubr.msk.f32.vlgmr.msra.gmra.mrb[46].mxu1 %vm1181_vm3, %v5440_v50  ;;  %v5470_v50 = vld [vmem:[%s14263_s11 + $0xf0] sm:$0xff] }
 0x410   : > { %9555 = vmatpush1.bf16.msra.mxu0 %v14356_v53  ;;  %9571 = vmatpush1.bf16.msra.mxu1 %v14359_v3  ;;  %v5471_v53 = vld [vmem:[%s14263_s11 + $0xf8] sm:$0xff]  ;;  %v5474_v3 = vld [vmem:[%s14263_s11 + $0x110] sm:$0xff] }
 0x411   : > { %9557 = vmatprep.subr.bf16.mxu0 %v14362_v42  ;;  %9573 = vmatprep.subr.bf16.mxu1 %v14365_v59  ;;  %v5478_v42 = vld [vmem:[%s14263_s11 + $0x130] sm:$0xff]  ;;  %v5481_v59 = vld [vmem:[%s14263_s11 + $0x148] sm:$0xff] }
 0x412   : > { %5766 = vmatprep.mubr.f32.mxu0 %v14322_v55  ;;  %6215 = vmatprep.mubr.f32.mxu1 %v14322_v55 }
 0x413   : > { %9139 = vmatmul.mubr.msk.f32.gmra.mrb[48].mxu0 %vm1181_vm3, %v5441_v18  ;;  %9203 = vmatmul.mubr.msk.f32.gmra.mrb[48].mxu1 %vm1181_vm3, %v5441_v18  ;;  %v5475_v18 = vld [vmem:[%s14263_s11 + $0x118] sm:$0xff] }
 0x414   : > { %9559 = vmatpush1.bf16.msra.mxu0 %v14368_v2  ;;  %9575 = vmatpush1.bf16.msra.mxu1 %v14371_v8  ;;  %v5484_v2 = vld [vmem:[%s14263_s11 + $0x160] sm:$0xff]  ;;  %v5487_v8 = vld [vmem:[%s14263_s11 + $0x178] sm:$0xff] }
 0x415   : > { %9561 = vmatprep.subr.bf16.mxu0 %v14374_v15  ;;  %9577 = vmatprep.subr.bf16.mxu1 %v14377_v23  ;;  %v5491_v15 = vld [vmem:[%s14263_s11 + $0x198] sm:$0xff] }
 0x416   : > { %5772 = vmatprep.mubr.f32.mxu0 %v14322_v55  ;;  %6221 = vmatprep.mubr.f32.mxu1 %v14322_v55 }
 0x417   : > { %9140 = vmatmul.mubr.msk.f32.gmra.mrb[50].mxu0 %vm1181_vm3, %v5442_v9  ;;  %9204 = vmatmul.mubr.msk.f32.gmra.mrb[50].mxu1 %vm1181_vm3, %v5442_v9  ;;  %v5488_v9 = vld [vmem:[%s14263_s11 + $0x180] sm:$0xff] }
 0x418   : > { %9563 = vmatpush1.bf16.msra.mxu0 %v14380_v12  ;;  %9579 = vmatpush1.bf16.msra.mxu1 %v14383_v51 }
 0x419   : > { %9565 = vmatprep.subr.bf16.mxu0 %v14384_v56  ;;  %9581 = vmatprep.subr.bf16.mxu1 %v14385_v57  ;;  %v5495_v57 = vld [vmem:[%s14263_s11 + $0x1b8] sm:$0xff] }
 0x41a   : > { %5778 = vmatprep.mubr.f32.mxu0 %v14322_v55  ;;  %6227 = vmatprep.mubr.f32.mxu1 %v14322_v55 }
 0x41b   : > { %9141 = vmatmul.mubr.msk.f32.gmra.mrb[52].mxu0 %vm1181_vm3, %v5443_v52  ;;  %9205 = vmatmul.mubr.msk.f32.gmra.mrb[52].mxu1 %vm1181_vm3, %v5443_v52 }
 0x41c   : > { %9567 = vmatpush1.bf16.msra.mxu0 %v14386_v4  ;;  %9583 = vmatpush1.bf16.msra.mxu1 %v14388_v60 }
 0x41d   : > { %5784 = vmatprep.mubr.f32.mxu0 %v14322_v55  ;;  %6233 = vmatprep.mubr.f32.mxu1 %v14322_v55 }
 0x41f   : > { %9142 = vmatmul.mubr.msk.f32.gmra.mrb[54].mxu0 %vm1181_vm3, %v5444_v26  ;;  %9206 = vmatmul.mubr.msk.f32.gmra.mrb[54].mxu1 %vm1181_vm3, %v5444_v26 }
 0x420   : > { %5790 = vmatprep.mubr.f32.mxu0 %v14322_v55  ;;  %6239 = vmatprep.mubr.f32.mxu1 %v14322_v55 }
 0x423   : > { %9143 = vmatmul.mubr.msk.f32.gmra.mrb[56].mxu0 %vm1181_vm3, %v5445_v61  ;;  %9207 = vmatmul.mubr.msk.f32.gmra.mrb[56].mxu1 %vm1181_vm3, %v5445_v61  ;;  %v5496_v61 = vld [vmem:[%s14263_s11 + $0x1c0] sm:$0xff] }
 0x424   : > { %5796 = vmatprep.mubr.f32.mxu0 %v14322_v55  ;;  %6245 = vmatprep.mubr.f32.mxu1 %v14322_v55 }
 0x427   : > { %9144 = vmatmul.mubr.msk.f32.gmra.mrb[58].mxu0 %vm1181_vm3, %v5446_v11  ;;  %9208 = vmatmul.mubr.msk.f32.gmra.mrb[58].mxu1 %vm1181_vm3, %v5446_v11 }
 0x428   : > { %5802 = vmatprep.mubr.f32.mxu0 %v14322_v55  ;;  %6251 = vmatprep.mubr.f32.mxu1 %v14322_v55 }
 0x42b   : > { %9145 = vmatmul.mubr.msk.f32.gmra.mrb[60].mxu0 %vm1181_vm3, %v5447_v29  ;;  %9209 = vmatmul.mubr.msk.f32.gmra.mrb[60].mxu1 %vm1181_vm3, %v5447_v29 }
 0x42c   : > { %5808 = vmatprep.mubr.f32.mxu0 %v14322_v55  ;;  %6257 = vmatprep.mubr.f32.mxu1 %v14322_v55 }
 0x42f   : > { %9146 = vmatmul.mubr.msk.f32.gmra.mrb[62].mxu0 %vm1181_vm3, %v5448_v6  ;;  %9210 = vmatmul.mubr.msk.f32.gmra.mrb[62].mxu1 %vm1181_vm3, %v5448_v6 }
 0x430   : > { %5814 = vmatprep.mubr.f32.mxu0 %v14322_v55  ;;  %6263 = vmatprep.mubr.f32.mxu1 %v14322_v55 }
 0x433   : > { %9147 = vmatmul.mubr.msk.f32.gmra.mrb[64].mxu0 %vm1181_vm3, %v5449_v27  ;;  %9211 = vmatmul.mubr.msk.f32.gmra.mrb[64].mxu1 %vm1181_vm3, %v5449_v27 }
 0x434   : > { %5820 = vmatprep.mubr.f32.mxu0 %v14322_v55  ;;  %6269 = vmatprep.mubr.f32.mxu1 %v14322_v55 }
 0x437   : > { %9148 = vmatmul.mubr.msk.f32.gmra.mrb[66].mxu0 %vm1181_vm3, %v5450_v16  ;;  %9212 = vmatmul.mubr.msk.f32.gmra.mrb[66].mxu1 %vm1181_vm3, %v5450_v16  ;;  %v5497_v16 = vld [vmem:[%s14263_s11 + $0x1c8] sm:$0xff] }
 0x438   : > { %5826 = vmatprep.mubr.f32.mxu0 %v14322_v55  ;;  %6275 = vmatprep.mubr.f32.mxu1 %v14322_v55 }
 0x43b   : > { %9149 = vmatmul.mubr.msk.f32.gmra.mrb[68].mxu0 %vm1181_vm3, %v5451_v17  ;;  %9213 = vmatmul.mubr.msk.f32.gmra.mrb[68].mxu1 %vm1181_vm3, %v5451_v17 }
 0x43c   : > { %5832 = vmatprep.mubr.f32.mxu0 %v14322_v55  ;;  %6281 = vmatprep.mubr.f32.mxu1 %v14322_v55 }
 0x43f   : > { %9150 = vmatmul.mubr.msk.f32.gmra.mrb[70].mxu0 %vm1181_vm3, %v5452_v21  ;;  %9214 = vmatmul.mubr.msk.f32.gmra.mrb[70].mxu1 %vm1181_vm3, %v5452_v21 }
 0x440   : > { %5838 = vmatprep.mubr.f32.mxu0 %v14322_v55  ;;  %6287 = vmatprep.mubr.f32.mxu1 %v14322_v55 }
 0x443   : > { %9151 = vmatmul.mubr.msk.f32.gmra.mrb[72].mxu0 %vm1181_vm3, %v5453_v22  ;;  %9215 = vmatmul.mubr.msk.f32.gmra.mrb[72].mxu1 %vm1181_vm3, %v5453_v22 }
 0x444   : > { %5844 = vmatprep.mubr.f32.mxu0 %v14322_v55  ;;  %6293 = vmatprep.mubr.f32.mxu1 %v14322_v55 }
 0x447   : > { %9152 = vmatmul.mubr.msk.f32.gmra.mrb[74].mxu0 %vm1181_vm3, %v5454_v33  ;;  %9216 = vmatmul.mubr.msk.f32.gmra.mrb[74].mxu1 %vm1181_vm3, %v5454_v33 }
 0x448   : > { %5850 = vmatprep.mubr.f32.mxu0 %v14322_v55  ;;  %6299 = vmatprep.mubr.f32.mxu1 %v14322_v55 }
 0x44b   : > { %9153 = vmatmul.mubr.msk.f32.gmra.mrb[76].mxu0 %vm1181_vm3, %v5455_v30  ;;  %9217 = vmatmul.mubr.msk.f32.gmra.mrb[76].mxu1 %vm1181_vm3, %v5455_v30  ;;  %v5498_v30 = vld [vmem:[%s14263_s11 + $0x1d0] sm:$0xff] }
 0x44c   : > { %5856 = vmatprep.mubr.f32.mxu0 %v14322_v55  ;;  %6305 = vmatprep.mubr.f32.mxu1 %v14322_v55 }
 0x44f   : > { %9154 = vmatmul.mubr.msk.f32.gmra.mrb[78].mxu0 %vm1181_vm3, %v5456_v31  ;;  %9218 = vmatmul.mubr.msk.f32.gmra.mrb[78].mxu1 %vm1181_vm3, %v5456_v31 }
 0x450   : > { %5862 = vmatprep.mubr.f32.mxu0 %v14322_v55  ;;  %6311 = vmatprep.mubr.f32.mxu1 %v14322_v55 }
 0x453   : > { %9155 = vmatmul.mubr.msk.f32.gmra.mrb[80].mxu0 %vm1181_vm3, %v5457_v34  ;;  %9219 = vmatmul.mubr.msk.f32.gmra.mrb[80].mxu1 %vm1181_vm3, %v5457_v34 }
 0x454   : > { %5868 = vmatprep.mubr.f32.mxu0 %v14322_v55  ;;  %6317 = vmatprep.mubr.f32.mxu1 %v14322_v55 }
 0x457   : > { %9156 = vmatmul.mubr.msk.f32.gmra.mrb[82].mxu0 %vm1181_vm3, %v5458_v35  ;;  %9220 = vmatmul.mubr.msk.f32.gmra.mrb[82].mxu1 %vm1181_vm3, %v5458_v35 }
 0x458   : > { %5874 = vmatprep.mubr.f32.mxu0 %v14322_v55  ;;  %6323 = vmatprep.mubr.f32.mxu1 %v14322_v55 }
 0x45b   : > { %9157 = vmatmul.mubr.msk.f32.gmra.mrb[84].mxu0 %vm1181_vm3, %v5459_v36  ;;  %9221 = vmatmul.mubr.msk.f32.gmra.mrb[84].mxu1 %vm1181_vm3, %v5459_v36 }
 0x45c   : > { %5880 = vmatprep.mubr.f32.mxu0 %v14322_v55  ;;  %6329 = vmatprep.mubr.f32.mxu1 %v14322_v55 }
 0x45f   : > { %9158 = vmatmul.mubr.msk.f32.gmra.mrb[86].mxu0 %vm1181_vm3, %v5460_v37  ;;  %9222 = vmatmul.mubr.msk.f32.gmra.mrb[86].mxu1 %vm1181_vm3, %v5460_v37  ;;  %v5499_v37 = vld [vmem:[%s14263_s11 + $0x1d8] sm:$0xff] }
 0x460   : > { %5886 = vmatprep.mubr.f32.mxu0 %v14322_v55  ;;  %6335 = vmatprep.mubr.f32.mxu1 %v14322_v55 }
 0x463   : > { %9159 = vmatmul.mubr.msk.f32.gmra.mrb[88].mxu0 %vm1181_vm3, %v5461_v38  ;;  %9223 = vmatmul.mubr.msk.f32.gmra.mrb[88].mxu1 %vm1181_vm3, %v5461_v38 }
 0x464   : > { %5892 = vmatprep.mubr.f32.mxu0 %v14322_v55  ;;  %6341 = vmatprep.mubr.f32.mxu1 %v14322_v55 }
 0x467   : > { %9160 = vmatmul.mubr.msk.f32.gmra.mrb[90].mxu0 %vm1181_vm3, %v5462_v44  ;;  %9224 = vmatmul.mubr.msk.f32.gmra.mrb[90].mxu1 %vm1181_vm3, %v5462_v44 }
 0x468   : > { %5898 = vmatprep.mubr.f32.mxu0 %v14322_v55  ;;  %6347 = vmatprep.mubr.f32.mxu1 %v14322_v55 }
 0x46b   : > { %9161 = vmatmul.mubr.msk.f32.gmra.mrb[92].mxu0 %vm1181_vm3, %v5463_v45  ;;  %9225 = vmatmul.mubr.msk.f32.gmra.mrb[92].mxu1 %vm1181_vm3, %v5463_v45 }
 0x46c   : > { %5904 = vmatprep.mubr.f32.mxu0 %v14322_v55  ;;  %6353 = vmatprep.mubr.f32.mxu1 %v14322_v55 }
 0x46f   : > { %9162 = vmatmul.mubr.msk.f32.gmra.mrb[94].mxu0 %vm1181_vm3, %v5464_v47  ;;  %9226 = vmatmul.mubr.msk.f32.gmra.mrb[94].mxu1 %vm1181_vm3, %v5464_v47 }
 0x470   : > { %5910 = vmatprep.mubr.f32.mxu0 %v14322_v55  ;;  %6359 = vmatprep.mubr.f32.mxu1 %v14322_v55 }
 0x473   : > { %9163 = vmatmul.mubr.msk.f32.gmra.mrb[96].mxu0 %vm1181_vm3, %v5465_v40  ;;  %9227 = vmatmul.mubr.msk.f32.gmra.mrb[96].mxu1 %vm1181_vm3, %v5465_v40  ;;  %v5500_v40 = vld [vmem:[%s14263_s11 + $0x1e0] sm:$0xff] }
 0x474   : > { %5916 = vmatprep.mubr.f32.mxu0 %v14322_v55  ;;  %6365 = vmatprep.mubr.f32.mxu1 %v14322_v55 }
 0x477   : > { %9164 = vmatmul.mubr.msk.f32.gmra.mrb[98].mxu0 %vm1181_vm3, %v5466_v39  ;;  %9228 = vmatmul.mubr.msk.f32.gmra.mrb[98].mxu1 %vm1181_vm3, %v5466_v39 }
 0x478   : > { %5922 = vmatprep.mubr.f32.mxu0 %v14322_v55  ;;  %6371 = vmatprep.mubr.f32.mxu1 %v14322_v55 }
 0x47b   : > { %9165 = vmatmul.mubr.msk.f32.gmra.mrb[100].mxu0 %vm1181_vm3, %v5467_v41  ;;  %9229 = vmatmul.mubr.msk.f32.gmra.mrb[100].mxu1 %vm1181_vm3, %v5467_v41 }
 0x47c   : > { %5928 = vmatprep.mubr.f32.mxu0 %v14322_v55  ;;  %6377 = vmatprep.mubr.f32.mxu1 %v14322_v55 }
 0x47f   : > { %9166 = vmatmul.mubr.msk.f32.gmra.mrb[102].mxu0 %vm1181_vm3, %v5468_v48  ;;  %9230 = vmatmul.mubr.msk.f32.gmra.mrb[102].mxu1 %vm1181_vm3, %v5468_v48 }
 0x480   : > { %5934 = vmatprep.mubr.f32.mxu0 %v14322_v55  ;;  %6383 = vmatprep.mubr.f32.mxu1 %v14322_v55 }
 0x483   : > { %9167 = vmatmul.mubr.msk.f32.gmra.mrb[104].mxu0 %vm1181_vm3, %v5469_v49  ;;  %9231 = vmatmul.mubr.msk.f32.gmra.mrb[104].mxu1 %vm1181_vm3, %v5469_v49 }
 0x484   : > { %5940 = vmatprep.mubr.f32.mxu0 %v14322_v55  ;;  %6389 = vmatprep.mubr.f32.mxu1 %v14322_v55 }
 0x487   : > { %9168 = vmatmul.mubr.msk.f32.gmra.mrb[106].mxu0 %vm1181_vm3, %v5470_v50  ;;  %9232 = vmatmul.mubr.msk.f32.gmra.mrb[106].mxu1 %vm1181_vm3, %v5470_v50  ;;  %v5501_v50 = vld [vmem:[%s14263_s11 + $0x1e8] sm:$0xff] }
 0x488   : > { %5946 = vmatprep.mubr.f32.mxu0 %v14322_v55  ;;  %6395 = vmatprep.mubr.f32.mxu1 %v14322_v55 }
 0x48b   : > { %9169 = vmatmul.mubr.msk.f32.gmra.mrb[108].mxu0 %vm1181_vm3, %v5471_v53  ;;  %9233 = vmatmul.mubr.msk.f32.gmra.mrb[108].mxu1 %vm1181_vm3, %v5471_v53 }
 0x48c   : > { %5952 = vmatprep.mubr.f32.mxu0 %v14322_v55  ;;  %6401 = vmatprep.mubr.f32.mxu1 %v14322_v55 }
 0x48f   : > { %9170 = vmatmul.mubr.msk.f32.gmra.mrb[110].mxu0 %vm1181_vm3, %v5472_v54  ;;  %9234 = vmatmul.mubr.msk.f32.gmra.mrb[110].mxu1 %vm1181_vm3, %v5472_v54 }
 0x490   : > { %5958 = vmatprep.mubr.f32.mxu0 %v14322_v55  ;;  %6407 = vmatprep.mubr.f32.mxu1 %v14322_v55 }
 0x493   : > { %9171 = vmatmul.mubr.msk.f32.gmra.mrb[112].mxu0 %vm1181_vm3, %v5473_v0  ;;  %9235 = vmatmul.mubr.msk.f32.gmra.mrb[112].mxu1 %vm1181_vm3, %v5473_v0 }
 0x494   : > { %5964 = vmatprep.mubr.f32.mxu0 %v14322_v55  ;;  %6413 = vmatprep.mubr.f32.mxu1 %v14322_v55 }
 0x497   : > { %9172 = vmatmul.mubr.msk.f32.gmra.mrb[114].mxu0 %vm1181_vm3, %v5474_v3  ;;  %9236 = vmatmul.mubr.msk.f32.gmra.mrb[114].mxu1 %vm1181_vm3, %v5474_v3 }
 0x498   : > { %5970 = vmatprep.mubr.f32.mxu0 %v14322_v55  ;;  %6419 = vmatprep.mubr.f32.mxu1 %v14322_v55 }
 0x49b   : > { %9173 = vmatmul.mubr.msk.f32.gmra.mrb[116].mxu0 %vm1181_vm3, %v5475_v18  ;;  %9237 = vmatmul.mubr.msk.f32.gmra.mrb[116].mxu1 %vm1181_vm3, %v5475_v18  ;;  %v5502_v18 = vld [vmem:[%s14263_s11 + $0x1f0] sm:$0xff] }
 0x49c   : > { %5976 = vmatprep.mubr.f32.mxu0 %v14322_v55  ;;  %6425 = vmatprep.mubr.f32.mxu1 %v14322_v55 }
 0x49f   : > { %9174 = vmatmul.mubr.msk.f32.gmra.mrb[118].mxu0 %vm1181_vm3, %v5476_v28  ;;  %9238 = vmatmul.mubr.msk.f32.gmra.mrb[118].mxu1 %vm1181_vm3, %v5476_v28 }
 0x4a0   : > { %5982 = vmatprep.mubr.f32.mxu0 %v14322_v55  ;;  %6431 = vmatprep.mubr.f32.mxu1 %v14322_v55 }
 0x4a3   : > { %9175 = vmatmul.mubr.msk.f32.gmra.mrb[120].mxu0 %vm1181_vm3, %v5477_v32  ;;  %9239 = vmatmul.mubr.msk.f32.gmra.mrb[120].mxu1 %vm1181_vm3, %v5477_v32 }
 0x4a4   : > { %5988 = vmatprep.mubr.f32.mxu0 %v14322_v55  ;;  %6437 = vmatprep.mubr.f32.mxu1 %v14322_v55 }
 0x4a7   : > { %9176 = vmatmul.mubr.msk.f32.gmra.mrb[122].mxu0 %vm1181_vm3, %v5478_v42  ;;  %9240 = vmatmul.mubr.msk.f32.gmra.mrb[122].mxu1 %vm1181_vm3, %v5478_v42 }
 0x4a8   : > { %5994 = vmatprep.mubr.f32.mxu0 %v14322_v55  ;;  %6443 = vmatprep.mubr.f32.mxu1 %v14322_v55 }
 0x4ab   : > { %9177 = vmatmul.mubr.msk.f32.gmra.mrb[124].mxu0 %vm1181_vm3, %v5479_v46  ;;  %9241 = vmatmul.mubr.msk.f32.gmra.mrb[124].mxu1 %vm1181_vm3, %v5479_v46 }
 0x4ac   : > { %6000 = vmatprep.mubr.f32.mxu0 %v14322_v55  ;;  %6449 = vmatprep.mubr.f32.mxu1 %v14322_v55 }
 0x4af   : > { %9178 = vmatmul.mubr.msk.f32.gmra.mrb[126].mxu0 %vm1181_vm3, %v5480_v62  ;;  %9242 = vmatmul.mubr.msk.f32.gmra.mrb[126].mxu1 %vm1181_vm3, %v5480_v62  ;;  %v5503_v62 = vld [vmem:[%s14263_s11 + $0x1f8] sm:$0xff] }
 0x4b0   : > { %6006 = vmatprep.mubr.f32.mxu0 %v14322_v55  ;;  %6455 = vmatprep.mubr.f32.mxu1 %v14322_v55 }
 0x4b3   : > { %9179 = vmatmul.mubr.msk.f32.gmra.mrb[128].mxu0 %vm1181_vm3, %v5481_v59  ;;  %9243 = vmatmul.mubr.msk.f32.gmra.mrb[128].mxu1 %vm1181_vm3, %v5481_v59 }
 0x4b4   : > { %6012 = vmatprep.mubr.f32.mxu0 %v14322_v55  ;;  %6461 = vmatprep.mubr.f32.mxu1 %v14322_v55 }
 0x4b7   : > { %9180 = vmatmul.mubr.msk.f32.gmra.mrb[130].mxu0 %vm1181_vm3, %v5482_v58  ;;  %9244 = vmatmul.mubr.msk.f32.gmra.mrb[130].mxu1 %vm1181_vm3, %v5482_v58 }
 0x4b8   : > { %6018 = vmatprep.mubr.f32.mxu0 %v14322_v55  ;;  %6467 = vmatprep.mubr.f32.mxu1 %v14322_v55 }
 0x4bb   : > { %9181 = vmatmul.mubr.msk.f32.gmra.mrb[132].mxu0 %vm1181_vm3, %v5483_v14  ;;  %9245 = vmatmul.mubr.msk.f32.gmra.mrb[132].mxu1 %vm1181_vm3, %v5483_v14 }
 0x4bc   : > { %6024 = vmatprep.mubr.f32.mxu0 %v14322_v55  ;;  %6473 = vmatprep.mubr.f32.mxu1 %v14322_v55 }
 0x4bf   : > { %9182 = vmatmul.mubr.msk.f32.gmra.mrb[134].mxu0 %vm1181_vm3, %v5484_v2  ;;  %9246 = vmatmul.mubr.msk.f32.gmra.mrb[134].mxu1 %vm1181_vm3, %v5484_v2 }
 0x4c0   : > { %6030 = vmatprep.mubr.f32.mxu0 %v14322_v55  ;;  %6479 = vmatprep.mubr.f32.mxu1 %v14322_v55 }
 0x4c3   : > { %9183 = vmatmul.mubr.msk.f32.gmra.mrb[136].mxu0 %vm1181_vm3, %v5485_v5  ;;  %9247 = vmatmul.mubr.msk.f32.gmra.mrb[136].mxu1 %vm1181_vm3, %v5485_v5  ;;  %v7106_v5 = vld [vmem:[%s14265_s13] sm:$0xff] }
 0x4c4   : > { %6036 = vmatprep.mubr.f32.mxu0 %v14322_v55  ;;  %6485 = vmatprep.mubr.f32.mxu1 %v14322_v55 }
 0x4c7   : > { %9184 = vmatmul.mubr.msk.f32.gmra.mrb[138].mxu0 %vm1181_vm3, %v5486_v7  ;;  %9248 = vmatmul.mubr.msk.f32.gmra.mrb[138].mxu1 %vm1181_vm3, %v5486_v7 }
 0x4c8   : > { %6042 = vmatprep.mubr.f32.mxu0 %v14322_v55  ;;  %6491 = vmatprep.mubr.f32.mxu1 %v14322_v55 }
 0x4cb   : > { %9185 = vmatmul.mubr.msk.f32.gmra.mrb[140].mxu0 %vm1181_vm3, %v5487_v8  ;;  %9249 = vmatmul.mubr.msk.f32.gmra.mrb[140].mxu1 %vm1181_vm3, %v5487_v8 }
 0x4cc   : > { %6048 = vmatprep.mubr.f32.mxu0 %v14322_v55  ;;  %6497 = vmatprep.mubr.f32.mxu1 %v14322_v55 }
 0x4cf   : > { %9186 = vmatmul.mubr.msk.f32.gmra.mrb[142].mxu0 %vm1181_vm3, %v5488_v9  ;;  %9250 = vmatmul.mubr.msk.f32.gmra.mrb[142].mxu1 %vm1181_vm3, %v5488_v9 }
 0x4d0   : > { %6054 = vmatprep.mubr.f32.mxu0 %v14322_v55  ;;  %6503 = vmatprep.mubr.f32.mxu1 %v14322_v55 }
 0x4d3   : > { %9187 = vmatmul.mubr.msk.f32.gmra.mrb[144].mxu0 %vm1181_vm3, %v5489_v10  ;;  %9251 = vmatmul.mubr.msk.f32.gmra.mrb[144].mxu1 %vm1181_vm3, %v5489_v10 }
 0x4d4   : > { %6060 = vmatprep.mubr.f32.mxu0 %v14322_v55  ;;  %6509 = vmatprep.mubr.f32.mxu1 %v14322_v55 }
 0x4d7   : > { %9188 = vmatmul.mubr.msk.f32.gmra.mrb[146].mxu0 %vm1181_vm3, %v5490_v13  ;;  %9252 = vmatmul.mubr.msk.f32.gmra.mrb[146].mxu1 %vm1181_vm3, %v5490_v13  ;;  %v7107_v13 = vld [vmem:[%s14265_s13 + $0x8] sm:$0xff] }
 0x4d8   : > { %6066 = vmatprep.mubr.f32.mxu0 %v14322_v55  ;;  %6515 = vmatprep.mubr.f32.mxu1 %v14322_v55 }
 0x4db   : > { %9189 = vmatmul.mubr.msk.f32.gmra.mrb[148].mxu0 %vm1181_vm3, %v5491_v15  ;;  %9253 = vmatmul.mubr.msk.f32.gmra.mrb[148].mxu1 %vm1181_vm3, %v5491_v15 }
 0x4dc   : > { %6072 = vmatprep.mubr.f32.mxu0 %v14322_v55  ;;  %6521 = vmatprep.mubr.f32.mxu1 %v14322_v55 }
 0x4df   : > { %9190 = vmatmul.mubr.msk.f32.gmra.mrb[150].mxu0 %vm1181_vm3, %v5492_v19  ;;  %9254 = vmatmul.mubr.msk.f32.gmra.mrb[150].mxu1 %vm1181_vm3, %v5492_v19 }
 0x4e0   : > { %6078 = vmatprep.mubr.f32.mxu0 %v14322_v55  ;;  %6527 = vmatprep.mubr.f32.mxu1 %v14322_v55 }
 0x4e2   : > { %v5762_v23 = vpop.f32.mrb[46].mxu0  ;;  %v6211_v24 = vpop.f32.mrb[46].mxu1 }
 0x4e3   : > { %6850 = vst [vmem:[%s13122_s26] sm:$0xff] %v5762_v23  ;;  %6852 = vst [vmem:[%s13122_s26 + $0x10] sm:$0xff] %v6211_v24  ;;  %v5764_v25 = vpop.f32.mrb[47].mxu0  ;;  %9191 = vmatmul.mubr.msk.f32.gmra.mrb[152].mxu0 %vm1181_vm3, %v5493_v20  ;;  %v6213_v12 = vpop.f32.mrb[47].mxu1  ;;  %9255 = vmatmul.mubr.msk.f32.gmra.mrb[152].mxu1 %vm1181_vm3, %v5493_v20  ;;  %v7108_v24 = vld [vmem:[%s14265_s13 + $0x10] sm:$0xff] }
 0x4e4   : > { %6851 = vst [vmem:[%s13122_s26 + $0x8] sm:$0xff] %v5764_v25  ;;  %6853 = vst [vmem:[%s13122_s26 + $0x18] sm:$0xff] %v6213_v12  ;;  %6084 = vmatprep.mubr.f32.mxu0 %v14322_v55  ;;  %6533 = vmatprep.mubr.f32.mxu1 %v14322_v55 }
 0x4e6   : > { %v5768_v63 = vpop.f32.mrb[48].mxu0  ;;  %v6217_v51 = vpop.f32.mrb[48].mxu1 }
 0x4e7   : > { %6854 = vst [vmem:[%s13122_s26 + $0x20] sm:$0xff] %v5768_v63  ;;  %6856 = vst [vmem:[%s13122_s26 + $0x30] sm:$0xff] %v6217_v51  ;;  %v5770_v52 = vpop.f32.mrb[49].mxu0  ;;  %9192 = vmatmul.mubr.msk.f32.gmra.mrb[154].mxu0 %vm1181_vm3, %v5494_v43  ;;  %v6219_v56 = vpop.f32.mrb[49].mxu1  ;;  %9256 = vmatmul.mubr.msk.f32.gmra.mrb[154].mxu1 %vm1181_vm3, %v5494_v43  ;;  %v7109_v51 = vld [vmem:[%s14265_s13 + $0x18] sm:$0xff] }
 0x4e8   : > { %6855 = vst [vmem:[%s13122_s26 + $0x28] sm:$0xff] %v5770_v52  ;;  %6857 = vst [vmem:[%s13122_s26 + $0x38] sm:$0xff] %v6219_v56  ;;  %6090 = vmatprep.mubr.f32.mxu0 %v14322_v55  ;;  %6539 = vmatprep.mubr.f32.mxu1 %v14322_v55 }
 0x4ea   : > { %v5774_v4 = vpop.f32.mrb[50].mxu0  ;;  %v6223_v1 = vpop.f32.mrb[50].mxu1 }
 0x4eb   : > { %6858 = vst [vmem:[%s13122_s26 + $0x40] sm:$0xff] %v5774_v4  ;;  %6860 = vst [vmem:[%s13122_s26 + $0x50] sm:$0xff] %v6223_v1  ;;  %v5776_v60 = vpop.f32.mrb[51].mxu0  ;;  %9193 = vmatmul.mubr.msk.f32.gmra.mrb[156].mxu0 %vm1181_vm3, %v5495_v57  ;;  %v6225_v26 = vpop.f32.mrb[51].mxu1  ;;  %9257 = vmatmul.mubr.msk.f32.gmra.mrb[156].mxu1 %vm1181_vm3, %v5495_v57  ;;  %v7110_v1 = vld [vmem:[%s14265_s13 + $0x20] sm:$0xff] }
 0x4ec   : > { %6859 = vst [vmem:[%s13122_s26 + $0x48] sm:$0xff] %v5776_v60  ;;  %6861 = vst [vmem:[%s13122_s26 + $0x58] sm:$0xff] %v6225_v26  ;;  %6096 = vmatprep.mubr.f32.mxu0 %v14322_v55  ;;  %6545 = vmatprep.mubr.f32.mxu1 %v14322_v55 }
 0x4ee   : > { %v5780_v11 = vpop.f32.mrb[52].mxu0  ;;  %v6229_v29 = vpop.f32.mrb[52].mxu1 }
 0x4ef   : > { %6862 = vst [vmem:[%s13122_s26 + $0x60] sm:$0xff] %v5780_v11  ;;  %6864 = vst [vmem:[%s13122_s26 + $0x70] sm:$0xff] %v6229_v29  ;;  %v5782_v6 = vpop.f32.mrb[53].mxu0  ;;  %9194 = vmatmul.mubr.msk.f32.gmra.mrb[158].mxu0 %vm1181_vm3, %v5496_v61  ;;  %v6231_v27 = vpop.f32.mrb[53].mxu1  ;;  %9258 = vmatmul.mubr.msk.f32.gmra.mrb[158].mxu1 %vm1181_vm3, %v5496_v61  ;;  %v7111_v29 = vld [vmem:[%s14265_s13 + $0x28] sm:$0xff] }
 0x4f0   : > { %6863 = vst [vmem:[%s13122_s26 + $0x68] sm:$0xff] %v5782_v6  ;;  %6865 = vst [vmem:[%s13122_s26 + $0x78] sm:$0xff] %v6231_v27  ;;  %6102 = vmatprep.mubr.f32.mxu0 %v14322_v55  ;;  %6551 = vmatprep.mubr.f32.mxu1 %v14322_v55 }
 0x4f2   : > { %v5786_v17 = vpop.f32.mrb[54].mxu0  ;;  %v6235_v21 = vpop.f32.mrb[54].mxu1 }
 0x4f3   : > { %6866 = vst [vmem:[%s13122_s26 + $0x80] sm:$0xff] %v5786_v17  ;;  %6868 = vst [vmem:[%s13122_s26 + $0x90] sm:$0xff] %v6235_v21  ;;  %v5788_v22 = vpop.f32.mrb[55].mxu0  ;;  %9195 = vmatmul.mubr.msk.f32.gmra.mrb[160].mxu0 %vm1181_vm3, %v5497_v16  ;;  %v6237_v33 = vpop.f32.mrb[55].mxu1  ;;  %9259 = vmatmul.mubr.msk.f32.gmra.mrb[160].mxu1 %vm1181_vm3, %v5497_v16  ;;  %v7112_v21 = vld [vmem:[%s14265_s13 + $0x30] sm:$0xff] }
 0x4f4   : > { %6867 = vst [vmem:[%s13122_s26 + $0x88] sm:$0xff] %v5788_v22  ;;  %6869 = vst [vmem:[%s13122_s26 + $0x98] sm:$0xff] %v6237_v33  ;;  %6108 = vmatprep.mubr.f32.mxu0 %v14322_v55  ;;  %6557 = vmatprep.mubr.f32.mxu1 %v14322_v55 }
 0x4f6   : > { %v5792_v31 = vpop.f32.mrb[56].mxu0  ;;  %v6241_v34 = vpop.f32.mrb[56].mxu1 }
 0x4f7   : > { %6870 = vst [vmem:[%s13122_s26 + $0xa0] sm:$0xff] %v5792_v31  ;;  %6872 = vst [vmem:[%s13122_s26 + $0xb0] sm:$0xff] %v6241_v34  ;;  %v5794_v35 = vpop.f32.mrb[57].mxu0  ;;  %9196 = vmatmul.mubr.msk.f32.gmra.mrb[162].mxu0 %vm1181_vm3, %v5498_v30  ;;  %v6243_v36 = vpop.f32.mrb[57].mxu1  ;;  %9260 = vmatmul.mubr.msk.f32.gmra.mrb[162].mxu1 %vm1181_vm3, %v5498_v30  ;;  %v7113_v34 = vld [vmem:[%s14265_s13 + $0x38] sm:$0xff] }
 0x4f8   : > { %6871 = vst [vmem:[%s13122_s26 + $0xa8] sm:$0xff] %v5794_v35  ;;  %6873 = vst [vmem:[%s13122_s26 + $0xb8] sm:$0xff] %v6243_v36  ;;  %6114 = vmatprep.mubr.f32.mxu0 %v14322_v55  ;;  %6563 = vmatprep.mubr.f32.mxu1 %v14322_v55 }
 0x4fa   : > { %v5798_v38 = vpop.f32.mrb[58].mxu0  ;;  %v6247_v44 = vpop.f32.mrb[58].mxu1 }
 0x4fb   : > { %6874 = vst [vmem:[%s13122_s26 + $0xc0] sm:$0xff] %v5798_v38  ;;  %6876 = vst [vmem:[%s13122_s26 + $0xd0] sm:$0xff] %v6247_v44  ;;  %v5800_v45 = vpop.f32.mrb[59].mxu0  ;;  %9197 = vmatmul.mubr.msk.f32.gmra.mrb[164].mxu0 %vm1181_vm3, %v5499_v37  ;;  %v6249_v47 = vpop.f32.mrb[59].mxu1  ;;  %9261 = vmatmul.mubr.msk.f32.gmra.mrb[164].mxu1 %vm1181_vm3, %v5499_v37  ;;  %v7114_v44 = vld [vmem:[%s14265_s13 + $0x40] sm:$0xff] }
 0x4fc   : > { %6875 = vst [vmem:[%s13122_s26 + $0xc8] sm:$0xff] %v5800_v45  ;;  %6877 = vst [vmem:[%s13122_s26 + $0xd8] sm:$0xff] %v6249_v47  ;;  %6120 = vmatprep.mubr.f32.mxu0 %v14322_v55  ;;  %6569 = vmatprep.mubr.f32.mxu1 %v14322_v55 }
 0x4fe   : > { %v5804_v39 = vpop.f32.mrb[60].mxu0  ;;  %v6253_v41 = vpop.f32.mrb[60].mxu1 }
 0x4ff   : > { %6878 = vst [vmem:[%s13122_s26 + $0xe0] sm:$0xff] %v5804_v39  ;;  %6880 = vst [vmem:[%s13122_s26 + $0xf0] sm:$0xff] %v6253_v41  ;;  %v5806_v48 = vpop.f32.mrb[61].mxu0  ;;  %9198 = vmatmul.mubr.msk.f32.gmra.mrb[166].mxu0 %vm1181_vm3, %v5500_v40  ;;  %v6255_v49 = vpop.f32.mrb[61].mxu1  ;;  %9262 = vmatmul.mubr.msk.f32.gmra.mrb[166].mxu1 %vm1181_vm3, %v5500_v40  ;;  %v7115_v41 = vld [vmem:[%s14265_s13 + $0x48] sm:$0xff] }
 0x500   : > { %6879 = vst [vmem:[%s13122_s26 + $0xe8] sm:$0xff] %v5806_v48  ;;  %6881 = vst [vmem:[%s13122_s26 + $0xf8] sm:$0xff] %v6255_v49  ;;  %6126 = vmatprep.mubr.f32.mxu0 %v14322_v55  ;;  %6575 = vmatprep.mubr.f32.mxu1 %v14322_v55 }
 0x502   : > { %v5810_v53 = vpop.f32.mrb[62].mxu0  ;;  %v6259_v54 = vpop.f32.mrb[62].mxu1 }
 0x503   : > { %6882 = vst [vmem:[%s13122_s26 + $0x100] sm:$0xff] %v5810_v53  ;;  %6884 = vst [vmem:[%s13122_s26 + $0x110] sm:$0xff] %v6259_v54  ;;  %v5812_v0 = vpop.f32.mrb[63].mxu0  ;;  %9199 = vmatmul.mubr.msk.f32.gmra.mrb[168].mxu0 %vm1181_vm3, %v5501_v50  ;;  %v6261_v3 = vpop.f32.mrb[63].mxu1  ;;  %9263 = vmatmul.mubr.msk.f32.gmra.mrb[168].mxu1 %vm1181_vm3, %v5501_v50  ;;  %v7116_v54 = vld [vmem:[%s14265_s13 + $0x50] sm:$0xff] }
 0x504   : > { %6883 = vst [vmem:[%s13122_s26 + $0x108] sm:$0xff] %v5812_v0  ;;  %6885 = vst [vmem:[%s13122_s26 + $0x118] sm:$0xff] %v6261_v3  ;;  %6132 = vmatprep.mubr.f32.mxu0 %v14322_v55  ;;  %6581 = vmatprep.mubr.f32.mxu1 %v14322_v55 }
 0x506   : > { %v5816_v28 = vpop.f32.mrb[64].mxu0  ;;  %v6265_v32 = vpop.f32.mrb[64].mxu1 }
 0x507   : > { %6886 = vst [vmem:[%s13122_s26 + $0x120] sm:$0xff] %v5816_v28  ;;  %6888 = vst [vmem:[%s13122_s26 + $0x130] sm:$0xff] %v6265_v32  ;;  %v5818_v42 = vpop.f32.mrb[65].mxu0  ;;  %9200 = vmatmul.mubr.msk.f32.gmra.mrb[170].mxu0 %vm1181_vm3, %v5502_v18  ;;  %v6267_v46 = vpop.f32.mrb[65].mxu1  ;;  %9264 = vmatmul.mubr.msk.f32.gmra.mrb[170].mxu1 %vm1181_vm3, %v5502_v18  ;;  %v7117_v32 = vld [vmem:[%s14265_s13 + $0x58] sm:$0xff] }
 0x508   : > { %6887 = vst [vmem:[%s13122_s26 + $0x128] sm:$0xff] %v5818_v42  ;;  %6889 = vst [vmem:[%s13122_s26 + $0x138] sm:$0xff] %v6267_v46  ;;  %6138 = vmatprep.mubr.f32.mxu0 %v14322_v55  ;;  %6587 = vmatprep.mubr.f32.mxu1 %v14322_v55 }
 0x50a   : > { %v5822_v59 = vpop.f32.mrb[66].mxu0  ;;  %v6271_v58 = vpop.f32.mrb[66].mxu1 }
 0x50b   : > { %6890 = vst [vmem:[%s13122_s26 + $0x140] sm:$0xff] %v5822_v59  ;;  %6892 = vst [vmem:[%s13122_s26 + $0x150] sm:$0xff] %v6271_v58  ;;  %v5824_v14 = vpop.f32.mrb[67].mxu0  ;;  %9201 = vmatmul.mubr.msk.f32.gmra.mrb[172].mxu0 %vm1181_vm3, %v5503_v62  ;;  %v6273_v2 = vpop.f32.mrb[67].mxu1  ;;  %9265 = vmatmul.mubr.msk.f32.gmra.mrb[172].mxu1 %vm1181_vm3, %v5503_v62  ;;  %v7118_v58 = vld [vmem:[%s14265_s13 + $0x60] sm:$0xff] }
 0x50c   : > { %6891 = vst [vmem:[%s13122_s26 + $0x148] sm:$0xff] %v5824_v14  ;;  %6893 = vst [vmem:[%s13122_s26 + $0x158] sm:$0xff] %v6273_v2  ;;  %7426 = vmatprep.mubr.f32.mxu0 %v14322_v55  ;;  %7875 = vmatprep.mubr.f32.mxu1 %v14322_v55 }
 0x50e   : > { %v5828_v7 = vpop.f32.mrb[68].mxu0  ;;  %v6277_v8 = vpop.f32.mrb[68].mxu1 }
 0x50f   : > { %6894 = vst [vmem:[%s13122_s26 + $0x160] sm:$0xff] %v5828_v7  ;;  %6896 = vst [vmem:[%s13122_s26 + $0x170] sm:$0xff] %v6277_v8  ;;  %v5830_v9 = vpop.f32.mrb[69].mxu0  ;;  %v6279_v10 = vpop.f32.mrb[69].mxu1  ;;  %9266 = vmatmul.mubr.msk.f32.vlgmr.msra.gmra.mrb[174].mxu0 %vm1181_vm3, %v7106_v5  ;;  %9330 = vmatmul.mubr.msk.f32.vlgmr.msra.gmra.mrb[174].mxu1 %vm1181_vm3, %v7106_v5  ;;  %v7119_v8 = vld [vmem:[%s14265_s13 + $0x68] sm:$0xff] }
 0x510   : > { %6895 = vst [vmem:[%s13122_s26 + $0x168] sm:$0xff] %v5830_v9  ;;  %6897 = vst [vmem:[%s13122_s26 + $0x178] sm:$0xff] %v6279_v10  ;;  %7432 = vmatprep.mubr.f32.mxu0 %v14322_v55  ;;  %7881 = vmatprep.mubr.f32.mxu1 %v14322_v55 }
 0x512   : > { %v5834_v15 = vpop.f32.mrb[70].mxu0  ;;  %v6283_v19 = vpop.f32.mrb[70].mxu1 }
 0x513   : > { %6898 = vst [vmem:[%s13122_s26 + $0x180] sm:$0xff] %v5834_v15  ;;  %6900 = vst [vmem:[%s13122_s26 + $0x190] sm:$0xff] %v6283_v19  ;;  %v5836_v20 = vpop.f32.mrb[71].mxu0  ;;  %v6285_v23 = vpop.f32.mrb[71].mxu1  ;;  %9267 = vmatmul.mubr.msk.f32.gmra.mrb[176].mxu0 %vm1181_vm3, %v7107_v13  ;;  %9331 = vmatmul.mubr.msk.f32.gmra.mrb[176].mxu1 %vm1181_vm3, %v7107_v13  ;;  %v7120_v19 = vld [vmem:[%s14265_s13 + $0x70] sm:$0xff] }
 0x514   : > { %6899 = vst [vmem:[%s13122_s26 + $0x188] sm:$0xff] %v5836_v20  ;;  %6901 = vst [vmem:[%s13122_s26 + $0x198] sm:$0xff] %v6285_v23  ;;  %7438 = vmatprep.mubr.f32.mxu0 %v14322_v55  ;;  %7887 = vmatprep.mubr.f32.mxu1 %v14322_v55 }
 0x516   : > { %v5840_v25 = vpop.f32.mrb[72].mxu0  ;;  %v6289_v12 = vpop.f32.mrb[72].mxu1 }
 0x517   : > { %6902 = vst [vmem:[%s13122_s26 + $0x1a0] sm:$0xff] %v5840_v25  ;;  %6904 = vst [vmem:[%s13122_s26 + $0x1b0] sm:$0xff] %v6289_v12  ;;  %v5842_v43 = vpop.f32.mrb[73].mxu0  ;;  %v6291_v63 = vpop.f32.mrb[73].mxu1  ;;  %9268 = vmatmul.mubr.msk.f32.gmra.mrb[178].mxu0 %vm1181_vm3, %v7108_v24  ;;  %9332 = vmatmul.mubr.msk.f32.gmra.mrb[178].mxu1 %vm1181_vm3, %v7108_v24  ;;  %v7121_v12 = vld [vmem:[%s14265_s13 + $0x78] sm:$0xff] }
 0x518   : > { %6903 = vst [vmem:[%s13122_s26 + $0x1a8] sm:$0xff] %v5842_v43  ;;  %6905 = vst [vmem:[%s13122_s26 + $0x1b8] sm:$0xff] %v6291_v63  ;;  %7444 = vmatprep.mubr.f32.mxu0 %v14322_v55  ;;  %7893 = vmatprep.mubr.f32.mxu1 %v14322_v55 }
 0x51a   : > { %v5846_v52 = vpop.f32.mrb[74].mxu0  ;;  %v6295_v56 = vpop.f32.mrb[74].mxu1 }
 0x51b   : > { %6906 = vst [vmem:[%s13122_s26 + $0x1c0] sm:$0xff] %v5846_v52  ;;  %6908 = vst [vmem:[%s13122_s26 + $0x1d0] sm:$0xff] %v6295_v56  ;;  %v5848_v57 = vpop.f32.mrb[75].mxu0  ;;  %v6297_v4 = vpop.f32.mrb[75].mxu1  ;;  %9269 = vmatmul.mubr.msk.f32.gmra.mrb[180].mxu0 %vm1181_vm3, %v7109_v51  ;;  %9333 = vmatmul.mubr.msk.f32.gmra.mrb[180].mxu1 %vm1181_vm3, %v7109_v51  ;;  %v7122_v56 = vld [vmem:[%s14265_s13 + $0x80] sm:$0xff] }
 0x51c   : > { %6907 = vst [vmem:[%s13122_s26 + $0x1c8] sm:$0xff] %v5848_v57  ;;  %6909 = vst [vmem:[%s13122_s26 + $0x1d8] sm:$0xff] %v6297_v4  ;;  %7450 = vmatprep.mubr.f32.mxu0 %v14322_v55  ;;  %7899 = vmatprep.mubr.f32.mxu1 %v14322_v55 }
 0x51e   : > { %v5852_v60 = vpop.f32.mrb[76].mxu0  ;;  %v6301_v26 = vpop.f32.mrb[76].mxu1 }
 0x51f   : > { %6910 = vst [vmem:[%s13122_s26 + $0x1e0] sm:$0xff] %v5852_v60  ;;  %6912 = vst [vmem:[%s13122_s26 + $0x1f0] sm:$0xff] %v6301_v26  ;;  %v5854_v61 = vpop.f32.mrb[77].mxu0  ;;  %v6303_v11 = vpop.f32.mrb[77].mxu1  ;;  %9270 = vmatmul.mubr.msk.f32.gmra.mrb[182].mxu0 %vm1181_vm3, %v7110_v1  ;;  %9334 = vmatmul.mubr.msk.f32.gmra.mrb[182].mxu1 %vm1181_vm3, %v7110_v1  ;;  %v7123_v26 = vld [vmem:[%s14265_s13 + $0x88] sm:$0xff] }
 0x520   : > { %6911 = vst [vmem:[%s13122_s26 + $0x1e8] sm:$0xff] %v5854_v61  ;;  %6913 = vst [vmem:[%s13122_s26 + $0x1f8] sm:$0xff] %v6303_v11  ;;  %7456 = vmatprep.mubr.f32.mxu0 %v14322_v55  ;;  %7905 = vmatprep.mubr.f32.mxu1 %v14322_v55 }
 0x522   : > { %v5858_v6 = vpop.f32.mrb[78].mxu0  ;;  %v6307_v27 = vpop.f32.mrb[78].mxu1 }
 0x523   : > { %6914 = vst [vmem:[%s13122_s26 + $0x200] sm:$0xff] %v5858_v6  ;;  %6916 = vst [vmem:[%s13122_s26 + $0x210] sm:$0xff] %v6307_v27  ;;  %v5860_v16 = vpop.f32.mrb[79].mxu0  ;;  %v6309_v17 = vpop.f32.mrb[79].mxu1  ;;  %9271 = vmatmul.mubr.msk.f32.gmra.mrb[184].mxu0 %vm1181_vm3, %v7111_v29  ;;  %9335 = vmatmul.mubr.msk.f32.gmra.mrb[184].mxu1 %vm1181_vm3, %v7111_v29  ;;  %v7124_v27 = vld [vmem:[%s14265_s13 + $0x90] sm:$0xff] }
 0x524   : > { %6915 = vst [vmem:[%s13122_s26 + $0x208] sm:$0xff] %v5860_v16  ;;  %6917 = vst [vmem:[%s13122_s26 + $0x218] sm:$0xff] %v6309_v17  ;;  %7462 = vmatprep.mubr.f32.mxu0 %v14322_v55  ;;  %7911 = vmatprep.mubr.f32.mxu1 %v14322_v55 }
 0x526   : > { %v5864_v22 = vpop.f32.mrb[80].mxu0  ;;  %v6313_v33 = vpop.f32.mrb[80].mxu1 }
 0x527   : > { %6918 = vst [vmem:[%s13122_s26 + $0x220] sm:$0xff] %v5864_v22  ;;  %6920 = vst [vmem:[%s13122_s26 + $0x230] sm:$0xff] %v6313_v33  ;;  %v5866_v30 = vpop.f32.mrb[81].mxu0  ;;  %v6315_v31 = vpop.f32.mrb[81].mxu1  ;;  %9272 = vmatmul.mubr.msk.f32.gmra.mrb[186].mxu0 %vm1181_vm3, %v7112_v21  ;;  %9336 = vmatmul.mubr.msk.f32.gmra.mrb[186].mxu1 %vm1181_vm3, %v7112_v21  ;;  %v7125_v33 = vld [vmem:[%s14265_s13 + $0x98] sm:$0xff] }
 0x528   : > { %6919 = vst [vmem:[%s13122_s26 + $0x228] sm:$0xff] %v5866_v30  ;;  %6921 = vst [vmem:[%s13122_s26 + $0x238] sm:$0xff] %v6315_v31  ;;  %7468 = vmatprep.mubr.f32.mxu0 %v14322_v55  ;;  %7917 = vmatprep.mubr.f32.mxu1 %v14322_v55 }
 0x52a   : > { %v5870_v35 = vpop.f32.mrb[82].mxu0  ;;  %v6319_v36 = vpop.f32.mrb[82].mxu1 }
 0x52b   : > { %6922 = vst [vmem:[%s13122_s26 + $0x240] sm:$0xff] %v5870_v35  ;;  %6924 = vst [vmem:[%s13122_s26 + $0x250] sm:$0xff] %v6319_v36  ;;  %v5872_v37 = vpop.f32.mrb[83].mxu0  ;;  %v6321_v38 = vpop.f32.mrb[83].mxu1  ;;  %9273 = vmatmul.mubr.msk.f32.gmra.mrb[188].mxu0 %vm1181_vm3, %v7113_v34  ;;  %9337 = vmatmul.mubr.msk.f32.gmra.mrb[188].mxu1 %vm1181_vm3, %v7113_v34  ;;  %v7126_v36 = vld [vmem:[%s14265_s13 + $0xa0] sm:$0xff] }
 0x52c   : > { %6923 = vst [vmem:[%s13122_s26 + $0x248] sm:$0xff] %v5872_v37  ;;  %6925 = vst [vmem:[%s13122_s26 + $0x258] sm:$0xff] %v6321_v38  ;;  %7474 = vmatprep.mubr.f32.mxu0 %v14322_v55  ;;  %7923 = vmatprep.mubr.f32.mxu1 %v14322_v55 }
 0x52e   : > { %v5876_v45 = vpop.f32.mrb[84].mxu0  ;;  %v6325_v47 = vpop.f32.mrb[84].mxu1 }
 0x52f   : > { %6926 = vst [vmem:[%s13122_s26 + $0x260] sm:$0xff] %v5876_v45  ;;  %6928 = vst [vmem:[%s13122_s26 + $0x270] sm:$0xff] %v6325_v47  ;;  %v5878_v40 = vpop.f32.mrb[85].mxu0  ;;  %v6327_v39 = vpop.f32.mrb[85].mxu1  ;;  %9274 = vmatmul.mubr.msk.f32.gmra.mrb[190].mxu0 %vm1181_vm3, %v7114_v44  ;;  %9338 = vmatmul.mubr.msk.f32.gmra.mrb[190].mxu1 %vm1181_vm3, %v7114_v44  ;;  %v7127_v47 = vld [vmem:[%s14265_s13 + $0xa8] sm:$0xff] }
 0x530   : > { %6927 = vst [vmem:[%s13122_s26 + $0x268] sm:$0xff] %v5878_v40  ;;  %6929 = vst [vmem:[%s13122_s26 + $0x278] sm:$0xff] %v6327_v39  ;;  %7480 = vmatprep.mubr.f32.mxu0 %v14322_v55  ;;  %7929 = vmatprep.mubr.f32.mxu1 %v14322_v55 }
 0x532   : > { %v5882_v48 = vpop.f32.mrb[86].mxu0  ;;  %v6331_v49 = vpop.f32.mrb[86].mxu1 }
 0x533   : > { %6930 = vst [vmem:[%s13122_s26 + $0x280] sm:$0xff] %v5882_v48  ;;  %6932 = vst [vmem:[%s13122_s26 + $0x290] sm:$0xff] %v6331_v49  ;;  %v5884_v50 = vpop.f32.mrb[87].mxu0  ;;  %v6333_v53 = vpop.f32.mrb[87].mxu1  ;;  %9275 = vmatmul.mubr.msk.f32.gmra.mrb[192].mxu0 %vm1181_vm3, %v7115_v41  ;;  %9339 = vmatmul.mubr.msk.f32.gmra.mrb[192].mxu1 %vm1181_vm3, %v7115_v41  ;;  %v7128_v49 = vld [vmem:[%s14265_s13 + $0xb0] sm:$0xff] }
 0x534   : > { %6931 = vst [vmem:[%s13122_s26 + $0x288] sm:$0xff] %v5884_v50  ;;  %6933 = vst [vmem:[%s13122_s26 + $0x298] sm:$0xff] %v6333_v53  ;;  %7486 = vmatprep.mubr.f32.mxu0 %v14322_v55  ;;  %7935 = vmatprep.mubr.f32.mxu1 %v14322_v55 }
 0x536   : > { %v5888_v0 = vpop.f32.mrb[88].mxu0  ;;  %v6337_v3 = vpop.f32.mrb[88].mxu1 }
 0x537   : > { %6934 = vst [vmem:[%s13122_s26 + $0x2a0] sm:$0xff] %v5888_v0  ;;  %6936 = vst [vmem:[%s13122_s26 + $0x2b0] sm:$0xff] %v6337_v3  ;;  %v5890_v18 = vpop.f32.mrb[89].mxu0  ;;  %v6339_v28 = vpop.f32.mrb[89].mxu1  ;;  %9276 = vmatmul.mubr.msk.f32.gmra.mrb[194].mxu0 %vm1181_vm3, %v7116_v54  ;;  %9340 = vmatmul.mubr.msk.f32.gmra.mrb[194].mxu1 %vm1181_vm3, %v7116_v54  ;;  %v7129_v3 = vld [vmem:[%s14265_s13 + $0xb8] sm:$0xff] }
 0x538   : > { %6935 = vst [vmem:[%s13122_s26 + $0x2a8] sm:$0xff] %v5890_v18  ;;  %6937 = vst [vmem:[%s13122_s26 + $0x2b8] sm:$0xff] %v6339_v28  ;;  %7492 = vmatprep.mubr.f32.mxu0 %v14322_v55  ;;  %7941 = vmatprep.mubr.f32.mxu1 %v14322_v55 }
 0x53a   : > { %v5894_v42 = vpop.f32.mrb[90].mxu0  ;;  %v6343_v46 = vpop.f32.mrb[90].mxu1 }
 0x53b   : > { %6938 = vst [vmem:[%s13122_s26 + $0x2c0] sm:$0xff] %v5894_v42  ;;  %6940 = vst [vmem:[%s13122_s26 + $0x2d0] sm:$0xff] %v6343_v46  ;;  %v5896_v62 = vpop.f32.mrb[91].mxu0  ;;  %v6345_v59 = vpop.f32.mrb[91].mxu1  ;;  %9277 = vmatmul.mubr.msk.f32.gmra.mrb[196].mxu0 %vm1181_vm3, %v7117_v32  ;;  %9341 = vmatmul.mubr.msk.f32.gmra.mrb[196].mxu1 %vm1181_vm3, %v7117_v32  ;;  %v7130_v46 = vld [vmem:[%s14265_s13 + $0xc0] sm:$0xff] }
 0x53c   : > { %6939 = vst [vmem:[%s13122_s26 + $0x2c8] sm:$0xff] %v5896_v62  ;;  %6941 = vst [vmem:[%s13122_s26 + $0x2d8] sm:$0xff] %v6345_v59  ;;  %7498 = vmatprep.mubr.f32.mxu0 %v14322_v55  ;;  %7947 = vmatprep.mubr.f32.mxu1 %v14322_v55 }
 0x53e   : > { %v5900_v14 = vpop.f32.mrb[92].mxu0  ;;  %v6349_v2 = vpop.f32.mrb[92].mxu1 }
 0x53f   : > { %6942 = vst [vmem:[%s13122_s26 + $0x2e0] sm:$0xff] %v5900_v14  ;;  %6944 = vst [vmem:[%s13122_s26 + $0x2f0] sm:$0xff] %v6349_v2  ;;  %v5902_v5 = vpop.f32.mrb[93].mxu0  ;;  %v6351_v7 = vpop.f32.mrb[93].mxu1  ;;  %9278 = vmatmul.mubr.msk.f32.gmra.mrb[198].mxu0 %vm1181_vm3, %v7118_v58  ;;  %9342 = vmatmul.mubr.msk.f32.gmra.mrb[198].mxu1 %vm1181_vm3, %v7118_v58  ;;  %v7131_v2 = vld [vmem:[%s14265_s13 + $0xc8] sm:$0xff] }
 0x540   : > { %6943 = vst [vmem:[%s13122_s26 + $0x2e8] sm:$0xff] %v5902_v5  ;;  %6945 = vst [vmem:[%s13122_s26 + $0x2f8] sm:$0xff] %v6351_v7  ;;  %7504 = vmatprep.mubr.f32.mxu0 %v14322_v55  ;;  %7953 = vmatprep.mubr.f32.mxu1 %v14322_v55 }
 0x542   : > { %v5906_v9 = vpop.f32.mrb[94].mxu0  ;;  %v6355_v10 = vpop.f32.mrb[94].mxu1 }
 0x543   : > { %6946 = vst [vmem:[%s13122_s26 + $0x300] sm:$0xff] %v5906_v9  ;;  %6948 = vst [vmem:[%s13122_s26 + $0x310] sm:$0xff] %v6355_v10  ;;  %v5908_v13 = vpop.f32.mrb[95].mxu0  ;;  %v6357_v15 = vpop.f32.mrb[95].mxu1  ;;  %9279 = vmatmul.mubr.msk.f32.gmra.mrb[200].mxu0 %vm1181_vm3, %v7119_v8  ;;  %9343 = vmatmul.mubr.msk.f32.gmra.mrb[200].mxu1 %vm1181_vm3, %v7119_v8  ;;  %v7132_v10 = vld [vmem:[%s14265_s13 + $0xd0] sm:$0xff] }
 0x544   : > { %6947 = vst [vmem:[%s13122_s26 + $0x308] sm:$0xff] %v5908_v13  ;;  %6949 = vst [vmem:[%s13122_s26 + $0x318] sm:$0xff] %v6357_v15  ;;  %7510 = vmatprep.mubr.f32.mxu0 %v14322_v55  ;;  %7959 = vmatprep.mubr.f32.mxu1 %v14322_v55 }
 0x546   : > { %v5912_v20 = vpop.f32.mrb[96].mxu0  ;;  %v6361_v23 = vpop.f32.mrb[96].mxu1 }
 0x547   : > { %6950 = vst [vmem:[%s13122_s26 + $0x320] sm:$0xff] %v5912_v20  ;;  %6952 = vst [vmem:[%s13122_s26 + $0x330] sm:$0xff] %v6361_v23  ;;  %v5914_v24 = vpop.f32.mrb[97].mxu0  ;;  %v6363_v25 = vpop.f32.mrb[97].mxu1  ;;  %9280 = vmatmul.mubr.msk.f32.gmra.mrb[202].mxu0 %vm1181_vm3, %v7120_v19  ;;  %9344 = vmatmul.mubr.msk.f32.gmra.mrb[202].mxu1 %vm1181_vm3, %v7120_v19  ;;  %v7133_v23 = vld [vmem:[%s14265_s13 + $0xd8] sm:$0xff] }
 0x548   : > { %6951 = vst [vmem:[%s13122_s26 + $0x328] sm:$0xff] %v5914_v24  ;;  %6953 = vst [vmem:[%s13122_s26 + $0x338] sm:$0xff] %v6363_v25  ;;  %7516 = vmatprep.mubr.f32.mxu0 %v14322_v55  ;;  %7965 = vmatprep.mubr.f32.mxu1 %v14322_v55 }
 0x54a   : > { %v5918_v43 = vpop.f32.mrb[98].mxu0  ;;  %v6367_v63 = vpop.f32.mrb[98].mxu1 }
 0x54b   : > { %6954 = vst [vmem:[%s13122_s26 + $0x340] sm:$0xff] %v5918_v43  ;;  %6956 = vst [vmem:[%s13122_s26 + $0x350] sm:$0xff] %v6367_v63  ;;  %v5920_v51 = vpop.f32.mrb[99].mxu0  ;;  %v6369_v52 = vpop.f32.mrb[99].mxu1  ;;  %9281 = vmatmul.mubr.msk.f32.gmra.mrb[204].mxu0 %vm1181_vm3, %v7121_v12  ;;  %9345 = vmatmul.mubr.msk.f32.gmra.mrb[204].mxu1 %vm1181_vm3, %v7121_v12  ;;  %v7134_v63 = vld [vmem:[%s14265_s13 + $0xe0] sm:$0xff] }
 0x54c   : > { %6955 = vst [vmem:[%s13122_s26 + $0x348] sm:$0xff] %v5920_v51  ;;  %6957 = vst [vmem:[%s13122_s26 + $0x358] sm:$0xff] %v6369_v52  ;;  %7522 = vmatprep.mubr.f32.mxu0 %v14322_v55  ;;  %7971 = vmatprep.mubr.f32.mxu1 %v14322_v55 }
 0x54e   : > { %v5924_v57 = vpop.f32.mrb[100].mxu0  ;;  %v6373_v4 = vpop.f32.mrb[100].mxu1 }
 0x54f   : > { %6958 = vst [vmem:[%s13122_s26 + $0x360] sm:$0xff] %v5924_v57  ;;  %6960 = vst [vmem:[%s13122_s26 + $0x370] sm:$0xff] %v6373_v4  ;;  %v5926_v1 = vpop.f32.mrb[101].mxu0  ;;  %v6375_v60 = vpop.f32.mrb[101].mxu1  ;;  %9282 = vmatmul.mubr.msk.f32.gmra.mrb[206].mxu0 %vm1181_vm3, %v7122_v56  ;;  %9346 = vmatmul.mubr.msk.f32.gmra.mrb[206].mxu1 %vm1181_vm3, %v7122_v56  ;;  %v7135_v4 = vld [vmem:[%s14265_s13 + $0xe8] sm:$0xff] }
 0x550   : > { %6959 = vst [vmem:[%s13122_s26 + $0x368] sm:$0xff] %v5926_v1  ;;  %6961 = vst [vmem:[%s13122_s26 + $0x378] sm:$0xff] %v6375_v60  ;;  %7528 = vmatprep.mubr.f32.mxu0 %v14322_v55  ;;  %7977 = vmatprep.mubr.f32.mxu1 %v14322_v55 }
 0x552   : > { %v5930_v61 = vpop.f32.mrb[102].mxu0  ;;  %v6379_v11 = vpop.f32.mrb[102].mxu1 }
 0x553   : > { %6962 = vst [vmem:[%s13122_s26 + $0x380] sm:$0xff] %v5930_v61  ;;  %6964 = vst [vmem:[%s13122_s26 + $0x390] sm:$0xff] %v6379_v11  ;;  %v5932_v29 = vpop.f32.mrb[103].mxu0  ;;  %v6381_v6 = vpop.f32.mrb[103].mxu1  ;;  %9283 = vmatmul.mubr.msk.f32.gmra.mrb[208].mxu0 %vm1181_vm3, %v7123_v26  ;;  %9347 = vmatmul.mubr.msk.f32.gmra.mrb[208].mxu1 %vm1181_vm3, %v7123_v26  ;;  %v7136_v11 = vld [vmem:[%s14265_s13 + $0xf0] sm:$0xff] }
 0x554   : > { %6963 = vst [vmem:[%s13122_s26 + $0x388] sm:$0xff] %v5932_v29  ;;  %6965 = vst [vmem:[%s13122_s26 + $0x398] sm:$0xff] %v6381_v6  ;;  %7534 = vmatprep.mubr.f32.mxu0 %v14322_v55  ;;  %7983 = vmatprep.mubr.f32.mxu1 %v14322_v55 }
 0x556   : > { %v5936_v16 = vpop.f32.mrb[104].mxu0  ;;  %v6385_v17 = vpop.f32.mrb[104].mxu1 }
 0x557   : > { %6966 = vst [vmem:[%s13122_s26 + $0x3a0] sm:$0xff] %v5936_v16  ;;  %6968 = vst [vmem:[%s13122_s26 + $0x3b0] sm:$0xff] %v6385_v17  ;;  %v5938_v21 = vpop.f32.mrb[105].mxu0  ;;  %v6387_v22 = vpop.f32.mrb[105].mxu1  ;;  %9284 = vmatmul.mubr.msk.f32.gmra.mrb[210].mxu0 %vm1181_vm3, %v7124_v27  ;;  %9348 = vmatmul.mubr.msk.f32.gmra.mrb[210].mxu1 %vm1181_vm3, %v7124_v27  ;;  %v7137_v17 = vld [vmem:[%s14265_s13 + $0xf8] sm:$0xff] }
 0x558   : > { %6967 = vst [vmem:[%s13122_s26 + $0x3a8] sm:$0xff] %v5938_v21  ;;  %6969 = vst [vmem:[%s13122_s26 + $0x3b8] sm:$0xff] %v6387_v22  ;;  %7540 = vmatprep.mubr.f32.mxu0 %v14322_v55  ;;  %7989 = vmatprep.mubr.f32.mxu1 %v14322_v55 }
 0x55a   : > { %v5942_v30 = vpop.f32.mrb[106].mxu0  ;;  %v6391_v31 = vpop.f32.mrb[106].mxu1 }
 0x55b   : > { %6970 = vst [vmem:[%s13122_s26 + $0x3c0] sm:$0xff] %v5942_v30  ;;  %6972 = vst [vmem:[%s13122_s26 + $0x3d0] sm:$0xff] %v6391_v31  ;;  %v5944_v34 = vpop.f32.mrb[107].mxu0  ;;  %v6393_v35 = vpop.f32.mrb[107].mxu1  ;;  %9285 = vmatmul.mubr.msk.f32.gmra.mrb[212].mxu0 %vm1181_vm3, %v7125_v33  ;;  %9349 = vmatmul.mubr.msk.f32.gmra.mrb[212].mxu1 %vm1181_vm3, %v7125_v33  ;;  %v7138_v31 = vld [vmem:[%s14265_s13 + $0x100] sm:$0xff] }
 0x55c   : > { %6971 = vst [vmem:[%s13122_s26 + $0x3c8] sm:$0xff] %v5944_v34  ;;  %6973 = vst [vmem:[%s13122_s26 + $0x3d8] sm:$0xff] %v6393_v35  ;;  %7546 = vmatprep.mubr.f32.mxu0 %v14322_v55  ;;  %7995 = vmatprep.mubr.f32.mxu1 %v14322_v55 }
 0x55e   : > { %v5948_v37 = vpop.f32.mrb[108].mxu0  ;;  %v6397_v38 = vpop.f32.mrb[108].mxu1 }
 0x55f   : > { %6974 = vst [vmem:[%s13122_s26 + $0x3e0] sm:$0xff] %v5948_v37  ;;  %6976 = vst [vmem:[%s13122_s26 + $0x3f0] sm:$0xff] %v6397_v38  ;;  %v5950_v44 = vpop.f32.mrb[109].mxu0  ;;  %v6399_v45 = vpop.f32.mrb[109].mxu1  ;;  %9286 = vmatmul.mubr.msk.f32.gmra.mrb[214].mxu0 %vm1181_vm3, %v7126_v36  ;;  %9350 = vmatmul.mubr.msk.f32.gmra.mrb[214].mxu1 %vm1181_vm3, %v7126_v36  ;;  %v7139_v38 = vld [vmem:[%s14265_s13 + $0x108] sm:$0xff] }
 0x560   : > { %6975 = vst [vmem:[%s13122_s26 + $0x3e8] sm:$0xff] %v5950_v44  ;;  %6977 = vst [vmem:[%s13122_s26 + $0x3f8] sm:$0xff] %v6399_v45  ;;  %7552 = vmatprep.mubr.f32.mxu0 %v14322_v55  ;;  %8001 = vmatprep.mubr.f32.mxu1 %v14322_v55 }
 0x562   : > { %v5954_v40 = vpop.f32.mrb[110].mxu0  ;;  %v6403_v39 = vpop.f32.mrb[110].mxu1 }
 0x563   : > { %6978 = vst [vmem:[%s13122_s26 + $0x400] sm:$0xff] %v5954_v40  ;;  %6980 = vst [vmem:[%s13122_s26 + $0x410] sm:$0xff] %v6403_v39  ;;  %v5956_v41 = vpop.f32.mrb[111].mxu0  ;;  %v6405_v48 = vpop.f32.mrb[111].mxu1  ;;  %9287 = vmatmul.mubr.msk.f32.gmra.mrb[216].mxu0 %vm1181_vm3, %v7127_v47  ;;  %9351 = vmatmul.mubr.msk.f32.gmra.mrb[216].mxu1 %vm1181_vm3, %v7127_v47  ;;  %v7140_v39 = vld [vmem:[%s14265_s13 + $0x110] sm:$0xff] }
 0x564   : > { %6979 = vst [vmem:[%s13122_s26 + $0x408] sm:$0xff] %v5956_v41  ;;  %6981 = vst [vmem:[%s13122_s26 + $0x418] sm:$0xff] %v6405_v48  ;;  %7558 = vmatprep.mubr.f32.mxu0 %v14322_v55  ;;  %8007 = vmatprep.mubr.f32.mxu1 %v14322_v55 }
 0x566   : > { %v5960_v50 = vpop.f32.mrb[112].mxu0  ;;  %v6409_v53 = vpop.f32.mrb[112].mxu1 }
 0x567   : > { %6982 = vst [vmem:[%s13122_s26 + $0x420] sm:$0xff] %v5960_v50  ;;  %6984 = vst [vmem:[%s13122_s26 + $0x430] sm:$0xff] %v6409_v53  ;;  %v5962_v54 = vpop.f32.mrb[113].mxu0  ;;  %v6411_v0 = vpop.f32.mrb[113].mxu1  ;;  %9288 = vmatmul.mubr.msk.f32.gmra.mrb[218].mxu0 %vm1181_vm3, %v7128_v49  ;;  %9352 = vmatmul.mubr.msk.f32.gmra.mrb[218].mxu1 %vm1181_vm3, %v7128_v49  ;;  %v7141_v53 = vld [vmem:[%s14265_s13 + $0x118] sm:$0xff] }
 0x568   : > { %6983 = vst [vmem:[%s13122_s26 + $0x428] sm:$0xff] %v5962_v54  ;;  %6985 = vst [vmem:[%s13122_s26 + $0x438] sm:$0xff] %v6411_v0  ;;  %7564 = vmatprep.mubr.f32.mxu0 %v14322_v55  ;;  %8013 = vmatprep.mubr.f32.mxu1 %v14322_v55 }
 0x56a   : > { %v5966_v18 = vpop.f32.mrb[114].mxu0  ;;  %v6415_v28 = vpop.f32.mrb[114].mxu1 }
 0x56b   : > { %6986 = vst [vmem:[%s13122_s26 + $0x440] sm:$0xff] %v5966_v18  ;;  %6988 = vst [vmem:[%s13122_s26 + $0x450] sm:$0xff] %v6415_v28  ;;  %v5968_v32 = vpop.f32.mrb[115].mxu0  ;;  %v6417_v42 = vpop.f32.mrb[115].mxu1  ;;  %9289 = vmatmul.mubr.msk.f32.gmra.mrb[220].mxu0 %vm1181_vm3, %v7129_v3  ;;  %9353 = vmatmul.mubr.msk.f32.gmra.mrb[220].mxu1 %vm1181_vm3, %v7129_v3  ;;  %v7142_v28 = vld [vmem:[%s14265_s13 + $0x120] sm:$0xff] }
 0x56c   : > { %6987 = vst [vmem:[%s13122_s26 + $0x448] sm:$0xff] %v5968_v32  ;;  %6989 = vst [vmem:[%s13122_s26 + $0x458] sm:$0xff] %v6417_v42  ;;  %7570 = vmatprep.mubr.f32.mxu0 %v14322_v55  ;;  %8019 = vmatprep.mubr.f32.mxu1 %v14322_v55 }
 0x56e   : > { %v5972_v62 = vpop.f32.mrb[116].mxu0  ;;  %v6421_v59 = vpop.f32.mrb[116].mxu1 }
 0x56f   : > { %6990 = vst [vmem:[%s13122_s26 + $0x460] sm:$0xff] %v5972_v62  ;;  %6992 = vst [vmem:[%s13122_s26 + $0x470] sm:$0xff] %v6421_v59  ;;  %v5974_v58 = vpop.f32.mrb[117].mxu0  ;;  %v6423_v14 = vpop.f32.mrb[117].mxu1  ;;  %9290 = vmatmul.mubr.msk.f32.gmra.mrb[222].mxu0 %vm1181_vm3, %v7130_v46  ;;  %9354 = vmatmul.mubr.msk.f32.gmra.mrb[222].mxu1 %vm1181_vm3, %v7130_v46  ;;  %v7143_v59 = vld [vmem:[%s14265_s13 + $0x128] sm:$0xff] }
 0x570   : > { %6991 = vst [vmem:[%s13122_s26 + $0x468] sm:$0xff] %v5974_v58  ;;  %6993 = vst [vmem:[%s13122_s26 + $0x478] sm:$0xff] %v6423_v14  ;;  %7576 = vmatprep.mubr.f32.mxu0 %v14322_v55  ;;  %8025 = vmatprep.mubr.f32.mxu1 %v14322_v55 }
 0x572   : > { %v5978_v5 = vpop.f32.mrb[118].mxu0  ;;  %v6427_v7 = vpop.f32.mrb[118].mxu1 }
 0x573   : > { %6994 = vst [vmem:[%s13122_s26 + $0x480] sm:$0xff] %v5978_v5  ;;  %6996 = vst [vmem:[%s13122_s26 + $0x490] sm:$0xff] %v6427_v7  ;;  %v5980_v8 = vpop.f32.mrb[119].mxu0  ;;  %v6429_v9 = vpop.f32.mrb[119].mxu1  ;;  %9291 = vmatmul.mubr.msk.f32.gmra.mrb[224].mxu0 %vm1181_vm3, %v7131_v2  ;;  %9355 = vmatmul.mubr.msk.f32.gmra.mrb[224].mxu1 %vm1181_vm3, %v7131_v2  ;;  %v7144_v7 = vld [vmem:[%s14265_s13 + $0x130] sm:$0xff] }
 0x574   : > { %6995 = vst [vmem:[%s13122_s26 + $0x488] sm:$0xff] %v5980_v8  ;;  %6997 = vst [vmem:[%s13122_s26 + $0x498] sm:$0xff] %v6429_v9  ;;  %7582 = vmatprep.mubr.f32.mxu0 %v14322_v55  ;;  %8031 = vmatprep.mubr.f32.mxu1 %v14322_v55 }
 0x576   : > { %v5984_v13 = vpop.f32.mrb[120].mxu0  ;;  %v6433_v15 = vpop.f32.mrb[120].mxu1 }
 0x577   : > { %6998 = vst [vmem:[%s13122_s26 + $0x4a0] sm:$0xff] %v5984_v13  ;;  %7000 = vst [vmem:[%s13122_s26 + $0x4b0] sm:$0xff] %v6433_v15  ;;  %v5986_v19 = vpop.f32.mrb[121].mxu0  ;;  %v6435_v20 = vpop.f32.mrb[121].mxu1  ;;  %9292 = vmatmul.mubr.msk.f32.gmra.mrb[226].mxu0 %vm1181_vm3, %v7132_v10  ;;  %9356 = vmatmul.mubr.msk.f32.gmra.mrb[226].mxu1 %vm1181_vm3, %v7132_v10  ;;  %v7145_v15 = vld [vmem:[%s14265_s13 + $0x138] sm:$0xff] }
 0x578   : > { %6999 = vst [vmem:[%s13122_s26 + $0x4a8] sm:$0xff] %v5986_v19  ;;  %7001 = vst [vmem:[%s13122_s26 + $0x4b8] sm:$0xff] %v6435_v20  ;;  %7588 = vmatprep.mubr.f32.mxu0 %v14322_v55  ;;  %8037 = vmatprep.mubr.f32.mxu1 %v14322_v55 }
 0x57a   : > { %v5990_v24 = vpop.f32.mrb[122].mxu0  ;;  %v6439_v25 = vpop.f32.mrb[122].mxu1 }
 0x57b   : > { %7002 = vst [vmem:[%s13122_s26 + $0x4c0] sm:$0xff] %v5990_v24  ;;  %7004 = vst [vmem:[%s13122_s26 + $0x4d0] sm:$0xff] %v6439_v25  ;;  %v5992_v12 = vpop.f32.mrb[123].mxu0  ;;  %v6441_v43 = vpop.f32.mrb[123].mxu1  ;;  %9293 = vmatmul.mubr.msk.f32.gmra.mrb[228].mxu0 %vm1181_vm3, %v7133_v23  ;;  %9357 = vmatmul.mubr.msk.f32.gmra.mrb[228].mxu1 %vm1181_vm3, %v7133_v23  ;;  %v7146_v25 = vld [vmem:[%s14265_s13 + $0x140] sm:$0xff] }
 0x57c   : > { %7003 = vst [vmem:[%s13122_s26 + $0x4c8] sm:$0xff] %v5992_v12  ;;  %7005 = vst [vmem:[%s13122_s26 + $0x4d8] sm:$0xff] %v6441_v43  ;;  %7594 = vmatprep.mubr.f32.mxu0 %v14322_v55  ;;  %8043 = vmatprep.mubr.f32.mxu1 %v14322_v55 }
 0x57e   : > { %v5996_v51 = vpop.f32.mrb[124].mxu0  ;;  %v6445_v52 = vpop.f32.mrb[124].mxu1 }
 0x57f   : > { %7006 = vst [vmem:[%s13122_s26 + $0x4e0] sm:$0xff] %v5996_v51  ;;  %7008 = vst [vmem:[%s13122_s26 + $0x4f0] sm:$0xff] %v6445_v52  ;;  %v5998_v56 = vpop.f32.mrb[125].mxu0  ;;  %v6447_v57 = vpop.f32.mrb[125].mxu1  ;;  %9294 = vmatmul.mubr.msk.f32.gmra.mrb[230].mxu0 %vm1181_vm3, %v7134_v63  ;;  %9358 = vmatmul.mubr.msk.f32.gmra.mrb[230].mxu1 %vm1181_vm3, %v7134_v63  ;;  %v7147_v52 = vld [vmem:[%s14265_s13 + $0x148] sm:$0xff] }
 0x580   : > { %7007 = vst [vmem:[%s13122_s26 + $0x4e8] sm:$0xff] %v5998_v56  ;;  %7009 = vst [vmem:[%s13122_s26 + $0x4f8] sm:$0xff] %v6447_v57  ;;  %7600 = vmatprep.mubr.f32.mxu0 %v14322_v55  ;;  %8049 = vmatprep.mubr.f32.mxu1 %v14322_v55 }
 0x582   : > { %v6002_v1 = vpop.f32.mrb[126].mxu0  ;;  %v6451_v60 = vpop.f32.mrb[126].mxu1 }
 0x583   : > { %7010 = vst [vmem:[%s13122_s26 + $0x500] sm:$0xff] %v6002_v1  ;;  %7012 = vst [vmem:[%s13122_s26 + $0x510] sm:$0xff] %v6451_v60  ;;  %v6004_v26 = vpop.f32.mrb[127].mxu0  ;;  %v6453_v61 = vpop.f32.mrb[127].mxu1  ;;  %9295 = vmatmul.mubr.msk.f32.gmra.mrb[232].mxu0 %vm1181_vm3, %v7135_v4  ;;  %9359 = vmatmul.mubr.msk.f32.gmra.mrb[232].mxu1 %vm1181_vm3, %v7135_v4  ;;  %v7148_v60 = vld [vmem:[%s14265_s13 + $0x150] sm:$0xff] }
 0x584   : > { %7011 = vst [vmem:[%s13122_s26 + $0x508] sm:$0xff] %v6004_v26  ;;  %7013 = vst [vmem:[%s13122_s26 + $0x518] sm:$0xff] %v6453_v61  ;;  %7606 = vmatprep.mubr.f32.mxu0 %v14322_v55  ;;  %8055 = vmatprep.mubr.f32.mxu1 %v14322_v55 }
 0x586   : > { %v6008_v29 = vpop.f32.mrb[128].mxu0  ;;  %v6457_v6 = vpop.f32.mrb[128].mxu1 }
 0x587   : > { %7014 = vst [vmem:[%s13122_s26 + $0x520] sm:$0xff] %v6008_v29  ;;  %7016 = vst [vmem:[%s13122_s26 + $0x530] sm:$0xff] %v6457_v6  ;;  %v6010_v27 = vpop.f32.mrb[129].mxu0  ;;  %v6459_v16 = vpop.f32.mrb[129].mxu1  ;;  %9296 = vmatmul.mubr.msk.f32.gmra.mrb[234].mxu0 %vm1181_vm3, %v7136_v11  ;;  %9360 = vmatmul.mubr.msk.f32.gmra.mrb[234].mxu1 %vm1181_vm3, %v7136_v11  ;;  %v7149_v6 = vld [vmem:[%s14265_s13 + $0x158] sm:$0xff] }
 0x588   : > { %7015 = vst [vmem:[%s13122_s26 + $0x528] sm:$0xff] %v6010_v27  ;;  %7017 = vst [vmem:[%s13122_s26 + $0x538] sm:$0xff] %v6459_v16  ;;  %7612 = vmatprep.mubr.f32.mxu0 %v14322_v55  ;;  %8061 = vmatprep.mubr.f32.mxu1 %v14322_v55 }
 0x58a   : > { %v6014_v21 = vpop.f32.mrb[130].mxu0  ;;  %v6463_v22 = vpop.f32.mrb[130].mxu1 }
 0x58b   : > { %7018 = vst [vmem:[%s13122_s26 + $0x540] sm:$0xff] %v6014_v21  ;;  %7020 = vst [vmem:[%s13122_s26 + $0x550] sm:$0xff] %v6463_v22  ;;  %v6016_v33 = vpop.f32.mrb[131].mxu0  ;;  %v6465_v30 = vpop.f32.mrb[131].mxu1  ;;  %9297 = vmatmul.mubr.msk.f32.gmra.mrb[236].mxu0 %vm1181_vm3, %v7137_v17  ;;  %9361 = vmatmul.mubr.msk.f32.gmra.mrb[236].mxu1 %vm1181_vm3, %v7137_v17  ;;  %v7150_v22 = vld [vmem:[%s14265_s13 + $0x160] sm:$0xff] }
 0x58c   : > { %7019 = vst [vmem:[%s13122_s26 + $0x548] sm:$0xff] %v6016_v33  ;;  %7021 = vst [vmem:[%s13122_s26 + $0x558] sm:$0xff] %v6465_v30  ;;  %7618 = vmatprep.mubr.f32.mxu0 %v14322_v55  ;;  %8067 = vmatprep.mubr.f32.mxu1 %v14322_v55 }
 0x58e   : > { %v6020_v34 = vpop.f32.mrb[132].mxu0  ;;  %v6469_v35 = vpop.f32.mrb[132].mxu1 }
 0x58f   : > { %7022 = vst [vmem:[%s13122_s26 + $0x560] sm:$0xff] %v6020_v34  ;;  %7024 = vst [vmem:[%s13122_s26 + $0x570] sm:$0xff] %v6469_v35  ;;  %v6022_v36 = vpop.f32.mrb[133].mxu0  ;;  %v6471_v37 = vpop.f32.mrb[133].mxu1  ;;  %9298 = vmatmul.mubr.msk.f32.gmra.mrb[238].mxu0 %vm1181_vm3, %v7138_v31  ;;  %9362 = vmatmul.mubr.msk.f32.gmra.mrb[238].mxu1 %vm1181_vm3, %v7138_v31  ;;  %v7151_v35 = vld [vmem:[%s14265_s13 + $0x168] sm:$0xff] }
 0x590   : > { %7023 = vst [vmem:[%s13122_s26 + $0x568] sm:$0xff] %v6022_v36  ;;  %7025 = vst [vmem:[%s13122_s26 + $0x578] sm:$0xff] %v6471_v37  ;;  %7624 = vmatprep.mubr.f32.mxu0 %v14322_v55  ;;  %8073 = vmatprep.mubr.f32.mxu1 %v14322_v55 }
 0x592   : > { %v6026_v44 = vpop.f32.mrb[134].mxu0  ;;  %v6475_v45 = vpop.f32.mrb[134].mxu1 }
 0x593   : > { %7026 = vst [vmem:[%s13122_s26 + $0x580] sm:$0xff] %v6026_v44  ;;  %7028 = vst [vmem:[%s13122_s26 + $0x590] sm:$0xff] %v6475_v45  ;;  %v6028_v47 = vpop.f32.mrb[135].mxu0  ;;  %v6477_v40 = vpop.f32.mrb[135].mxu1  ;;  %9299 = vmatmul.mubr.msk.f32.gmra.mrb[240].mxu0 %vm1181_vm3, %v7139_v38  ;;  %9363 = vmatmul.mubr.msk.f32.gmra.mrb[240].mxu1 %vm1181_vm3, %v7139_v38  ;;  %v7152_v45 = vld [vmem:[%s14265_s13 + $0x170] sm:$0xff] }
 0x594   : > { %7027 = vst [vmem:[%s13122_s26 + $0x588] sm:$0xff] %v6028_v47  ;;  %7029 = vst [vmem:[%s13122_s26 + $0x598] sm:$0xff] %v6477_v40  ;;  %7630 = vmatprep.mubr.f32.mxu0 %v14322_v55  ;;  %8079 = vmatprep.mubr.f32.mxu1 %v14322_v55 }
 0x596   : > { %v6032_v41 = vpop.f32.mrb[136].mxu0  ;;  %v6481_v48 = vpop.f32.mrb[136].mxu1 }
 0x597   : > { %7030 = vst [vmem:[%s13122_s26 + $0x5a0] sm:$0xff] %v6032_v41  ;;  %7032 = vst [vmem:[%s13122_s26 + $0x5b0] sm:$0xff] %v6481_v48  ;;  %v6034_v49 = vpop.f32.mrb[137].mxu0  ;;  %v6483_v50 = vpop.f32.mrb[137].mxu1  ;;  %9300 = vmatmul.mubr.msk.f32.gmra.mrb[242].mxu0 %vm1181_vm3, %v7140_v39  ;;  %9364 = vmatmul.mubr.msk.f32.gmra.mrb[242].mxu1 %vm1181_vm3, %v7140_v39  ;;  %v7153_v48 = vld [vmem:[%s14265_s13 + $0x178] sm:$0xff] }
 0x598   : > { %7031 = vst [vmem:[%s13122_s26 + $0x5a8] sm:$0xff] %v6034_v49  ;;  %7033 = vst [vmem:[%s13122_s26 + $0x5b8] sm:$0xff] %v6483_v50  ;;  %7636 = vmatprep.mubr.f32.mxu0 %v14322_v55  ;;  %8085 = vmatprep.mubr.f32.mxu1 %v14322_v55 }
 0x59a   : > { %v6038_v54 = vpop.f32.mrb[138].mxu0  ;;  %v6487_v0 = vpop.f32.mrb[138].mxu1 }
 0x59b   : > { %7034 = vst [vmem:[%s13122_s26 + $0x5c0] sm:$0xff] %v6038_v54  ;;  %7036 = vst [vmem:[%s13122_s26 + $0x5d0] sm:$0xff] %v6487_v0  ;;  %v6040_v3 = vpop.f32.mrb[139].mxu0  ;;  %v6489_v18 = vpop.f32.mrb[139].mxu1  ;;  %9301 = vmatmul.mubr.msk.f32.gmra.mrb[244].mxu0 %vm1181_vm3, %v7141_v53  ;;  %9365 = vmatmul.mubr.msk.f32.gmra.mrb[244].mxu1 %vm1181_vm3, %v7141_v53  ;;  %v7154_v0 = vld [vmem:[%s14265_s13 + $0x180] sm:$0xff] }
 0x59c   : > { %7035 = vst [vmem:[%s13122_s26 + $0x5c8] sm:$0xff] %v6040_v3  ;;  %7037 = vst [vmem:[%s13122_s26 + $0x5d8] sm:$0xff] %v6489_v18  ;;  %7642 = vmatprep.mubr.f32.mxu0 %v14322_v55  ;;  %8091 = vmatprep.mubr.f32.mxu1 %v14322_v55 }
 0x59e   : > { %v6044_v32 = vpop.f32.mrb[140].mxu0  ;;  %v6493_v42 = vpop.f32.mrb[140].mxu1 }
 0x59f   : > { %7038 = vst [vmem:[%s13122_s26 + $0x5e0] sm:$0xff] %v6044_v32  ;;  %7040 = vst [vmem:[%s13122_s26 + $0x5f0] sm:$0xff] %v6493_v42  ;;  %v6046_v46 = vpop.f32.mrb[141].mxu0  ;;  %v6495_v62 = vpop.f32.mrb[141].mxu1  ;;  %9302 = vmatmul.mubr.msk.f32.gmra.mrb[246].mxu0 %vm1181_vm3, %v7142_v28  ;;  %9366 = vmatmul.mubr.msk.f32.gmra.mrb[246].mxu1 %vm1181_vm3, %v7142_v28  ;;  %v7155_v42 = vld [vmem:[%s14265_s13 + $0x188] sm:$0xff] }
 0x5a0   : > { %7039 = vst [vmem:[%s13122_s26 + $0x5e8] sm:$0xff] %v6046_v46  ;;  %7041 = vst [vmem:[%s13122_s26 + $0x5f8] sm:$0xff] %v6495_v62  ;;  %7648 = vmatprep.mubr.f32.mxu0 %v14322_v55  ;;  %8097 = vmatprep.mubr.f32.mxu1 %v14322_v55 }
 0x5a2   : > { %v6050_v58 = vpop.f32.mrb[142].mxu0  ;;  %v6499_v14 = vpop.f32.mrb[142].mxu1 }
 0x5a3   : > { %7042 = vst [vmem:[%s13122_s26 + $0x600] sm:$0xff] %v6050_v58  ;;  %7044 = vst [vmem:[%s13122_s26 + $0x610] sm:$0xff] %v6499_v14  ;;  %v6052_v2 = vpop.f32.mrb[143].mxu0  ;;  %v6501_v5 = vpop.f32.mrb[143].mxu1  ;;  %9303 = vmatmul.mubr.msk.f32.gmra.mrb[248].mxu0 %vm1181_vm3, %v7143_v59  ;;  %9367 = vmatmul.mubr.msk.f32.gmra.mrb[248].mxu1 %vm1181_vm3, %v7143_v59  ;;  %v7156_v14 = vld [vmem:[%s14265_s13 + $0x190] sm:$0xff] }
 0x5a4   : > { %7043 = vst [vmem:[%s13122_s26 + $0x608] sm:$0xff] %v6052_v2  ;;  %7045 = vst [vmem:[%s13122_s26 + $0x618] sm:$0xff] %v6501_v5  ;;  %7654 = vmatprep.mubr.f32.mxu0 %v14322_v55  ;;  %8103 = vmatprep.mubr.f32.mxu1 %v14322_v55 }
 0x5a6   : > { %v6056_v8 = vpop.f32.mrb[144].mxu0  ;;  %v6505_v9 = vpop.f32.mrb[144].mxu1 }
 0x5a7   : > { %7046 = vst [vmem:[%s13122_s26 + $0x620] sm:$0xff] %v6056_v8  ;;  %7048 = vst [vmem:[%s13122_s26 + $0x630] sm:$0xff] %v6505_v9  ;;  %v6058_v10 = vpop.f32.mrb[145].mxu0  ;;  %v6507_v13 = vpop.f32.mrb[145].mxu1  ;;  %9304 = vmatmul.mubr.msk.f32.gmra.mrb[250].mxu0 %vm1181_vm3, %v7144_v7  ;;  %9368 = vmatmul.mubr.msk.f32.gmra.mrb[250].mxu1 %vm1181_vm3, %v7144_v7  ;;  %v7157_v9 = vld [vmem:[%s14265_s13 + $0x198] sm:$0xff] }
 0x5a8   : > { %7047 = vst [vmem:[%s13122_s26 + $0x628] sm:$0xff] %v6058_v10  ;;  %7049 = vst [vmem:[%s13122_s26 + $0x638] sm:$0xff] %v6507_v13  ;;  %7660 = vmatprep.mubr.f32.mxu0 %v14322_v55  ;;  %8109 = vmatprep.mubr.f32.mxu1 %v14322_v55 }
 0x5aa   : > { %v6062_v19 = vpop.f32.mrb[146].mxu0  ;;  %v6511_v20 = vpop.f32.mrb[146].mxu1 }
 0x5ab   : > { %7050 = vst [vmem:[%s13122_s26 + $0x640] sm:$0xff] %v6062_v19  ;;  %7052 = vst [vmem:[%s13122_s26 + $0x650] sm:$0xff] %v6511_v20  ;;  %v6064_v23 = vpop.f32.mrb[147].mxu0  ;;  %v6513_v24 = vpop.f32.mrb[147].mxu1  ;;  %9305 = vmatmul.mubr.msk.f32.gmra.mrb[252].mxu0 %vm1181_vm3, %v7145_v15  ;;  %9369 = vmatmul.mubr.msk.f32.gmra.mrb[252].mxu1 %vm1181_vm3, %v7145_v15  ;;  %v7158_v20 = vld [vmem:[%s14265_s13 + $0x1a0] sm:$0xff] }
 0x5ac   : > { %7051 = vst [vmem:[%s13122_s26 + $0x648] sm:$0xff] %v6064_v23  ;;  %7053 = vst [vmem:[%s13122_s26 + $0x658] sm:$0xff] %v6513_v24  ;;  %7666 = vmatprep.mubr.f32.mxu0 %v14322_v55  ;;  %8115 = vmatprep.mubr.f32.mxu1 %v14322_v55 }
 0x5ae   : > { %v6068_v12 = vpop.f32.mrb[148].mxu0  ;;  %v6517_v43 = vpop.f32.mrb[148].mxu1 }
 0x5af   : > { %7054 = vst [vmem:[%s13122_s26 + $0x660] sm:$0xff] %v6068_v12  ;;  %7056 = vst [vmem:[%s13122_s26 + $0x670] sm:$0xff] %v6517_v43  ;;  %v6070_v63 = vpop.f32.mrb[149].mxu0  ;;  %v6519_v51 = vpop.f32.mrb[149].mxu1  ;;  %9306 = vmatmul.mubr.msk.f32.gmra.mrb[254].mxu0 %vm1181_vm3, %v7146_v25  ;;  %9370 = vmatmul.mubr.msk.f32.gmra.mrb[254].mxu1 %vm1181_vm3, %v7146_v25  ;;  %v7159_v43 = vld [vmem:[%s14265_s13 + $0x1a8] sm:$0xff] }
 0x5b0   : > { %7055 = vst [vmem:[%s13122_s26 + $0x668] sm:$0xff] %v6070_v63  ;;  %7057 = vst [vmem:[%s13122_s26 + $0x678] sm:$0xff] %v6519_v51  ;;  %7672 = vmatprep.mubr.f32.mxu0 %v14322_v55  ;;  %8121 = vmatprep.mubr.f32.mxu1 %v14322_v55 }
 0x5b2   : > { %v6074_v56 = vpop.f32.mrb[150].mxu0  ;;  %v6523_v57 = vpop.f32.mrb[150].mxu1 }
 0x5b3   : > { %7058 = vst [vmem:[%s13122_s26 + $0x680] sm:$0xff] %v6074_v56  ;;  %7060 = vst [vmem:[%s13122_s26 + $0x690] sm:$0xff] %v6523_v57  ;;  %v6076_v4 = vpop.f32.mrb[151].mxu0  ;;  %v6525_v1 = vpop.f32.mrb[151].mxu1  ;;  %9307 = vmatmul.mubr.msk.f32.gmra.mrb[0].mxu0 %vm1181_vm3, %v7147_v52  ;;  %9371 = vmatmul.mubr.msk.f32.gmra.mrb[0].mxu1 %vm1181_vm3, %v7147_v52  ;;  %v7160_v57 = vld [vmem:[%s14265_s13 + $0x1b0] sm:$0xff] }
 0x5b4   : > { %7059 = vst [vmem:[%s13122_s26 + $0x688] sm:$0xff] %v6076_v4  ;;  %7061 = vst [vmem:[%s13122_s26 + $0x698] sm:$0xff] %v6525_v1  ;;  %7678 = vmatprep.mubr.f32.mxu0 %v14322_v55  ;;  %8127 = vmatprep.mubr.f32.mxu1 %v14322_v55 }
 0x5b6   : > { %v6080_v26 = vpop.f32.mrb[152].mxu0  ;;  %v6529_v61 = vpop.f32.mrb[152].mxu1 }
 0x5b7   : > { %7062 = vst [vmem:[%s13122_s26 + $0x6a0] sm:$0xff] %v6080_v26  ;;  %7064 = vst [vmem:[%s13122_s26 + $0x6b0] sm:$0xff] %v6529_v61  ;;  %v6082_v11 = vpop.f32.mrb[153].mxu0  ;;  %v6531_v29 = vpop.f32.mrb[153].mxu1  ;;  %9308 = vmatmul.mubr.msk.f32.gmra.mrb[2].mxu0 %vm1181_vm3, %v7148_v60  ;;  %9372 = vmatmul.mubr.msk.f32.gmra.mrb[2].mxu1 %vm1181_vm3, %v7148_v60  ;;  %v7161_v61 = vld [vmem:[%s14265_s13 + $0x1b8] sm:$0xff] }
 0x5b8   : > { %7063 = vst [vmem:[%s13122_s26 + $0x6a8] sm:$0xff] %v6082_v11  ;;  %7065 = vst [vmem:[%s13122_s26 + $0x6b8] sm:$0xff] %v6531_v29  ;;  %7684 = vmatprep.mubr.f32.mxu0 %v14322_v55  ;;  %8133 = vmatprep.mubr.f32.mxu1 %v14322_v55 }
 0x5ba   : > { %v6086_v27 = vpop.f32.mrb[154].mxu0  ;;  %v6535_v16 = vpop.f32.mrb[154].mxu1 }
 0x5bb   : > { %7066 = vst [vmem:[%s13122_s26 + $0x6c0] sm:$0xff] %v6086_v27  ;;  %7068 = vst [vmem:[%s13122_s26 + $0x6d0] sm:$0xff] %v6535_v16  ;;  %v6088_v17 = vpop.f32.mrb[155].mxu0  ;;  %v6537_v21 = vpop.f32.mrb[155].mxu1  ;;  %9309 = vmatmul.mubr.msk.f32.gmra.mrb[4].mxu0 %vm1181_vm3, %v7149_v6  ;;  %9373 = vmatmul.mubr.msk.f32.gmra.mrb[4].mxu1 %vm1181_vm3, %v7149_v6  ;;  %v7162_v16 = vld [vmem:[%s14265_s13 + $0x1c0] sm:$0xff] }
 0x5bc   : > { %7067 = vst [vmem:[%s13122_s26 + $0x6c8] sm:$0xff] %v6088_v17  ;;  %7069 = vst [vmem:[%s13122_s26 + $0x6d8] sm:$0xff] %v6537_v21  ;;  %7690 = vmatprep.mubr.f32.mxu0 %v14322_v55  ;;  %8139 = vmatprep.mubr.f32.mxu1 %v14322_v55 }
 0x5be   : > { %v6092_v33 = vpop.f32.mrb[156].mxu0  ;;  %v6541_v30 = vpop.f32.mrb[156].mxu1 }
 0x5bf   : > { %7070 = vst [vmem:[%s13122_s26 + $0x6e0] sm:$0xff] %v6092_v33  ;;  %7072 = vst [vmem:[%s13122_s26 + $0x6f0] sm:$0xff] %v6541_v30  ;;  %v6094_v31 = vpop.f32.mrb[157].mxu0  ;;  %v6543_v34 = vpop.f32.mrb[157].mxu1  ;;  %9310 = vmatmul.mubr.msk.f32.gmra.mrb[6].mxu0 %vm1181_vm3, %v7150_v22  ;;  %9374 = vmatmul.mubr.msk.f32.gmra.mrb[6].mxu1 %vm1181_vm3, %v7150_v22  ;;  %v7163_v30 = vld [vmem:[%s14265_s13 + $0x1c8] sm:$0xff] }
 0x5c0   : > { %7071 = vst [vmem:[%s13122_s26 + $0x6e8] sm:$0xff] %v6094_v31  ;;  %7073 = vst [vmem:[%s13122_s26 + $0x6f8] sm:$0xff] %v6543_v34  ;;  %7696 = vmatprep.mubr.f32.mxu0 %v14322_v55  ;;  %8145 = vmatprep.mubr.f32.mxu1 %v14322_v55 }
 0x5c2   : > { %v6098_v36 = vpop.f32.mrb[158].mxu0  ;;  %v6547_v37 = vpop.f32.mrb[158].mxu1 }
 0x5c3   : > { %7074 = vst [vmem:[%s13122_s26 + $0x700] sm:$0xff] %v6098_v36  ;;  %7076 = vst [vmem:[%s13122_s26 + $0x710] sm:$0xff] %v6547_v37  ;;  %v6100_v38 = vpop.f32.mrb[159].mxu0  ;;  %v6549_v44 = vpop.f32.mrb[159].mxu1  ;;  %9311 = vmatmul.mubr.msk.f32.gmra.mrb[8].mxu0 %vm1181_vm3, %v7151_v35  ;;  %9375 = vmatmul.mubr.msk.f32.gmra.mrb[8].mxu1 %vm1181_vm3, %v7151_v35  ;;  %v7164_v37 = vld [vmem:[%s14265_s13 + $0x1d0] sm:$0xff] }
 0x5c4   : > { %7075 = vst [vmem:[%s13122_s26 + $0x708] sm:$0xff] %v6100_v38  ;;  %7077 = vst [vmem:[%s13122_s26 + $0x718] sm:$0xff] %v6549_v44  ;;  %7702 = vmatprep.mubr.f32.mxu0 %v14322_v55  ;;  %8151 = vmatprep.mubr.f32.mxu1 %v14322_v55 }
 0x5c6   : > { %v6104_v47 = vpop.f32.mrb[160].mxu0  ;;  %v6553_v40 = vpop.f32.mrb[160].mxu1 }
 0x5c7   : > { %7078 = vst [vmem:[%s13122_s26 + $0x720] sm:$0xff] %v6104_v47  ;;  %7080 = vst [vmem:[%s13122_s26 + $0x730] sm:$0xff] %v6553_v40  ;;  %v6106_v39 = vpop.f32.mrb[161].mxu0  ;;  %v6555_v41 = vpop.f32.mrb[161].mxu1  ;;  %9312 = vmatmul.mubr.msk.f32.gmra.mrb[10].mxu0 %vm1181_vm3, %v7152_v45  ;;  %9376 = vmatmul.mubr.msk.f32.gmra.mrb[10].mxu1 %vm1181_vm3, %v7152_v45  ;;  %v7165_v40 = vld [vmem:[%s14265_s13 + $0x1d8] sm:$0xff] }
 0x5c8   : > { %7079 = vst [vmem:[%s13122_s26 + $0x728] sm:$0xff] %v6106_v39  ;;  %7081 = vst [vmem:[%s13122_s26 + $0x738] sm:$0xff] %v6555_v41  ;;  %7708 = vmatprep.mubr.f32.mxu0 %v14322_v55  ;;  %8157 = vmatprep.mubr.f32.mxu1 %v14322_v55 }
 0x5ca   : > { %v6110_v49 = vpop.f32.mrb[162].mxu0  ;;  %v6559_v50 = vpop.f32.mrb[162].mxu1 }
 0x5cb   : > { %7082 = vst [vmem:[%s13122_s26 + $0x740] sm:$0xff] %v6110_v49  ;;  %7084 = vst [vmem:[%s13122_s26 + $0x750] sm:$0xff] %v6559_v50  ;;  %v6112_v53 = vpop.f32.mrb[163].mxu0  ;;  %v6561_v54 = vpop.f32.mrb[163].mxu1  ;;  %9313 = vmatmul.mubr.msk.f32.gmra.mrb[12].mxu0 %vm1181_vm3, %v7153_v48  ;;  %9377 = vmatmul.mubr.msk.f32.gmra.mrb[12].mxu1 %vm1181_vm3, %v7153_v48  ;;  %v7166_v50 = vld [vmem:[%s14265_s13 + $0x1e0] sm:$0xff] }
 0x5cc   : > { %7083 = vst [vmem:[%s13122_s26 + $0x748] sm:$0xff] %v6112_v53  ;;  %7085 = vst [vmem:[%s13122_s26 + $0x758] sm:$0xff] %v6561_v54  ;;  %7714 = vmatprep.mubr.f32.mxu0 %v14322_v55  ;;  %8163 = vmatprep.mubr.f32.mxu1 %v14322_v55 }
 0x5ce   : > { %v6116_v3 = vpop.f32.mrb[164].mxu0  ;;  %v6565_v18 = vpop.f32.mrb[164].mxu1 }
 0x5cf   : > { %7086 = vst [vmem:[%s13122_s26 + $0x760] sm:$0xff] %v6116_v3  ;;  %7088 = vst [vmem:[%s13122_s26 + $0x770] sm:$0xff] %v6565_v18  ;;  %v6118_v28 = vpop.f32.mrb[165].mxu0  ;;  %v6567_v32 = vpop.f32.mrb[165].mxu1  ;;  %9314 = vmatmul.mubr.msk.f32.gmra.mrb[14].mxu0 %vm1181_vm3, %v7154_v0  ;;  %9378 = vmatmul.mubr.msk.f32.gmra.mrb[14].mxu1 %vm1181_vm3, %v7154_v0  ;;  %v7167_v18 = vld [vmem:[%s14265_s13 + $0x1e8] sm:$0xff] }
 0x5d0   : > { %7087 = vst [vmem:[%s13122_s26 + $0x768] sm:$0xff] %v6118_v28  ;;  %7089 = vst [vmem:[%s13122_s26 + $0x778] sm:$0xff] %v6567_v32  ;;  %7720 = vmatprep.mubr.f32.mxu0 %v14322_v55  ;;  %8169 = vmatprep.mubr.f32.mxu1 %v14322_v55 }
 0x5d2   : > { %v6122_v46 = vpop.f32.mrb[166].mxu0  ;;  %v6571_v62 = vpop.f32.mrb[166].mxu1 }
 0x5d3   : > { %7090 = vst [vmem:[%s13122_s26 + $0x780] sm:$0xff] %v6122_v46  ;;  %7092 = vst [vmem:[%s13122_s26 + $0x790] sm:$0xff] %v6571_v62  ;;  %v6124_v59 = vpop.f32.mrb[167].mxu0  ;;  %v6573_v58 = vpop.f32.mrb[167].mxu1  ;;  %9315 = vmatmul.mubr.msk.f32.gmra.mrb[16].mxu0 %vm1181_vm3, %v7155_v42  ;;  %9379 = vmatmul.mubr.msk.f32.gmra.mrb[16].mxu1 %vm1181_vm3, %v7155_v42  ;;  %v7168_v62 = vld [vmem:[%s14265_s13 + $0x1f0] sm:$0xff] }
 0x5d4   : > { %7091 = vst [vmem:[%s13122_s26 + $0x788] sm:$0xff] %v6124_v59  ;;  %7093 = vst [vmem:[%s13122_s26 + $0x798] sm:$0xff] %v6573_v58  ;;  %7726 = vmatprep.mubr.f32.mxu0 %v14322_v55  ;;  %8175 = vmatprep.mubr.f32.mxu1 %v14322_v55 }
 0x5d6   : > { %v6128_v2 = vpop.f32.mrb[168].mxu0  ;;  %v6577_v5 = vpop.f32.mrb[168].mxu1 }
 0x5d7   : > { %7094 = vst [vmem:[%s13122_s26 + $0x7a0] sm:$0xff] %v6128_v2  ;;  %7096 = vst [vmem:[%s13122_s26 + $0x7b0] sm:$0xff] %v6577_v5  ;;  %v6130_v7 = vpop.f32.mrb[169].mxu0  ;;  %v6579_v8 = vpop.f32.mrb[169].mxu1  ;;  %9316 = vmatmul.mubr.msk.f32.gmra.mrb[18].mxu0 %vm1181_vm3, %v7156_v14  ;;  %9380 = vmatmul.mubr.msk.f32.gmra.mrb[18].mxu1 %vm1181_vm3, %v7156_v14  ;;  %v7169_v5 = vld [vmem:[%s14265_s13 + $0x1f8] sm:$0xff] }
 0x5d8   : > { %7095 = vst [vmem:[%s13122_s26 + $0x7a8] sm:$0xff] %v6130_v7  ;;  %7097 = vst [vmem:[%s13122_s26 + $0x7b8] sm:$0xff] %v6579_v8  ;;  %7732 = vmatprep.mubr.f32.mxu0 %v14322_v55  ;;  %8181 = vmatprep.mubr.f32.mxu1 %v14322_v55 }
 0x5da   : > { %v6134_v10 = vpop.f32.mrb[170].mxu0  ;;  %v6583_v13 = vpop.f32.mrb[170].mxu1 }
 0x5db   : > { %7098 = vst [vmem:[%s13122_s26 + $0x7c0] sm:$0xff] %v6134_v10  ;;  %7100 = vst [vmem:[%s13122_s26 + $0x7d0] sm:$0xff] %v6583_v13  ;;  %v6136_v15 = vpop.f32.mrb[171].mxu0  ;;  %v6585_v19 = vpop.f32.mrb[171].mxu1  ;;  %9317 = vmatmul.mubr.msk.f32.gmra.mrb[20].mxu0 %vm1181_vm3, %v7157_v9  ;;  %9381 = vmatmul.mubr.msk.f32.gmra.mrb[20].mxu1 %vm1181_vm3, %v7157_v9 }
 0x5dc   : > { %7099 = vst [vmem:[%s13122_s26 + $0x7c8] sm:$0xff] %v6136_v15  ;;  %7101 = vst [vmem:[%s13122_s26 + $0x7d8] sm:$0xff] %v6585_v19  ;;  %7738 = vmatprep.mubr.f32.mxu0 %v14322_v55  ;;  %8187 = vmatprep.mubr.f32.mxu1 %v14322_v55 }
 0x5de   : > { %v6140_v23 = vpop.f32.mrb[172].mxu0  ;;  %v6589_v24 = vpop.f32.mrb[172].mxu1 }
 0x5df   : > { %7102 = vst [vmem:[%s13122_s26 + $0x7e0] sm:$0xff] %v6140_v23  ;;  %7104 = vst [vmem:[%s13122_s26 + $0x7f0] sm:$0xff] %v6589_v24  ;;  %v6142_v25 = vpop.f32.mrb[173].mxu0  ;;  %v6591_v12 = vpop.f32.mrb[173].mxu1  ;;  %9318 = vmatmul.mubr.msk.f32.gmra.mrb[22].mxu0 %vm1181_vm3, %v7158_v20  ;;  %9382 = vmatmul.mubr.msk.f32.gmra.mrb[22].mxu1 %vm1181_vm3, %v7158_v20 }
 0x5e0   : > { %7103 = vst [vmem:[%s13122_s26 + $0x7e8] sm:$0xff] %v6142_v25  ;;  %7105 = vst [vmem:[%s13122_s26 + $0x7f8] sm:$0xff] %v6591_v12  ;;  %7744 = vmatprep.mubr.f32.mxu0 %v14322_v55  ;;  %8193 = vmatprep.mubr.f32.mxu1 %v14322_v55  ;;  %s10496_s26 = smov [#allocation2]  }
 0x5e1   : > { %s10403_s8 = sshll.u32 %s10496_s26, 4  ;;  %s10404_s8 = int_to_ptr.vmem [resolvable:$false] %s10403_s8 }
 0x5e2   : > { %v7428_v63 = vpop.f32.mrb[174].mxu0  ;;  %v7877_v51 = vpop.f32.mrb[174].mxu1  ;;  %s10405_s20 = scalar_lea.vmem %s10404_s8, 65536  ;;  %p10406_p0 = scmp.lt.s32.totalorder %s14041_s16, %s10404_s8 }
 0x5e3   : > { %8260 = vst [vmem:[%s13830_s29] sm:$0xff] %v7428_v63  ;;  %8262 = vst [vmem:[%s13830_s29 + $0x10] sm:$0xff] %v7877_v51  ;;  %v7430_v52 = vpop.f32.mrb[175].mxu0  ;;  %9319 = vmatmul.mubr.msk.f32.gmra.mrb[24].mxu0 %vm1181_vm3, %v7159_v43  ;;  %v7879_v56 = vpop.f32.mrb[175].mxu1  ;;  %9383 = vmatmul.mubr.msk.f32.gmra.mrb[24].mxu1 %vm1181_vm3, %v7159_v43  ;;  %p10407_p1 = scmp.lt.s32.totalorder %s10405_s20, %s10399_s21 }
 0x5e4   : > { %8261 = vst [vmem:[%s13830_s29 + $0x8] sm:$0xff] %v7430_v52  ;;  %8263 = vst [vmem:[%s13830_s29 + $0x18] sm:$0xff] %v7879_v56  ;;  %7750 = vmatprep.mubr.f32.mxu0 %v14322_v55  ;;  %8199 = vmatprep.mubr.f32.mxu1 %v14322_v55 }
 0x5e5   : > { %p10408_p2 = por %p10407_p1, %p10406_p0 }
 0x5e6   : > { %v7434_v4 = vpop.f32.mrb[176].mxu0  ;;  %v7883_v1 = vpop.f32.mrb[176].mxu1 }
 0x5e7   : > { %8264 = vst [vmem:[%s13830_s29 + $0x20] sm:$0xff] %v7434_v4  ;;  %8266 = vst [vmem:[%s13830_s29 + $0x30] sm:$0xff] %v7883_v1  ;;  %v7436_v60 = vpop.f32.mrb[177].mxu0  ;;  %9320 = vmatmul.mubr.msk.f32.gmra.mrb[26].mxu0 %vm1181_vm3, %v7160_v57  ;;  %v7885_v26 = vpop.f32.mrb[177].mxu1  ;;  %9384 = vmatmul.mubr.msk.f32.gmra.mrb[26].mxu1 %vm1181_vm3, %v7160_v57  ;;  %p10409_p3 = pnand %p10408_p2, %p10402_p13 }
 0x5e8   : > { %8265 = vst [vmem:[%s13830_s29 + $0x28] sm:$0xff] %v7436_v60  ;;  %8267 = vst [vmem:[%s13830_s29 + $0x38] sm:$0xff] %v7885_v26  ;;  %7756 = vmatprep.mubr.f32.mxu0 %v14322_v55  ;;  %8205 = vmatprep.mubr.f32.mxu1 %v14322_v55 }
 0x5ea   : > { %v7440_v11 = vpop.f32.mrb[178].mxu0  ;;  %v7889_v29 = vpop.f32.mrb[178].mxu1 }
 0x5eb   : > { %8268 = vst [vmem:[%s13830_s29 + $0x40] sm:$0xff] %v7440_v11  ;;  %8270 = vst [vmem:[%s13830_s29 + $0x50] sm:$0xff] %v7889_v29  ;;  %v7442_v6 = vpop.f32.mrb[179].mxu0  ;;  %9321 = vmatmul.mubr.msk.f32.gmra.mrb[28].mxu0 %vm1181_vm3, %v7161_v61  ;;  %v7891_v27 = vpop.f32.mrb[179].mxu1  ;;  %9385 = vmatmul.mubr.msk.f32.gmra.mrb[28].mxu1 %vm1181_vm3, %v7161_v61 }
 0x5ec   : > { %8269 = vst [vmem:[%s13830_s29 + $0x48] sm:$0xff] %v7442_v6  ;;  %8271 = vst [vmem:[%s13830_s29 + $0x58] sm:$0xff] %v7891_v27  ;;  %7762 = vmatprep.mubr.f32.mxu0 %v14322_v55  ;;  %8211 = vmatprep.mubr.f32.mxu1 %v14322_v55 }
 0x5ee   : > { %v7446_v17 = vpop.f32.mrb[180].mxu0  ;;  %v7895_v21 = vpop.f32.mrb[180].mxu1 }
 0x5ef   : > { %8272 = vst [vmem:[%s13830_s29 + $0x60] sm:$0xff] %v7446_v17  ;;  %8274 = vst [vmem:[%s13830_s29 + $0x70] sm:$0xff] %v7895_v21  ;;  %v7448_v22 = vpop.f32.mrb[181].mxu0  ;;  %9322 = vmatmul.mubr.msk.f32.gmra.mrb[30].mxu0 %vm1181_vm3, %v7162_v16  ;;  %v7897_v33 = vpop.f32.mrb[181].mxu1  ;;  %9386 = vmatmul.mubr.msk.f32.gmra.mrb[30].mxu1 %vm1181_vm3, %v7162_v16 }
 0x5f0   : > { %8273 = vst [vmem:[%s13830_s29 + $0x68] sm:$0xff] %v7448_v22  ;;  %8275 = vst [vmem:[%s13830_s29 + $0x78] sm:$0xff] %v7897_v33  ;;  %7768 = vmatprep.mubr.f32.mxu0 %v14322_v55  ;;  %8217 = vmatprep.mubr.f32.mxu1 %v14322_v55 }
 0x5f2   : > { %v7452_v31 = vpop.f32.mrb[182].mxu0  ;;  %v7901_v34 = vpop.f32.mrb[182].mxu1 }
 0x5f3   : > { %8276 = vst [vmem:[%s13830_s29 + $0x80] sm:$0xff] %v7452_v31  ;;  %8278 = vst [vmem:[%s13830_s29 + $0x90] sm:$0xff] %v7901_v34  ;;  %v7454_v35 = vpop.f32.mrb[183].mxu0  ;;  %9323 = vmatmul.mubr.msk.f32.gmra.mrb[32].mxu0 %vm1181_vm3, %v7163_v30  ;;  %v7903_v36 = vpop.f32.mrb[183].mxu1  ;;  %9387 = vmatmul.mubr.msk.f32.gmra.mrb[32].mxu1 %vm1181_vm3, %v7163_v30 }
 0x5f4   : > { %8277 = vst [vmem:[%s13830_s29 + $0x88] sm:$0xff] %v7454_v35  ;;  %8279 = vst [vmem:[%s13830_s29 + $0x98] sm:$0xff] %v7903_v36  ;;  %7774 = vmatprep.mubr.f32.mxu0 %v14322_v55  ;;  %8223 = vmatprep.mubr.f32.mxu1 %v14322_v55 }
 0x5f6   : > { %v7458_v38 = vpop.f32.mrb[184].mxu0  ;;  %v7907_v44 = vpop.f32.mrb[184].mxu1 }
 0x5f7   : > { %8280 = vst [vmem:[%s13830_s29 + $0xa0] sm:$0xff] %v7458_v38  ;;  %8282 = vst [vmem:[%s13830_s29 + $0xb0] sm:$0xff] %v7907_v44  ;;  %v7460_v45 = vpop.f32.mrb[185].mxu0  ;;  %9324 = vmatmul.mubr.msk.f32.gmra.mrb[34].mxu0 %vm1181_vm3, %v7164_v37  ;;  %v7909_v47 = vpop.f32.mrb[185].mxu1  ;;  %9388 = vmatmul.mubr.msk.f32.gmra.mrb[34].mxu1 %vm1181_vm3, %v7164_v37 }
 0x5f8   : > { %8281 = vst [vmem:[%s13830_s29 + $0xa8] sm:$0xff] %v7460_v45  ;;  %8283 = vst [vmem:[%s13830_s29 + $0xb8] sm:$0xff] %v7909_v47  ;;  %7780 = vmatprep.mubr.f32.mxu0 %v14322_v55  ;;  %8229 = vmatprep.mubr.f32.mxu1 %v14322_v55 }
 0x5fa   : > { %v7464_v39 = vpop.f32.mrb[186].mxu0  ;;  %v7913_v41 = vpop.f32.mrb[186].mxu1 }
 0x5fb   : > { %8284 = vst [vmem:[%s13830_s29 + $0xc0] sm:$0xff] %v7464_v39  ;;  %8286 = vst [vmem:[%s13830_s29 + $0xd0] sm:$0xff] %v7913_v41  ;;  %v7466_v48 = vpop.f32.mrb[187].mxu0  ;;  %9325 = vmatmul.mubr.msk.f32.gmra.mrb[36].mxu0 %vm1181_vm3, %v7165_v40  ;;  %v7915_v49 = vpop.f32.mrb[187].mxu1  ;;  %9389 = vmatmul.mubr.msk.f32.gmra.mrb[36].mxu1 %vm1181_vm3, %v7165_v40 }
 0x5fc   : > { %8285 = vst [vmem:[%s13830_s29 + $0xc8] sm:$0xff] %v7466_v48  ;;  %8287 = vst [vmem:[%s13830_s29 + $0xd8] sm:$0xff] %v7915_v49  ;;  %7786 = vmatprep.mubr.f32.mxu0 %v14322_v55  ;;  %8235 = vmatprep.mubr.f32.mxu1 %v14322_v55 }
 0x5fe   : > { %v7470_v53 = vpop.f32.mrb[188].mxu0  ;;  %v7919_v54 = vpop.f32.mrb[188].mxu1 }
 0x5ff   : > { %8288 = vst [vmem:[%s13830_s29 + $0xe0] sm:$0xff] %v7470_v53  ;;  %8290 = vst [vmem:[%s13830_s29 + $0xf0] sm:$0xff] %v7919_v54  ;;  %v7472_v0 = vpop.f32.mrb[189].mxu0  ;;  %9326 = vmatmul.mubr.msk.f32.gmra.mrb[38].mxu0 %vm1181_vm3, %v7166_v50  ;;  %v7921_v3 = vpop.f32.mrb[189].mxu1  ;;  %9390 = vmatmul.mubr.msk.f32.gmra.mrb[38].mxu1 %vm1181_vm3, %v7166_v50 }
 0x600   : > { %8289 = vst [vmem:[%s13830_s29 + $0xe8] sm:$0xff] %v7472_v0  ;;  %8291 = vst [vmem:[%s13830_s29 + $0xf8] sm:$0xff] %v7921_v3  ;;  %7792 = vmatprep.mubr.f32.mxu0 %v14322_v55  ;;  %8241 = vmatprep.mubr.f32.mxu1 %v14322_v55 }
 0x602   : > { %v7476_v28 = vpop.f32.mrb[190].mxu0  ;;  %v7925_v32 = vpop.f32.mrb[190].mxu1 }
 0x603   : > { %8292 = vst [vmem:[%s13830_s29 + $0x100] sm:$0xff] %v7476_v28  ;;  %8294 = vst [vmem:[%s13830_s29 + $0x110] sm:$0xff] %v7925_v32  ;;  %v7478_v42 = vpop.f32.mrb[191].mxu0  ;;  %9327 = vmatmul.mubr.msk.f32.gmra.mrb[40].mxu0 %vm1181_vm3, %v7167_v18  ;;  %v7927_v46 = vpop.f32.mrb[191].mxu1  ;;  %9391 = vmatmul.mubr.msk.f32.gmra.mrb[40].mxu1 %vm1181_vm3, %v7167_v18 }
 0x604   : > { %8293 = vst [vmem:[%s13830_s29 + $0x108] sm:$0xff] %v7478_v42  ;;  %8295 = vst [vmem:[%s13830_s29 + $0x118] sm:$0xff] %v7927_v46  ;;  %7798 = vmatprep.mubr.f32.mxu0 %v14322_v55  ;;  %8247 = vmatprep.mubr.f32.mxu1 %v14322_v55 }
 0x606   : > { %v7482_v59 = vpop.f32.mrb[192].mxu0  ;;  %v7931_v58 = vpop.f32.mrb[192].mxu1 }
 0x607   : > { %8296 = vst [vmem:[%s13830_s29 + $0x120] sm:$0xff] %v7482_v59  ;;  %8298 = vst [vmem:[%s13830_s29 + $0x130] sm:$0xff] %v7931_v58  ;;  %v7484_v14 = vpop.f32.mrb[193].mxu0  ;;  %9328 = vmatmul.mubr.msk.f32.gmra.mrb[42].mxu0 %vm1181_vm3, %v7168_v62  ;;  %v7933_v2 = vpop.f32.mrb[193].mxu1  ;;  %9392 = vmatmul.mubr.msk.f32.gmra.mrb[42].mxu1 %vm1181_vm3, %v7168_v62 }
 0x608   : > { %8297 = vst [vmem:[%s13830_s29 + $0x128] sm:$0xff] %v7484_v14  ;;  %8299 = vst [vmem:[%s13830_s29 + $0x138] sm:$0xff] %v7933_v2  ;;  %7804 = vmatprep.mubr.f32.mxu0 %v14322_v55  ;;  %8253 = vmatprep.mubr.f32.mxu1 %v14322_v55 }
 0x60a   : > { %v7488_v7 = vpop.f32.mrb[194].mxu0  ;;  %v7937_v8 = vpop.f32.mrb[194].mxu1 }
 0x60b   : > { %8300 = vst [vmem:[%s13830_s29 + $0x140] sm:$0xff] %v7488_v7  ;;  %8302 = vst [vmem:[%s13830_s29 + $0x150] sm:$0xff] %v7937_v8  ;;  %v7490_v9 = vpop.f32.mrb[195].mxu0  ;;  %9329 = vmatmul.mubr.msk.f32.gmra.mrb[44].mxu0 %vm1181_vm3, %v7169_v5  ;;  %v7939_v10 = vpop.f32.mrb[195].mxu1  ;;  %9393 = vmatmul.mubr.msk.f32.gmra.mrb[44].mxu1 %vm1181_vm3, %v7169_v5 }
 0x60c   : > { %8301 = vst [vmem:[%s13830_s29 + $0x148] sm:$0xff] %v7490_v9  ;;  %8303 = vst [vmem:[%s13830_s29 + $0x158] sm:$0xff] %v7939_v10 }
 0x60e   : > { %v7494_v55 = vpop.f32.mrb[196].mxu0  ;;  %v7943_v13 = vpop.f32.mrb[196].mxu1 }
 0x60f   : > { %8304 = vst [vmem:[%s13830_s29 + $0x160] sm:$0xff] %v7494_v55  ;;  %8306 = vst [vmem:[%s13830_s29 + $0x170] sm:$0xff] %v7943_v13  ;;  %v7496_v15 = vpop.f32.mrb[197].mxu0  ;;  %v7945_v19 = vpop.f32.mrb[197].mxu1 }
 0x610   : > { %8305 = vst [vmem:[%s13830_s29 + $0x168] sm:$0xff] %v7496_v15  ;;  %8307 = vst [vmem:[%s13830_s29 + $0x178] sm:$0xff] %v7945_v19 }
 0x612   : > { %v7500_v20 = vpop.f32.mrb[198].mxu0  ;;  %v7949_v23 = vpop.f32.mrb[198].mxu1 }
 0x613   : > { %8308 = vst [vmem:[%s13830_s29 + $0x180] sm:$0xff] %v7500_v20  ;;  %8310 = vst [vmem:[%s13830_s29 + $0x190] sm:$0xff] %v7949_v23  ;;  %v7502_v24 = vpop.f32.mrb[199].mxu0  ;;  %v7951_v25 = vpop.f32.mrb[199].mxu1 }
 0x614   : > { %8309 = vst [vmem:[%s13830_s29 + $0x188] sm:$0xff] %v7502_v24  ;;  %8311 = vst [vmem:[%s13830_s29 + $0x198] sm:$0xff] %v7951_v25 }
 0x616   : > { %v7506_v12 = vpop.f32.mrb[200].mxu0  ;;  %v7955_v43 = vpop.f32.mrb[200].mxu1 }
 0x617   : > { %8312 = vst [vmem:[%s13830_s29 + $0x1a0] sm:$0xff] %v7506_v12  ;;  %8314 = vst [vmem:[%s13830_s29 + $0x1b0] sm:$0xff] %v7955_v43  ;;  %v7508_v63 = vpop.f32.mrb[201].mxu0  ;;  %v7957_v51 = vpop.f32.mrb[201].mxu1 }
 0x618   : > { %8313 = vst [vmem:[%s13830_s29 + $0x1a8] sm:$0xff] %v7508_v63  ;;  %8315 = vst [vmem:[%s13830_s29 + $0x1b8] sm:$0xff] %v7957_v51 }
 0x61a   : > { %v7512_v52 = vpop.f32.mrb[202].mxu0  ;;  %v7961_v56 = vpop.f32.mrb[202].mxu1 }
 0x61b   : > { %8316 = vst [vmem:[%s13830_s29 + $0x1c0] sm:$0xff] %v7512_v52  ;;  %8318 = vst [vmem:[%s13830_s29 + $0x1d0] sm:$0xff] %v7961_v56  ;;  %v7514_v57 = vpop.f32.mrb[203].mxu0  ;;  %v7963_v4 = vpop.f32.mrb[203].mxu1 }
 0x61c   : > { %8317 = vst [vmem:[%s13830_s29 + $0x1c8] sm:$0xff] %v7514_v57  ;;  %8319 = vst [vmem:[%s13830_s29 + $0x1d8] sm:$0xff] %v7963_v4 }
 0x61e   : > { %v7518_v1 = vpop.f32.mrb[204].mxu0  ;;  %v7967_v60 = vpop.f32.mrb[204].mxu1 }
 0x61f   : > { %8320 = vst [vmem:[%s13830_s29 + $0x1e0] sm:$0xff] %v7518_v1  ;;  %8322 = vst [vmem:[%s13830_s29 + $0x1f0] sm:$0xff] %v7967_v60  ;;  %v7520_v26 = vpop.f32.mrb[205].mxu0  ;;  %v7969_v61 = vpop.f32.mrb[205].mxu1 }
 0x620   : > { %8321 = vst [vmem:[%s13830_s29 + $0x1e8] sm:$0xff] %v7520_v26  ;;  %8323 = vst [vmem:[%s13830_s29 + $0x1f8] sm:$0xff] %v7969_v61 }
 0x622   : > { %v7524_v11 = vpop.f32.mrb[206].mxu0  ;;  %v7973_v29 = vpop.f32.mrb[206].mxu1 }
 0x623   : > { %8324 = vst [vmem:[%s13830_s29 + $0x200] sm:$0xff] %v7524_v11  ;;  %8326 = vst [vmem:[%s13830_s29 + $0x210] sm:$0xff] %v7973_v29  ;;  %v7526_v6 = vpop.f32.mrb[207].mxu0  ;;  %v7975_v27 = vpop.f32.mrb[207].mxu1 }
 0x624   : > { %8325 = vst [vmem:[%s13830_s29 + $0x208] sm:$0xff] %v7526_v6  ;;  %8327 = vst [vmem:[%s13830_s29 + $0x218] sm:$0xff] %v7975_v27 }
 0x626   : > { %v7530_v16 = vpop.f32.mrb[208].mxu0  ;;  %v7979_v17 = vpop.f32.mrb[208].mxu1 }
 0x627   : > { %8328 = vst [vmem:[%s13830_s29 + $0x220] sm:$0xff] %v7530_v16  ;;  %8330 = vst [vmem:[%s13830_s29 + $0x230] sm:$0xff] %v7979_v17  ;;  %v7532_v21 = vpop.f32.mrb[209].mxu0  ;;  %v7981_v22 = vpop.f32.mrb[209].mxu1 }
 0x628   : > { %8329 = vst [vmem:[%s13830_s29 + $0x228] sm:$0xff] %v7532_v21  ;;  %8331 = vst [vmem:[%s13830_s29 + $0x238] sm:$0xff] %v7981_v22 }
 0x62a   : > { %v7536_v33 = vpop.f32.mrb[210].mxu0  ;;  %v7985_v30 = vpop.f32.mrb[210].mxu1 }
 0x62b   : > { %8332 = vst [vmem:[%s13830_s29 + $0x240] sm:$0xff] %v7536_v33  ;;  %8334 = vst [vmem:[%s13830_s29 + $0x250] sm:$0xff] %v7985_v30  ;;  %v7538_v31 = vpop.f32.mrb[211].mxu0  ;;  %v7987_v34 = vpop.f32.mrb[211].mxu1 }
 0x62c   : > { %8333 = vst [vmem:[%s13830_s29 + $0x248] sm:$0xff] %v7538_v31  ;;  %8335 = vst [vmem:[%s13830_s29 + $0x258] sm:$0xff] %v7987_v34 }
 0x62e   : > { %v7542_v35 = vpop.f32.mrb[212].mxu0  ;;  %v7991_v36 = vpop.f32.mrb[212].mxu1 }
 0x62f   : > { %8336 = vst [vmem:[%s13830_s29 + $0x260] sm:$0xff] %v7542_v35  ;;  %8338 = vst [vmem:[%s13830_s29 + $0x270] sm:$0xff] %v7991_v36  ;;  %v7544_v37 = vpop.f32.mrb[213].mxu0  ;;  %v7993_v38 = vpop.f32.mrb[213].mxu1 }
 0x630   : > { %8337 = vst [vmem:[%s13830_s29 + $0x268] sm:$0xff] %v7544_v37  ;;  %8339 = vst [vmem:[%s13830_s29 + $0x278] sm:$0xff] %v7993_v38 }
 0x632   : > { %v7548_v44 = vpop.f32.mrb[214].mxu0  ;;  %v7997_v45 = vpop.f32.mrb[214].mxu1 }
 0x633   : > { %8340 = vst [vmem:[%s13830_s29 + $0x280] sm:$0xff] %v7548_v44  ;;  %8342 = vst [vmem:[%s13830_s29 + $0x290] sm:$0xff] %v7997_v45  ;;  %v7550_v47 = vpop.f32.mrb[215].mxu0  ;;  %v7999_v40 = vpop.f32.mrb[215].mxu1 }
 0x634   : > { %8341 = vst [vmem:[%s13830_s29 + $0x288] sm:$0xff] %v7550_v47  ;;  %8343 = vst [vmem:[%s13830_s29 + $0x298] sm:$0xff] %v7999_v40 }
 0x636   : > { %v7554_v39 = vpop.f32.mrb[216].mxu0  ;;  %v8003_v41 = vpop.f32.mrb[216].mxu1 }
 0x637   : > { %8344 = vst [vmem:[%s13830_s29 + $0x2a0] sm:$0xff] %v7554_v39  ;;  %8346 = vst [vmem:[%s13830_s29 + $0x2b0] sm:$0xff] %v8003_v41  ;;  %v7556_v48 = vpop.f32.mrb[217].mxu0  ;;  %v8005_v49 = vpop.f32.mrb[217].mxu1 }
 0x638   : > { %8345 = vst [vmem:[%s13830_s29 + $0x2a8] sm:$0xff] %v7556_v48  ;;  %8347 = vst [vmem:[%s13830_s29 + $0x2b8] sm:$0xff] %v8005_v49 }
 0x63a   : > { %v7560_v50 = vpop.f32.mrb[218].mxu0  ;;  %v8009_v53 = vpop.f32.mrb[218].mxu1 }
 0x63b   : > { %8348 = vst [vmem:[%s13830_s29 + $0x2c0] sm:$0xff] %v7560_v50  ;;  %8350 = vst [vmem:[%s13830_s29 + $0x2d0] sm:$0xff] %v8009_v53  ;;  %v7562_v54 = vpop.f32.mrb[219].mxu0  ;;  %v8011_v0 = vpop.f32.mrb[219].mxu1 }
 0x63c   : > { %8349 = vst [vmem:[%s13830_s29 + $0x2c8] sm:$0xff] %v7562_v54  ;;  %8351 = vst [vmem:[%s13830_s29 + $0x2d8] sm:$0xff] %v8011_v0 }
 0x63e   : > { %v7566_v3 = vpop.f32.mrb[220].mxu0  ;;  %v8015_v18 = vpop.f32.mrb[220].mxu1 }
 0x63f   : > { %8352 = vst [vmem:[%s13830_s29 + $0x2e0] sm:$0xff] %v7566_v3  ;;  %8354 = vst [vmem:[%s13830_s29 + $0x2f0] sm:$0xff] %v8015_v18  ;;  %v7568_v28 = vpop.f32.mrb[221].mxu0  ;;  %v8017_v32 = vpop.f32.mrb[221].mxu1 }
 0x640   : > { %8353 = vst [vmem:[%s13830_s29 + $0x2e8] sm:$0xff] %v7568_v28  ;;  %8355 = vst [vmem:[%s13830_s29 + $0x2f8] sm:$0xff] %v8017_v32 }
 0x642   : > { %v7572_v42 = vpop.f32.mrb[222].mxu0  ;;  %v8021_v46 = vpop.f32.mrb[222].mxu1 }
 0x643   : > { %8356 = vst [vmem:[%s13830_s29 + $0x300] sm:$0xff] %v7572_v42  ;;  %8358 = vst [vmem:[%s13830_s29 + $0x310] sm:$0xff] %v8021_v46  ;;  %v7574_v62 = vpop.f32.mrb[223].mxu0  ;;  %v8023_v59 = vpop.f32.mrb[223].mxu1 }
 0x644   : > { %8357 = vst [vmem:[%s13830_s29 + $0x308] sm:$0xff] %v7574_v62  ;;  %8359 = vst [vmem:[%s13830_s29 + $0x318] sm:$0xff] %v8023_v59 }
 0x646   : > { %v7578_v58 = vpop.f32.mrb[224].mxu0  ;;  %v8027_v14 = vpop.f32.mrb[224].mxu1 }
 0x647   : > { %8360 = vst [vmem:[%s13830_s29 + $0x320] sm:$0xff] %v7578_v58  ;;  %8362 = vst [vmem:[%s13830_s29 + $0x330] sm:$0xff] %v8027_v14  ;;  %v7580_v2 = vpop.f32.mrb[225].mxu0  ;;  %v8029_v5 = vpop.f32.mrb[225].mxu1 }
 0x648   : > { %8361 = vst [vmem:[%s13830_s29 + $0x328] sm:$0xff] %v7580_v2  ;;  %8363 = vst [vmem:[%s13830_s29 + $0x338] sm:$0xff] %v8029_v5 }
 0x64a   : > { %v7584_v7 = vpop.f32.mrb[226].mxu0  ;;  %v8033_v8 = vpop.f32.mrb[226].mxu1 }
 0x64b   : > { %8364 = vst [vmem:[%s13830_s29 + $0x340] sm:$0xff] %v7584_v7  ;;  %8366 = vst [vmem:[%s13830_s29 + $0x350] sm:$0xff] %v8033_v8  ;;  %v7586_v9 = vpop.f32.mrb[227].mxu0  ;;  %v8035_v10 = vpop.f32.mrb[227].mxu1 }
 0x64c   : > { %8365 = vst [vmem:[%s13830_s29 + $0x348] sm:$0xff] %v7586_v9  ;;  %8367 = vst [vmem:[%s13830_s29 + $0x358] sm:$0xff] %v8035_v10 }
 0x64e   : > { %v7590_v55 = vpop.f32.mrb[228].mxu0  ;;  %v8039_v13 = vpop.f32.mrb[228].mxu1 }
 0x64f   : > { %8368 = vst [vmem:[%s13830_s29 + $0x360] sm:$0xff] %v7590_v55  ;;  %8370 = vst [vmem:[%s13830_s29 + $0x370] sm:$0xff] %v8039_v13  ;;  %v7592_v15 = vpop.f32.mrb[229].mxu0  ;;  %v8041_v19 = vpop.f32.mrb[229].mxu1 }
 0x650   : > { %8369 = vst [vmem:[%s13830_s29 + $0x368] sm:$0xff] %v7592_v15  ;;  %8371 = vst [vmem:[%s13830_s29 + $0x378] sm:$0xff] %v8041_v19 }
 0x652   : > { %v7596_v20 = vpop.f32.mrb[230].mxu0  ;;  %v8045_v23 = vpop.f32.mrb[230].mxu1 }
 0x653   : > { %8372 = vst [vmem:[%s13830_s29 + $0x380] sm:$0xff] %v7596_v20  ;;  %8374 = vst [vmem:[%s13830_s29 + $0x390] sm:$0xff] %v8045_v23  ;;  %v7598_v24 = vpop.f32.mrb[231].mxu0  ;;  %v8047_v25 = vpop.f32.mrb[231].mxu1 }
 0x654   : > { %8373 = vst [vmem:[%s13830_s29 + $0x388] sm:$0xff] %v7598_v24  ;;  %8375 = vst [vmem:[%s13830_s29 + $0x398] sm:$0xff] %v8047_v25 }
 0x656   : > { %v7602_v12 = vpop.f32.mrb[232].mxu0  ;;  %v8051_v43 = vpop.f32.mrb[232].mxu1 }
 0x657   : > { %8376 = vst [vmem:[%s13830_s29 + $0x3a0] sm:$0xff] %v7602_v12  ;;  %8378 = vst [vmem:[%s13830_s29 + $0x3b0] sm:$0xff] %v8051_v43  ;;  %v7604_v63 = vpop.f32.mrb[233].mxu0  ;;  %v8053_v51 = vpop.f32.mrb[233].mxu1 }
 0x658   : > { %8377 = vst [vmem:[%s13830_s29 + $0x3a8] sm:$0xff] %v7604_v63  ;;  %8379 = vst [vmem:[%s13830_s29 + $0x3b8] sm:$0xff] %v8053_v51 }
 0x65a   : > { %v7608_v52 = vpop.f32.mrb[234].mxu0  ;;  %v8057_v56 = vpop.f32.mrb[234].mxu1 }
 0x65b   : > { %8380 = vst [vmem:[%s13830_s29 + $0x3c0] sm:$0xff] %v7608_v52  ;;  %8382 = vst [vmem:[%s13830_s29 + $0x3d0] sm:$0xff] %v8057_v56  ;;  %v7610_v57 = vpop.f32.mrb[235].mxu0  ;;  %v8059_v4 = vpop.f32.mrb[235].mxu1 }
 0x65c   : > { %8381 = vst [vmem:[%s13830_s29 + $0x3c8] sm:$0xff] %v7610_v57  ;;  %8383 = vst [vmem:[%s13830_s29 + $0x3d8] sm:$0xff] %v8059_v4 }
 0x65e   : > { %v7614_v1 = vpop.f32.mrb[236].mxu0  ;;  %v8063_v60 = vpop.f32.mrb[236].mxu1 }
 0x65f   : > { %8384 = vst [vmem:[%s13830_s29 + $0x3e0] sm:$0xff] %v7614_v1  ;;  %8386 = vst [vmem:[%s13830_s29 + $0x3f0] sm:$0xff] %v8063_v60  ;;  %v7616_v26 = vpop.f32.mrb[237].mxu0  ;;  %v8065_v61 = vpop.f32.mrb[237].mxu1 }
 0x660   : > { %8385 = vst [vmem:[%s13830_s29 + $0x3e8] sm:$0xff] %v7616_v26  ;;  %8387 = vst [vmem:[%s13830_s29 + $0x3f8] sm:$0xff] %v8065_v61 }
 0x662   : > { %v7620_v11 = vpop.f32.mrb[238].mxu0  ;;  %v8069_v29 = vpop.f32.mrb[238].mxu1 }
 0x663   : > { %8388 = vst [vmem:[%s13830_s29 + $0x400] sm:$0xff] %v7620_v11  ;;  %8390 = vst [vmem:[%s13830_s29 + $0x410] sm:$0xff] %v8069_v29  ;;  %v7622_v6 = vpop.f32.mrb[239].mxu0  ;;  %v8071_v27 = vpop.f32.mrb[239].mxu1 }
 0x664   : > { %8389 = vst [vmem:[%s13830_s29 + $0x408] sm:$0xff] %v7622_v6  ;;  %8391 = vst [vmem:[%s13830_s29 + $0x418] sm:$0xff] %v8071_v27 }
 0x665   : > { %10412 = shalt.err (!%p10409_p3)
}
 0x666   : > { %s10413_s6 = scalar_lea.hbm %s14038_s23, 32768  ;;  %s10417_s18 = scalar_lea.hbm %s14267_s15, 65536 }
 0x667   : > { %p10414_p4 = scmp.ne.s32.totalorder %s14038_s23, %s10413_s6  ;;  %p10418_p9 = scmp.lt.u32.totalorder %s14038_s23, %s14267_s15 }
 0x668   : > { %p10419_p10 = scmp.lt.u32.totalorder %s10417_s18, %s10413_s6  ;;  %p10421_p12 = scmp.lt.u32.totalorder %s10413_s6, %s14038_s23 }
 0x669   : > { %p10415_p7 = pnand %p10414_p4, %p10623_p5 }
 0x66a   : > { %p10420_p11 = por %p10419_p10, %p10418_p9 }
 0x66b   : > { %p10416_p8 = pneg %p10415_p7 }
 0x66c   : > { %p10422_p13 = por %p10421_p12, %p10420_p11 }
 0x66e   : > { %p10423_p0 = pnand %p10422_p13, %p10416_p8 }
 0x670   : > { %10426 = shalt.err (!%p10423_p0)
}
 0x671   : > { %s10497_s21 = smov 512   ;;  %s10498_s8 = smov 32   ;;  %v7626_v16 = vpop.f32.mrb[240].mxu0  ;;  %v8075_v17 = vpop.f32.mrb[240].mxu1 }
 0x672   : > { %10352 = dma.vmem_to_hbm [thread:$0]  (%p10623_p5), %s14041_s16, 32768, %s14038_s23, %s8517_s19, %s10497_s21, %s10497_s21, %s10498_s8   ;;  %v7628_v21 = vpop.f32.mrb[241].mxu0  ;;  %v8077_v22 = vpop.f32.mrb[241].mxu1 }
 0x673   : > { %8392 = vst [vmem:[%s13830_s29 + $0x420] sm:$0xff] %v7626_v16  ;;  %8394 = vst [vmem:[%s13830_s29 + $0x430] sm:$0xff] %v8075_v17  ;;  %v7632_v33 = vpop.f32.mrb[242].mxu0  ;;  %v8081_v30 = vpop.f32.mrb[242].mxu1  ;;  %s8551_s23 = sshll.u32 %s13830_s29, 4  ;;  %s14389_s20 = sld [smem:[#allocation36_spill]]  ;;  %s14202_s23 = int_to_ptr.vmem [resolvable:$true] %s8551_s23 }
 0x674   : > { %8393 = vst [vmem:[%s13830_s29 + $0x428] sm:$0xff] %v7628_v21  ;;  %8395 = vst [vmem:[%s13830_s29 + $0x438] sm:$0xff] %v8077_v22  ;;  %v7634_v31 = vpop.f32.mrb[243].mxu0  ;;  %v8083_v34 = vpop.f32.mrb[243].mxu1  ;;  %s8522_s27 = scalar_lea.sflag [#allocation5], %s13103_s30  ;;  %s10427_s28 = scalar_lea.vmem %s14202_s23, 32768 }
 0x675   : > { %8396 = vst [vmem:[%s13830_s29 + $0x440] sm:$0xff] %v7632_v33  ;;  %8398 = vst [vmem:[%s13830_s29 + $0x450] sm:$0xff] %v8081_v30  ;;  %v7638_v35 = vpop.f32.mrb[244].mxu0  ;;  %v8087_v36 = vpop.f32.mrb[244].mxu1  ;;  %p10428_p1 = scmp.ne.s32.totalorder %s14202_s23, %s10427_s28  ;;  %s10499_s25 = smov [#allocation4]  }
 0x676   : > { %8397 = vst [vmem:[%s13830_s29 + $0x448] sm:$0xff] %v7634_v31  ;;  %8399 = vst [vmem:[%s13830_s29 + $0x458] sm:$0xff] %v8083_v34  ;;  %v7640_v37 = vpop.f32.mrb[245].mxu0  ;;  %v8089_v38 = vpop.f32.mrb[245].mxu1 }
 0x677   : > { %8400 = vst [vmem:[%s13830_s29 + $0x460] sm:$0xff] %v7638_v35  ;;  %8402 = vst [vmem:[%s13830_s29 + $0x470] sm:$0xff] %v8087_v36  ;;  %v7644_v44 = vpop.f32.mrb[246].mxu0  ;;  %v8093_v45 = vpop.f32.mrb[246].mxu1  ;;  %p10429_p2 = pnand %p10428_p1, %p10623_p5 }
 0x678   : > { %8401 = vst [vmem:[%s13830_s29 + $0x468] sm:$0xff] %v7640_v37  ;;  %8403 = vst [vmem:[%s13830_s29 + $0x478] sm:$0xff] %v8089_v38  ;;  %v7646_v47 = vpop.f32.mrb[247].mxu0  ;;  %v8095_v40 = vpop.f32.mrb[247].mxu1 }
 0x679   : > { %8404 = vst [vmem:[%s13830_s29 + $0x480] sm:$0xff] %v7644_v44  ;;  %8406 = vst [vmem:[%s13830_s29 + $0x490] sm:$0xff] %v8093_v45  ;;  %v7650_v39 = vpop.f32.mrb[248].mxu0  ;;  %v8099_v41 = vpop.f32.mrb[248].mxu1  ;;  %s14200_s6 = scalar_lea.hbm %s14389_s20, %s9406_s24  ;;  %p10430_p3 = pneg %p10429_p2 }
 0x67a   : > { %8405 = vst [vmem:[%s13830_s29 + $0x488] sm:$0xff] %v7646_v47  ;;  %8407 = vst [vmem:[%s13830_s29 + $0x498] sm:$0xff] %v8095_v40  ;;  %v7652_v48 = vpop.f32.mrb[249].mxu0  ;;  %v8101_v49 = vpop.f32.mrb[249].mxu1  ;;  %s10431_s24 = sshll.u32 %s10499_s25, 4  ;;  %s10432_s24 = int_to_ptr.vmem [resolvable:$false] %s10431_s24 }
 0x67b   : > { %8408 = vst [vmem:[%s13830_s29 + $0x4a0] sm:$0xff] %v7650_v39  ;;  %8410 = vst [vmem:[%s13830_s29 + $0x4b0] sm:$0xff] %v8099_v41  ;;  %v7656_v50 = vpop.f32.mrb[250].mxu0  ;;  %v8105_v53 = vpop.f32.mrb[250].mxu1  ;;  %s10433_s18 = scalar_lea.vmem %s10432_s24, 65536  ;;  %p10434_p4 = scmp.lt.s32.totalorder %s14202_s23, %s10432_s24 }
 0x67c   : > { %8409 = vst [vmem:[%s13830_s29 + $0x4a8] sm:$0xff] %v7652_v48  ;;  %8411 = vst [vmem:[%s13830_s29 + $0x4b8] sm:$0xff] %v8101_v49  ;;  %v7658_v54 = vpop.f32.mrb[251].mxu0  ;;  %v8107_v0 = vpop.f32.mrb[251].mxu1  ;;  %p10435_p7 = scmp.lt.s32.totalorder %s10433_s18, %s10427_s28 }
 0x67d   : > { %8412 = vst [vmem:[%s13830_s29 + $0x4c0] sm:$0xff] %v7656_v50  ;;  %8414 = vst [vmem:[%s13830_s29 + $0x4d0] sm:$0xff] %v8105_v53 }
 0x67e   : > { %8413 = vst [vmem:[%s13830_s29 + $0x4c8] sm:$0xff] %v7658_v54  ;;  %8415 = vst [vmem:[%s13830_s29 + $0x4d8] sm:$0xff] %v8107_v0  ;;  %v7662_v3 = vpop.f32.mrb[252].mxu0  ;;  %v8111_v18 = vpop.f32.mrb[252].mxu1  ;;  %p10436_p8 = por %p10435_p7, %p10434_p4 }
 0x67f   : > { %8416 = vst [vmem:[%s13830_s29 + $0x4e0] sm:$0xff] %v7662_v3  ;;  %8418 = vst [vmem:[%s13830_s29 + $0x4f0] sm:$0xff] %v8111_v18  ;;  %v7664_v28 = vpop.f32.mrb[253].mxu0  ;;  %v8113_v32 = vpop.f32.mrb[253].mxu1 }
 0x680   : > { %8417 = vst [vmem:[%s13830_s29 + $0x4e8] sm:$0xff] %v7664_v28  ;;  %8419 = vst [vmem:[%s13830_s29 + $0x4f8] sm:$0xff] %v8113_v32  ;;  %p10437_p9 = pnand %p10436_p8, %p10430_p3 }
 0x682   : > { %v7668_v42 = vpop.f32.mrb[254].mxu0  ;;  %v8117_v46 = vpop.f32.mrb[254].mxu1 }
 0x683   : > { %8420 = vst [vmem:[%s13830_s29 + $0x500] sm:$0xff] %v7668_v42  ;;  %8422 = vst [vmem:[%s13830_s29 + $0x510] sm:$0xff] %v8117_v46  ;;  %v7670_v62 = vpop.f32.mrb[255].mxu0  ;;  %v8119_v59 = vpop.f32.mrb[255].mxu1 }
 0x684   : > { %8421 = vst [vmem:[%s13830_s29 + $0x508] sm:$0xff] %v7670_v62  ;;  %8423 = vst [vmem:[%s13830_s29 + $0x518] sm:$0xff] %v8119_v59 }
 0x686   : > { %v7674_v58 = vpop.f32.mrb[0].mxu0  ;;  %v8123_v14 = vpop.f32.mrb[0].mxu1 }
 0x687   : > { %8424 = vst [vmem:[%s13830_s29 + $0x520] sm:$0xff] %v7674_v58  ;;  %8426 = vst [vmem:[%s13830_s29 + $0x530] sm:$0xff] %v8123_v14  ;;  %v7676_v2 = vpop.f32.mrb[1].mxu0  ;;  %v8125_v5 = vpop.f32.mrb[1].mxu1 }
 0x688   : > { %8425 = vst [vmem:[%s13830_s29 + $0x528] sm:$0xff] %v7676_v2  ;;  %8427 = vst [vmem:[%s13830_s29 + $0x538] sm:$0xff] %v8125_v5 }
 0x68a   : > { %v7680_v7 = vpop.f32.mrb[2].mxu0  ;;  %v8129_v8 = vpop.f32.mrb[2].mxu1 }
 0x68b   : > { %8428 = vst [vmem:[%s13830_s29 + $0x540] sm:$0xff] %v7680_v7  ;;  %8430 = vst [vmem:[%s13830_s29 + $0x550] sm:$0xff] %v8129_v8  ;;  %v7682_v9 = vpop.f32.mrb[3].mxu0  ;;  %v8131_v10 = vpop.f32.mrb[3].mxu1 }
 0x68c   : > { %8429 = vst [vmem:[%s13830_s29 + $0x548] sm:$0xff] %v7682_v9  ;;  %8431 = vst [vmem:[%s13830_s29 + $0x558] sm:$0xff] %v8131_v10 }
 0x68e   : > { %v7686_v55 = vpop.f32.mrb[4].mxu0  ;;  %v8135_v13 = vpop.f32.mrb[4].mxu1 }
 0x68f   : > { %8432 = vst [vmem:[%s13830_s29 + $0x560] sm:$0xff] %v7686_v55  ;;  %8434 = vst [vmem:[%s13830_s29 + $0x570] sm:$0xff] %v8135_v13  ;;  %v7688_v15 = vpop.f32.mrb[5].mxu0  ;;  %v8137_v19 = vpop.f32.mrb[5].mxu1 }
 0x690   : > { %8433 = vst [vmem:[%s13830_s29 + $0x568] sm:$0xff] %v7688_v15  ;;  %8435 = vst [vmem:[%s13830_s29 + $0x578] sm:$0xff] %v8137_v19 }
 0x692   : > { %v7692_v20 = vpop.f32.mrb[6].mxu0  ;;  %v8141_v23 = vpop.f32.mrb[6].mxu1 }
 0x693   : > { %8436 = vst [vmem:[%s13830_s29 + $0x580] sm:$0xff] %v7692_v20  ;;  %8438 = vst [vmem:[%s13830_s29 + $0x590] sm:$0xff] %v8141_v23  ;;  %v7694_v24 = vpop.f32.mrb[7].mxu0  ;;  %v8143_v25 = vpop.f32.mrb[7].mxu1 }
 0x694   : > { %8437 = vst [vmem:[%s13830_s29 + $0x588] sm:$0xff] %v7694_v24  ;;  %8439 = vst [vmem:[%s13830_s29 + $0x598] sm:$0xff] %v8143_v25 }
 0x696   : > { %v7698_v12 = vpop.f32.mrb[8].mxu0  ;;  %v8147_v43 = vpop.f32.mrb[8].mxu1 }
 0x697   : > { %8440 = vst [vmem:[%s13830_s29 + $0x5a0] sm:$0xff] %v7698_v12  ;;  %8442 = vst [vmem:[%s13830_s29 + $0x5b0] sm:$0xff] %v8147_v43  ;;  %v7700_v63 = vpop.f32.mrb[9].mxu0  ;;  %v8149_v51 = vpop.f32.mrb[9].mxu1 }
 0x698   : > { %8441 = vst [vmem:[%s13830_s29 + $0x5a8] sm:$0xff] %v7700_v63  ;;  %8443 = vst [vmem:[%s13830_s29 + $0x5b8] sm:$0xff] %v8149_v51 }
 0x69a   : > { %v7704_v52 = vpop.f32.mrb[10].mxu0  ;;  %v8153_v56 = vpop.f32.mrb[10].mxu1 }
 0x69b   : > { %8444 = vst [vmem:[%s13830_s29 + $0x5c0] sm:$0xff] %v7704_v52  ;;  %8446 = vst [vmem:[%s13830_s29 + $0x5d0] sm:$0xff] %v8153_v56  ;;  %v7706_v57 = vpop.f32.mrb[11].mxu0  ;;  %v8155_v4 = vpop.f32.mrb[11].mxu1 }
 0x69c   : > { %8445 = vst [vmem:[%s13830_s29 + $0x5c8] sm:$0xff] %v7706_v57  ;;  %8447 = vst [vmem:[%s13830_s29 + $0x5d8] sm:$0xff] %v8155_v4 }
 0x69e   : > { %v7710_v1 = vpop.f32.mrb[12].mxu0  ;;  %v8159_v60 = vpop.f32.mrb[12].mxu1 }
 0x69f   : > { %8448 = vst [vmem:[%s13830_s29 + $0x5e0] sm:$0xff] %v7710_v1  ;;  %8450 = vst [vmem:[%s13830_s29 + $0x5f0] sm:$0xff] %v8159_v60  ;;  %v7712_v26 = vpop.f32.mrb[13].mxu0  ;;  %v8161_v61 = vpop.f32.mrb[13].mxu1 }
 0x6a0   : > { %8449 = vst [vmem:[%s13830_s29 + $0x5e8] sm:$0xff] %v7712_v26  ;;  %8451 = vst [vmem:[%s13830_s29 + $0x5f8] sm:$0xff] %v8161_v61 }
 0x6a2   : > { %v7716_v11 = vpop.f32.mrb[14].mxu0  ;;  %v8165_v29 = vpop.f32.mrb[14].mxu1 }
 0x6a3   : > { %8452 = vst [vmem:[%s13830_s29 + $0x600] sm:$0xff] %v7716_v11  ;;  %8454 = vst [vmem:[%s13830_s29 + $0x610] sm:$0xff] %v8165_v29  ;;  %v7718_v6 = vpop.f32.mrb[15].mxu0  ;;  %v8167_v27 = vpop.f32.mrb[15].mxu1 }
 0x6a4   : > { %8453 = vst [vmem:[%s13830_s29 + $0x608] sm:$0xff] %v7718_v6  ;;  %8455 = vst [vmem:[%s13830_s29 + $0x618] sm:$0xff] %v8167_v27 }
 0x6a6   : > { %v7722_v16 = vpop.f32.mrb[16].mxu0  ;;  %v8171_v17 = vpop.f32.mrb[16].mxu1 }
 0x6a7   : > { %8456 = vst [vmem:[%s13830_s29 + $0x620] sm:$0xff] %v7722_v16  ;;  %8458 = vst [vmem:[%s13830_s29 + $0x630] sm:$0xff] %v8171_v17  ;;  %v7724_v21 = vpop.f32.mrb[17].mxu0  ;;  %v8173_v22 = vpop.f32.mrb[17].mxu1 }
 0x6a8   : > { %8457 = vst [vmem:[%s13830_s29 + $0x628] sm:$0xff] %v7724_v21  ;;  %8459 = vst [vmem:[%s13830_s29 + $0x638] sm:$0xff] %v8173_v22 }
 0x6aa   : > { %v7728_v33 = vpop.f32.mrb[18].mxu0  ;;  %v8177_v30 = vpop.f32.mrb[18].mxu1 }
 0x6ab   : > { %8460 = vst [vmem:[%s13830_s29 + $0x640] sm:$0xff] %v7728_v33  ;;  %8462 = vst [vmem:[%s13830_s29 + $0x650] sm:$0xff] %v8177_v30  ;;  %v7730_v31 = vpop.f32.mrb[19].mxu0  ;;  %v8179_v34 = vpop.f32.mrb[19].mxu1 }
 0x6ac   : > { %8461 = vst [vmem:[%s13830_s29 + $0x648] sm:$0xff] %v7730_v31  ;;  %8463 = vst [vmem:[%s13830_s29 + $0x658] sm:$0xff] %v8179_v34 }
 0x6ae   : > { %v7734_v35 = vpop.f32.mrb[20].mxu0  ;;  %v8183_v36 = vpop.f32.mrb[20].mxu1 }
 0x6af   : > { %8464 = vst [vmem:[%s13830_s29 + $0x660] sm:$0xff] %v7734_v35  ;;  %8466 = vst [vmem:[%s13830_s29 + $0x670] sm:$0xff] %v8183_v36  ;;  %v7736_v37 = vpop.f32.mrb[21].mxu0  ;;  %v8185_v38 = vpop.f32.mrb[21].mxu1 }
 0x6b0   : > { %8465 = vst [vmem:[%s13830_s29 + $0x668] sm:$0xff] %v7736_v37  ;;  %8467 = vst [vmem:[%s13830_s29 + $0x678] sm:$0xff] %v8185_v38 }
 0x6b2   : > { %v7740_v44 = vpop.f32.mrb[22].mxu0  ;;  %v8189_v45 = vpop.f32.mrb[22].mxu1 }
 0x6b3   : > { %8468 = vst [vmem:[%s13830_s29 + $0x680] sm:$0xff] %v7740_v44  ;;  %8470 = vst [vmem:[%s13830_s29 + $0x690] sm:$0xff] %v8189_v45  ;;  %v7742_v47 = vpop.f32.mrb[23].mxu0  ;;  %v8191_v40 = vpop.f32.mrb[23].mxu1 }
 0x6b4   : > { %8469 = vst [vmem:[%s13830_s29 + $0x688] sm:$0xff] %v7742_v47  ;;  %8471 = vst [vmem:[%s13830_s29 + $0x698] sm:$0xff] %v8191_v40 }
 0x6b6   : > { %v7746_v39 = vpop.f32.mrb[24].mxu0  ;;  %v8195_v41 = vpop.f32.mrb[24].mxu1 }
 0x6b7   : > { %8472 = vst [vmem:[%s13830_s29 + $0x6a0] sm:$0xff] %v7746_v39  ;;  %8474 = vst [vmem:[%s13830_s29 + $0x6b0] sm:$0xff] %v8195_v41  ;;  %v7748_v48 = vpop.f32.mrb[25].mxu0  ;;  %v8197_v49 = vpop.f32.mrb[25].mxu1 }
 0x6b8   : > { %8473 = vst [vmem:[%s13830_s29 + $0x6a8] sm:$0xff] %v7748_v48  ;;  %8475 = vst [vmem:[%s13830_s29 + $0x6b8] sm:$0xff] %v8197_v49 }
 0x6ba   : > { %v7752_v50 = vpop.f32.mrb[26].mxu0  ;;  %v8201_v53 = vpop.f32.mrb[26].mxu1 }
 0x6bb   : > { %8476 = vst [vmem:[%s13830_s29 + $0x6c0] sm:$0xff] %v7752_v50  ;;  %8478 = vst [vmem:[%s13830_s29 + $0x6d0] sm:$0xff] %v8201_v53  ;;  %v7754_v54 = vpop.f32.mrb[27].mxu0  ;;  %v8203_v0 = vpop.f32.mrb[27].mxu1 }
 0x6bc   : > { %8477 = vst [vmem:[%s13830_s29 + $0x6c8] sm:$0xff] %v7754_v54  ;;  %8479 = vst [vmem:[%s13830_s29 + $0x6d8] sm:$0xff] %v8203_v0 }
 0x6be   : > { %v7758_v3 = vpop.f32.mrb[28].mxu0  ;;  %v8207_v18 = vpop.f32.mrb[28].mxu1 }
 0x6bf   : > { %8480 = vst [vmem:[%s13830_s29 + $0x6e0] sm:$0xff] %v7758_v3  ;;  %8482 = vst [vmem:[%s13830_s29 + $0x6f0] sm:$0xff] %v8207_v18  ;;  %v7760_v28 = vpop.f32.mrb[29].mxu0  ;;  %v8209_v32 = vpop.f32.mrb[29].mxu1 }
 0x6c0   : > { %8481 = vst [vmem:[%s13830_s29 + $0x6e8] sm:$0xff] %v7760_v28  ;;  %8483 = vst [vmem:[%s13830_s29 + $0x6f8] sm:$0xff] %v8209_v32 }
 0x6c2   : > { %v7764_v42 = vpop.f32.mrb[30].mxu0  ;;  %v8213_v46 = vpop.f32.mrb[30].mxu1 }
 0x6c3   : > { %8484 = vst [vmem:[%s13830_s29 + $0x700] sm:$0xff] %v7764_v42  ;;  %8486 = vst [vmem:[%s13830_s29 + $0x710] sm:$0xff] %v8213_v46  ;;  %v7766_v62 = vpop.f32.mrb[31].mxu0  ;;  %v8215_v59 = vpop.f32.mrb[31].mxu1 }
 0x6c4   : > { %8485 = vst [vmem:[%s13830_s29 + $0x708] sm:$0xff] %v7766_v62  ;;  %8487 = vst [vmem:[%s13830_s29 + $0x718] sm:$0xff] %v8215_v59 }
 0x6c6   : > { %v7770_v58 = vpop.f32.mrb[32].mxu0  ;;  %v8219_v14 = vpop.f32.mrb[32].mxu1 }
 0x6c7   : > { %8488 = vst [vmem:[%s13830_s29 + $0x720] sm:$0xff] %v7770_v58  ;;  %8490 = vst [vmem:[%s13830_s29 + $0x730] sm:$0xff] %v8219_v14  ;;  %v7772_v2 = vpop.f32.mrb[33].mxu0  ;;  %v8221_v5 = vpop.f32.mrb[33].mxu1 }
 0x6c8   : > { %8489 = vst [vmem:[%s13830_s29 + $0x728] sm:$0xff] %v7772_v2  ;;  %8491 = vst [vmem:[%s13830_s29 + $0x738] sm:$0xff] %v8221_v5 }
 0x6ca   : > { %v7776_v7 = vpop.f32.mrb[34].mxu0  ;;  %v8225_v8 = vpop.f32.mrb[34].mxu1 }
 0x6cb   : > { %8492 = vst [vmem:[%s13830_s29 + $0x740] sm:$0xff] %v7776_v7  ;;  %8494 = vst [vmem:[%s13830_s29 + $0x750] sm:$0xff] %v8225_v8  ;;  %v7778_v9 = vpop.f32.mrb[35].mxu0  ;;  %v8227_v10 = vpop.f32.mrb[35].mxu1 }
 0x6cc   : > { %8493 = vst [vmem:[%s13830_s29 + $0x748] sm:$0xff] %v7778_v9  ;;  %8495 = vst [vmem:[%s13830_s29 + $0x758] sm:$0xff] %v8227_v10 }
 0x6ce   : > { %v7782_v55 = vpop.f32.mrb[36].mxu0  ;;  %v8231_v13 = vpop.f32.mrb[36].mxu1 }
 0x6cf   : > { %8496 = vst [vmem:[%s13830_s29 + $0x760] sm:$0xff] %v7782_v55  ;;  %8498 = vst [vmem:[%s13830_s29 + $0x770] sm:$0xff] %v8231_v13  ;;  %v7784_v15 = vpop.f32.mrb[37].mxu0  ;;  %v8233_v19 = vpop.f32.mrb[37].mxu1 }
 0x6d0   : > { %8497 = vst [vmem:[%s13830_s29 + $0x768] sm:$0xff] %v7784_v15  ;;  %8499 = vst [vmem:[%s13830_s29 + $0x778] sm:$0xff] %v8233_v19 }
 0x6d2   : > { %v7788_v20 = vpop.f32.mrb[38].mxu0  ;;  %v8237_v23 = vpop.f32.mrb[38].mxu1 }
 0x6d3   : > { %8500 = vst [vmem:[%s13830_s29 + $0x780] sm:$0xff] %v7788_v20  ;;  %8502 = vst [vmem:[%s13830_s29 + $0x790] sm:$0xff] %v8237_v23  ;;  %v7790_v24 = vpop.f32.mrb[39].mxu0  ;;  %v8239_v25 = vpop.f32.mrb[39].mxu1 }
 0x6d4   : > { %8501 = vst [vmem:[%s13830_s29 + $0x788] sm:$0xff] %v7790_v24  ;;  %8503 = vst [vmem:[%s13830_s29 + $0x798] sm:$0xff] %v8239_v25 }
 0x6d6   : > { %v7794_v12 = vpop.f32.mrb[40].mxu0  ;;  %v8243_v43 = vpop.f32.mrb[40].mxu1 }
 0x6d7   : > { %8504 = vst [vmem:[%s13830_s29 + $0x7a0] sm:$0xff] %v7794_v12  ;;  %8506 = vst [vmem:[%s13830_s29 + $0x7b0] sm:$0xff] %v8243_v43  ;;  %v7796_v63 = vpop.f32.mrb[41].mxu0  ;;  %v8245_v51 = vpop.f32.mrb[41].mxu1 }
 0x6d8   : > { %8505 = vst [vmem:[%s13830_s29 + $0x7a8] sm:$0xff] %v7796_v63  ;;  %8507 = vst [vmem:[%s13830_s29 + $0x7b8] sm:$0xff] %v8245_v51 }
 0x6da   : > { %v7800_v52 = vpop.f32.mrb[42].mxu0  ;;  %v8249_v56 = vpop.f32.mrb[42].mxu1 }
 0x6db   : > { %8508 = vst [vmem:[%s13830_s29 + $0x7c0] sm:$0xff] %v7800_v52  ;;  %8510 = vst [vmem:[%s13830_s29 + $0x7d0] sm:$0xff] %v8249_v56  ;;  %v7802_v57 = vpop.f32.mrb[43].mxu0  ;;  %v8251_v4 = vpop.f32.mrb[43].mxu1 }
 0x6dc   : > { %8509 = vst [vmem:[%s13830_s29 + $0x7c8] sm:$0xff] %v7802_v57  ;;  %8511 = vst [vmem:[%s13830_s29 + $0x7d8] sm:$0xff] %v8251_v4 }
 0x6de   : > { %v7806_v1 = vpop.f32.mrb[44].mxu0  ;;  %v8255_v60 = vpop.f32.mrb[44].mxu1 }
 0x6df   : > { %8512 = vst [vmem:[%s13830_s29 + $0x7e0] sm:$0xff] %v7806_v1  ;;  %8514 = vst [vmem:[%s13830_s29 + $0x7f0] sm:$0xff] %v8255_v60  ;;  %v7808_v26 = vpop.f32.mrb[45].mxu0  ;;  %v8257_v61 = vpop.f32.mrb[45].mxu1 }
 0x6e0   : > { %8513 = vst [vmem:[%s13830_s29 + $0x7e8] sm:$0xff] %v7808_v26  ;;  %8515 = vst [vmem:[%s13830_s29 + $0x7f8] sm:$0xff] %v8257_v61 }
 0x6e1   : > { %10440 = shalt.err (!%p10437_p9)
}
 0x6e2   : > { %s10441_s29 = scalar_lea.hbm %s14200_s6, 32768  ;;  %s10445_s16 = scalar_lea.hbm %s14389_s20, 65536 }
 0x6e3   : > { %p10442_p10 = scmp.ne.s32.totalorder %s14200_s6, %s10441_s29  ;;  %p10446_p13 = scmp.lt.u32.totalorder %s14200_s6, %s14389_s20 }
 0x6e4   : > { %p10447_p0 = scmp.lt.u32.totalorder %s10445_s16, %s10441_s29  ;;  %p10449_p2 = scmp.lt.u32.totalorder %s10441_s29, %s14200_s6 }
 0x6e5   : > { %p10443_p11 = pnand %p10442_p10, %p10623_p5 }
 0x6e6   : > { %p10448_p1 = por %p10447_p0, %p10446_p13 }
 0x6e7   : > { %p10444_p12 = pneg %p10443_p11 }
 0x6e8   : > { %p10450_p3 = por %p10449_p2, %p10448_p1 }
 0x6ea   : > { %p10451_p4 = pnand %p10450_p3, %p10444_p12 }
 0x6ec   : > { %10454 = shalt.err (!%p10451_p4)
}
 0x6ed   : > { %10353 = dma.vmem_to_hbm [thread:$0]  (%p10623_p5), %s14202_s23, 32768, %s14200_s6, %s8522_s27, %s10497_s21, %s10497_s21, %s10498_s8  }
 0x6ee PF: > { %s14390_s28 = sld [smem:[#allocation10_spill]]  ;;  %s14391_s24 = sld [smem:[#allocation8_spill]] }
 0x6f4   : > { %p10363_p7 = scmp.ge.s32.totalorder %s14390_s28, 2  ;;  %s8566_s17 = sand.u32 1, %s14391_s24  }
 0x6f5   : > { %s8567_s29 = scalar_lea.sflag [#allocation3], %s8566_s17 }
 0x6f6   : > { %p10357_p8 = pnand %p10363_p7, %p10627_p6 }
 0x6f8   : > { %10472 = dma.done.wait (!%p10357_p8), %s8567_s29, 32768  }
 0x6f9   : > { %10474 = vsyncadd (!%p10357_p8), %s8567_s29, 4294934528  ;;  %s8576_s0 = scalar_lea.sflag [#allocation5], %s8566_s17 }
 0x6fa   : > { %10476 = dma.done.wait (!%p10357_p8), %s8576_s0, 32768  }
 0x6fb   : > { %10478 = vsyncadd (!%p10357_p8), %s8576_s0, 4294934528  ;;  %s14393_s24 = sld [smem:[#allocation11_spill]]  ;;  %s14394_s30 = sld [smem:[#allocation9_spill]] }
 0x6fc   : > { %s14395_s23 = sld [smem:[#allocation12_spill]]  ;;  %s14396_s21 = smov %s10485_s22 }
 0x701   : > { %p30_p5 = scmp.ge.s32.totalorder %s14393_s24, 4   ;;  %s14397_s22 = smov %s14394_s30 }
 0x703   :  { %32 = sbr.rel (!%p30_p5) target bundleno = 10 (0xa), region = 144 }
 0x70a   :  { %8581 = vsyncpa [#allocation3], 1 }
 0x70b   :  { %8583 = vsyncpa [#allocation3 + $0x1], 1 }
 0x70c   :  { %8584 = vsyncpa [#allocation5], 1 }
 0x70d   :  { %8586 = vsyncpa [#allocation5 + $0x1], 1 }

</bundles_post_ra>
